<compile_context>
chip_gen: v7x
topology: tpu7x:2x2x1
jax: 0.10.0
libtpu: 0.0.40
codegen_flags: <defaults>
</compile_context>

<pallas_src>
import jax
import jax.numpy as jnp
from jax import lax
from jax.experimental import pallas as pl
from jax.experimental.pallas import tpu as pltpu


# -------------------- helpers (host-side packing / padding) --------------------

def _round_up(n, m):
    return ((n + m - 1) // m) * m


def _pack_gate_cols(w, H, P):
    """(rows, 4H) with PyTorch gate order [i,f,g,o] -> (rows, 4P); gate k -> cols [k*P, k*P+H)."""
    rows = w.shape[0]
    out = jnp.zeros((rows, 4 * P), jnp.float32)
    for k in range(4):
        out = out.at[:, k * P:k * P + H].set(w[:, k * H:(k + 1) * H])
    return out


def _pad_rows(w, P):
    return jnp.zeros((P, w.shape[1]), jnp.float32).at[:w.shape[0], :].set(w)


# -------------------- fused Pallas kernel --------------------

def make_fused_lstm_kernel(T, Bp):
    """T timesteps, Bp padded batch. All feature dims padded to P (multiple of 128)."""

    def kernel(x_ref, w_ih_ref, w_hh_ref, b_ref, w_fc_ref, b_fc_ref, out_ref,
               seq_scr, proj_scr, h_scr, c_scr):
        # x_ref    : (T*Bp, P)      time-major, flattened
        # w_ih_ref : (L, P, 4P)     gate cols packed [i,f,g,o], each gate 128-lane aligned
        # w_hh_ref : (L, P, 4P)
        # b_ref    : (L, 1, 4P)     b_ih + b_hh pre-summed
        # w_fc_ref : (P, Op)
        # b_fc_ref : (1, Op)
        # out_ref  : (T*Bp, Op)
        # seq_scr  : (T*Bp, P)      current layer's sequence (input, then overwritten with output)
        # proj_scr : (T*Bp, 4P)     hoisted input projection for all timesteps
        # h_scr/c_scr : (Bp, P)     recurrent state
        L = w_ih_ref.shape[0]
        P = w_hh_ref.shape[1]

        seq_scr[...] = x_ref[...]

        for l in range(L):  # static, small; weights stay resident in VMEM
            w_hh = w_hh_ref[l]                                  # (P, 4P)

            # (1) Hoisted input projection + bias: one big MXU-friendly GEMM over T*Bp rows.
            proj_scr[...] = (jnp.dot(seq_scr[...], w_ih_ref[l],
                                     preferred_element_type=jnp.float32)
                             + b_ref[l])

            h_scr[...] = jnp.zeros_like(h_scr)
            c_scr[...] = jnp.zeros_like(c_scr)

            # (2) Serial recurrence: only (Bp, P) @ (P, 4P) per step remains.
            def step(t, carry):
                r0 = pl.multiple_of(t * Bp, Bp)
                h = h_scr[...]
                gates = (proj_scr[pl.ds(r0, Bp), :]
                         + jnp.dot(h, w_hh, preferred_element_type=jnp.float32))
                # gate slices are full 128-lane aligned tiles (P is a multiple of 128)
                i_g = jax.nn.sigmoid(gates[:, 0 * P:1 * P])
                f_g = jax.nn.sigmoid(gates[:, 1 * P:2 * P])
                g_g = jnp.tanh(gates[:, 2 * P:3 * P])
                o_g = jax.nn.sigmoid(gates[:, 3 * P:4 * P])
                c_new = f_g * c_scr[...] + i_g * g_g
                h_new = o_g * jnp.tanh(c_new)
                c_scr[...] = c_new
                h_scr[...] = h_new
                seq_scr[pl.ds(r0, Bp), :] = h_new               # lane-dense (Bp, P) store
                return carry

            lax.fori_loop(0, T, step, 0, unroll=True)

        # (3) Final FC over all timesteps in one GEMM, lane-dense (T*Bp, Op) store.
        out_ref[...] = (jnp.dot(seq_scr[...], w_fc_ref[...],
                                preferred_element_type=jnp.float32)
                        + b_fc_ref[...])

    return kernel


# -------------------- wrapper --------------------

_VMEM = pl.BlockSpec(memory_space=pltpu.MemorySpace.VMEM)


def lstm_sequence_model(x, layer_params, w_fc, b_fc):
    """x: (B, T, input_size) -> (B, T, output_size). Matches PyTorch LSTMSequenceModel.forward."""
    B, T, Din = x.shape
    H = layer_params[0][1].shape[0]
    O = w_fc.shape[1]

    P = _round_up(max(Din, H), 128)     # common lane-padded feature width
    Bp = _round_up(B, 8)                # f32 sublane count
    Op = _round_up(O, 128)

    # Pack / pad parameters (zeros in padded rows & gate columns keep padded h/c lanes exactly 0).
    w_ih_s, w_hh_s, b_s = [], [], []
    for (w_ih, w_hh, b) in layer_params:
        w_ih_s.append(_pad_rows(_pack_gate_cols(w_ih, H, P), P))
        w_hh_s.append(_pad_rows(_pack_gate_cols(w_hh, H, P), P))
        b_s.append(_pack_gate_cols(b.reshape(1, -1), H, P))
    w_ih_s = jnp.stack(w_ih_s)          # (L, P, 4P)
    w_hh_s = jnp.stack(w_hh_s)          # (L, P, 4P)
    b_s = jnp.stack(b_s)                # (L, 1, 4P)

    w_fc_p = jnp.zeros((P, Op), jnp.float32).at[:H, :O].set(w_fc)
    b_fc_p = jnp.zeros((1, Op), jnp.float32).at[0, :O].set(b_fc)

    # Time-major, batch/feature padded, flattened to 2-D (no in-kernel reshapes needed).
    x_tm = jnp.transpose(x, (1, 0, 2))                                    # (T, B, Din)
    x_p = jnp.zeros((T, Bp, P), jnp.float32).at[:, :B, :Din].set(x_tm)
    x2d = x_p.reshape(T * Bp, P)

    kernel = make_fused_lstm_kernel(T, Bp)
    out2d = pl.pallas_call(
        kernel,
        out_shape=jax.ShapeDtypeStruct((T * Bp, Op), jnp.float32),
        in_specs=[_VMEM] * 6,
        out_specs=_VMEM,
        scratch_shapes=[
            pltpu.VMEM((T * Bp, P), jnp.float32),       # sequence buffer
            pltpu.VMEM((T * Bp, 4 * P), jnp.float32),   # hoisted projection
            pltpu.VMEM((Bp, P), jnp.float32),           # h
            pltpu.VMEM((Bp, P), jnp.float32),           # c
        ],
        compiler_params=pltpu.CompilerParams(vmem_limit_bytes=32 * 1024 * 1024),
    )(x2d, w_ih_s, w_hh_s, b_s, w_fc_p, b_fc_p)

    out = out2d.reshape(T, Bp, Op)[:, :B, :O]           # drop batch/lane padding
    return jnp.transpose(out, (1, 0, 2))                # back to (B, T, O)


# -------------------- pure-JAX reference --------------------

def lstm_sequence_model_ref(x, layer_params, w_fc, b_fc):
    h_seq = x                                           # (B, T, D)
    for (w_ih, w_hh, b) in layer_params:
        B = h_seq.shape[0]
        H = w_hh.shape[0]

        def step(carry, xt):
            h, c = carry
            gates = xt @ w_ih + h @ w_hh + b
            i_g = jax.nn.sigmoid(gates[:, 0 * H:1 * H])
            f_g = jax.nn.sigmoid(gates[:, 1 * H:2 * H])
            g_g = jnp.tanh(gates[:, 2 * H:3 * H])
            o_g = jax.nn.sigmoid(gates[:, 3 * H:4 * H])
            c = f_g * c + i_g * g_g
            h = o_g * jnp.tanh(c)
            return (h, c), h

        init = (jnp.zeros((B, H), jnp.float32), jnp.zeros((B, H), jnp.float32))
        _, ys = lax.scan(step, init, jnp.transpose(h_seq, (1, 0, 2)))
        h_seq = jnp.transpose(ys, (1, 0, 2))
    return h_seq @ w_fc + b_fc


# -------------------- main --------------------

if __name__ == "__main__":
    B, T = 2, 8
    INPUT_SIZE, HIDDEN_SIZE, NUM_LAYERS, OUTPUT_SIZE = 16, 32, 2, 8

    key = jax.random.PRNGKey(0)
    k_x, k_p = jax.random.split(key)
    x = jax.random.normal(k_x, (B, T, INPUT_SIZE), dtype=jnp.float32)

    # Deterministic parameter init (uniform(-1/sqrt(H), 1/sqrt(H)) like PyTorch).
    bound = 1.0 / jnp.sqrt(jnp.float32(HIDDEN_SIZE))
    layer_params = []
    pk = k_p
    for layer in range(NUM_LAYERS):
        din = INPUT_SIZE if layer == 0 else HIDDEN_SIZE
        pk, k1, k2, k3, k4 = jax.random.split(pk, 5)
        w_ih = jax.random.uniform(k1, (din, 4 * HIDDEN_SIZE), jnp.float32, -bound, bound)
        w_hh = jax.random.uniform(k2, (HIDDEN_SIZE, 4 * HIDDEN_SIZE), jnp.float32, -bound, bound)
        b_ih = jax.random.uniform(k3, (4 * HIDDEN_SIZE,), jnp.float32, -bound, bound)
        b_hh = jax.random.uniform(k4, (4 * HIDDEN_SIZE,), jnp.float32, -bound, bound)
        layer_params.append((w_ih, w_hh, b_ih + b_hh))
    pk, k5, k6 = jax.random.split(pk, 3)
    w_fc = jax.random.uniform(k5, (HIDDEN_SIZE, OUTPUT_SIZE), jnp.float32, -bound, bound)
    b_fc = jax.random.uniform(k6, (OUTPUT_SIZE,), jnp.float32, -bound, bound)

    out = lstm_sequence_model(x, layer_params, w_fc, b_fc)
    out = jax.block_until_ready(out)

    ref = lstm_sequence_model_ref(x, layer_params, w_fc, b_fc)
    assert out.shape == (B, T, OUTPUT_SIZE), out.shape
    assert jnp.allclose(out, ref, atol=2e-5, rtol=2e-5), "mismatch vs. pure-JAX reference"

    print("KERNEL_OK")
</pallas_src>

<mosaic_0001>
module attributes {stable_mosaic.version = 11 : i64} {
  func.func @kernel(%arg0: memref<64x128xf32, #tpu.memory_space<vmem>>, %arg1: memref<2x128x512xf32, #tpu.memory_space<vmem>>, %arg2: memref<2x128x512xf32, #tpu.memory_space<vmem>>, %arg3: memref<2x1x512xf32, #tpu.memory_space<vmem>>, %arg4: memref<128x128xf32, #tpu.memory_space<vmem>>, %arg5: memref<1x128xf32, #tpu.memory_space<vmem>>, %arg6: memref<64x128xf32, #tpu.memory_space<vmem>>, %arg7: memref<64x128xf32, #tpu.memory_space<vmem>>, %arg8: memref<64x512xf32, #tpu.memory_space<vmem>>, %arg9: memref<8x128xf32, #tpu.memory_space<vmem>>, %arg10: memref<8x128xf32, #tpu.memory_space<vmem>>) attributes {dimension_semantics = [], scalar_prefetch = 0 : i64, scratch_operands = 4 : i64, tpu.core_type = #tpu.core_type<tc>} {
    %c0 = arith.constant 0 : index
    %c0_0 = arith.constant 0 : index
    %0 = vector.load %arg0[%c0, %c0_0] : memref<64x128xf32, #tpu.memory_space<vmem>>, vector<64x128xf32>
    %c0_1 = arith.constant 0 : index
    %c0_2 = arith.constant 0 : index
    %1 = vector.load %arg7[%c0_1, %c0_2] : memref<64x128xf32, #tpu.memory_space<vmem>>, vector<64x128xf32>
    tpu.vector_store %arg7[%c0_1, %c0_2], %0 {strides = array<i32>} : memref<64x128xf32, #tpu.memory_space<vmem>>, vector<64x128xf32>,
    %c0_3 = arith.constant 0 : index
    %c0_4 = arith.constant 0 : index
    %c0_5 = arith.constant 0 : index
    %2 = vector.load %arg2[%c0_3, %c0_4, %c0_5] : memref<2x128x512xf32, #tpu.memory_space<vmem>>, vector<1x128x512xf32>
    %3 = vector.shape_cast %2 : vector<1x128x512xf32> to vector<128x512xf32>
    %c0_6 = arith.constant 0 : index
    %c0_7 = arith.constant 0 : index
    %4 = vector.load %arg7[%c0_6, %c0_7] : memref<64x128xf32, #tpu.memory_space<vmem>>, vector<64x128xf32>
    %c0_8 = arith.constant 0 : index
    %c0_9 = arith.constant 0 : index
    %c0_10 = arith.constant 0 : index
    %5 = vector.load %arg1[%c0_8, %c0_9, %c0_10] : memref<2x128x512xf32, #tpu.memory_space<vmem>>, vector<1x128x512xf32>
    %6 = vector.shape_cast %5 : vector<1x128x512xf32> to vector<128x512xf32>
    %cst = arith.constant dense<0.000000e+00> : vector<64x512xf32>
    %7 = tpu.matmul %4, %6, %cst {dimension_numbers = #tpu.dot_dimension_numbers<[1], [0], [0], [1], [0, 0, 1, 1], [], []>} : vector<64x128xf32>, vector<128x512xf32>, vector<64x512xf32> -> vector<64x512xf32>
    %c0_11 = arith.constant 0 : index
    %c0_12 = arith.constant 0 : index
    %c0_13 = arith.constant 0 : index
    %8 = vector.load %arg3[%c0_11, %c0_12, %c0_13] : memref<2x1x512xf32, #tpu.memory_space<vmem>>, vector<1x1x512xf32>
    %9 = vector.shape_cast %8 : vector<1x1x512xf32> to vector<1x512xf32>
    %10 = vector.broadcast %9 : vector<1x512xf32> to vector<64x512xf32>
    %11 = arith.addf %7, %10 : vector<64x512xf32>
    %c0_14 = arith.constant 0 : index
    %c0_15 = arith.constant 0 : index
    %12 = vector.load %arg8[%c0_14, %c0_15] : memref<64x512xf32, #tpu.memory_space<vmem>>, vector<64x512xf32>
    tpu.vector_store %arg8[%c0_14, %c0_15], %11 {strides = array<i32>} : memref<64x512xf32, #tpu.memory_space<vmem>>, vector<64x512xf32>,
    %cst_16 = arith.constant 0.000000e+00 : f32
    %13 = vector.broadcast %cst_16 : f32 to vector<8x128xf32>
    %c0_17 = arith.constant 0 : index
    %c0_18 = arith.constant 0 : index
    %14 = vector.load %arg9[%c0_17, %c0_18] : memref<8x128xf32, #tpu.memory_space<vmem>>, vector<8x128xf32>
    tpu.vector_store %arg9[%c0_17, %c0_18], %13 {strides = array<i32>} : memref<8x128xf32, #tpu.memory_space<vmem>>, vector<8x128xf32>,
    %cst_19 = arith.constant 0.000000e+00 : f32
    %15 = vector.broadcast %cst_19 : f32 to vector<8x128xf32>
    %c0_20 = arith.constant 0 : index
    %c0_21 = arith.constant 0 : index
    %16 = vector.load %arg10[%c0_20, %c0_21] : memref<8x128xf32, #tpu.memory_space<vmem>>, vector<8x128xf32>
    tpu.vector_store %arg10[%c0_20, %c0_21], %15 {strides = array<i32>} : memref<8x128xf32, #tpu.memory_space<vmem>>, vector<8x128xf32>,
    %c0_i32 = arith.constant 0 : i32
    %c8_i32 = arith.constant 8 : i32
    %17 = arith.muli %c0_i32, %c8_i32 : i32
    %18 = tpu.assume_multiple %17, 8 : i32
    %c0_22 = arith.constant 0 : index
    %c0_23 = arith.constant 0 : index
    %19 = vector.load %arg9[%c0_22, %c0_23] : memref<8x128xf32, #tpu.memory_space<vmem>>, vector<8x128xf32>
    %20 = arith.index_cast %18 : i32 to index
    %c0_24 = arith.constant 0 : index
    %21 = vector.load %arg8[%20, %c0_24] : memref<64x512xf32, #tpu.memory_space<vmem>>, vector<8x512xf32>
    %cst_25 = arith.constant dense<0.000000e+00> : vector<8x512xf32>
    %22 = tpu.matmul %19, %3, %cst_25 {dimension_numbers = #tpu.dot_dimension_numbers<[1], [0], [0], [1], [0, 0, 1, 1], [], []>} : vector<8x128xf32>, vector<128x512xf32>, vector<8x512xf32> -> vector<8x512xf32>
    %23 = arith.addf %21, %22 : vector<8x512xf32>
    %24 = vector.extract_strided_slice %23 {offsets = [0, 0], sizes = [8, 128], strides = [1, 1]} : vector<8x512xf32> to vector<8x128xf32>
    %25 = arith.negf %24 : vector<8x128xf32>
    %26 = math.exp %25 : vector<8x128xf32>
    %cst_26 = arith.constant 1.000000e+00 : f32
    %27 = vector.broadcast %cst_26 : f32 to vector<8x128xf32>
    %28 = arith.addf %27, %26 : vector<8x128xf32>
    %29 = arith.divf %27, %28 : vector<8x128xf32>
    %30 = vector.extract_strided_slice %23 {offsets = [0, 128], sizes = [8, 128], strides = [1, 1]} : vector<8x512xf32> to vector<8x128xf32>
    %31 = arith.negf %30 : vector<8x128xf32>
    %32 = math.exp %31 : vector<8x128xf32>
    %cst_27 = arith.constant 1.000000e+00 : f32
    %33 = vector.broadcast %cst_27 : f32 to vector<8x128xf32>
    %34 = arith.addf %33, %32 : vector<8x128xf32>
    %35 = arith.divf %33, %34 : vector<8x128xf32>
    %36 = vector.extract_strided_slice %23 {offsets = [0, 256], sizes = [8, 128], strides = [1, 1]} : vector<8x512xf32> to vector<8x128xf32>
    %37 = math.tanh %36 : vector<8x128xf32>
    %38 = vector.extract_strided_slice %23 {offsets = [0, 384], sizes = [8, 128], strides = [1, 1]} : vector<8x512xf32> to vector<8x128xf32>
    %39 = arith.negf %38 : vector<8x128xf32>
    %40 = math.exp %39 : vector<8x128xf32>
    %cst_28 = arith.constant 1.000000e+00 : f32
    %41 = vector.broadcast %cst_28 : f32 to vector<8x128xf32>
    %42 = arith.addf %41, %40 : vector<8x128xf32>
    %43 = arith.divf %41, %42 : vector<8x128xf32>
    %c0_29 = arith.constant 0 : index
    %c0_30 = arith.constant 0 : index
    %44 = vector.load %arg10[%c0_29, %c0_30] : memref<8x128xf32, #tpu.memory_space<vmem>>, vector<8x128xf32>
    %45 = arith.mulf %35, %44 : vector<8x128xf32>
    %46 = arith.mulf %29, %37 : vector<8x128xf32>
    %47 = arith.addf %45, %46 : vector<8x128xf32>
    %48 = math.tanh %47 : vector<8x128xf32>
    %49 = arith.mulf %43, %48 : vector<8x128xf32>
    %c0_31 = arith.constant 0 : index
    %c0_32 = arith.constant 0 : index
    %50 = vector.load %arg10[%c0_31, %c0_32] : memref<8x128xf32, #tpu.memory_space<vmem>>, vector<8x128xf32>
    tpu.vector_store %arg10[%c0_31, %c0_32], %47 {strides = array<i32>} : memref<8x128xf32, #tpu.memory_space<vmem>>, vector<8x128xf32>,
    %c0_33 = arith.constant 0 : index
    %c0_34 = arith.constant 0 : index
    %51 = vector.load %arg9[%c0_33, %c0_34] : memref<8x128xf32, #tpu.memory_space<vmem>>, vector<8x128xf32>
    tpu.vector_store %arg9[%c0_33, %c0_34], %49 {strides = array<i32>} : memref<8x128xf32, #tpu.memory_space<vmem>>, vector<8x128xf32>,
    %52 = arith.index_cast %18 : i32 to index
    %c0_35 = arith.constant 0 : index
    %53 = vector.load %arg7[%52, %c0_35] : memref<64x128xf32, #tpu.memory_space<vmem>>, vector<8x128xf32>
    tpu.vector_store %arg7[%52, %c0_35], %49 {strides = array<i32>} : memref<64x128xf32, #tpu.memory_space<vmem>>, vector<8x128xf32>,
    %c1_i32 = arith.constant 1 : i32
    %c8_i32_36 = arith.constant 8 : i32
    %54 = arith.muli %c1_i32, %c8_i32_36 : i32
    %55 = tpu.assume_multiple %54, 8 : i32
    %c0_37 = arith.constant 0 : index
    %c0_38 = arith.constant 0 : index
    %56 = vector.load %arg9[%c0_37, %c0_38] : memref<8x128xf32, #tpu.memory_space<vmem>>, vector<8x128xf32>
    %57 = arith.index_cast %55 : i32 to index
    %c0_39 = arith.constant 0 : index
    %58 = vector.load %arg8[%57, %c0_39] : memref<64x512xf32, #tpu.memory_space<vmem>>, vector<8x512xf32>
    %cst_40 = arith.constant dense<0.000000e+00> : vector<8x512xf32>
    %59 = tpu.matmul %56, %3, %cst_40 {dimension_numbers = #tpu.dot_dimension_numbers<[1], [0], [0], [1], [0, 0, 1, 1], [], []>} : vector<8x128xf32>, vector<128x512xf32>, vector<8x512xf32> -> vector<8x512xf32>
    %60 = arith.addf %58, %59 : vector<8x512xf32>
    %61 = vector.extract_strided_slice %60 {offsets = [0, 0], sizes = [8, 128], strides = [1, 1]} : vector<8x512xf32> to vector<8x128xf32>
    %62 = arith.negf %61 : vector<8x128xf32>
    %63 = math.exp %62 : vector<8x128xf32>
    %cst_41 = arith.constant 1.000000e+00 : f32
    %64 = vector.broadcast %cst_41 : f32 to vector<8x128xf32>
    %65 = arith.addf %64, %63 : vector<8x128xf32>
    %66 = arith.divf %64, %65 : vector<8x128xf32>
    %67 = vector.extract_strided_slice %60 {offsets = [0, 128], sizes = [8, 128], strides = [1, 1]} : vector<8x512xf32> to vector<8x128xf32>
    %68 = arith.negf %67 : vector<8x128xf32>
    %69 = math.exp %68 : vector<8x128xf32>
    %cst_42 = arith.constant 1.000000e+00 : f32
    %70 = vector.broadcast %cst_42 : f32 to vector<8x128xf32>
    %71 = arith.addf %70, %69 : vector<8x128xf32>
    %72 = arith.divf %70, %71 : vector<8x128xf32>
    %73 = vector.extract_strided_slice %60 {offsets = [0, 256], sizes = [8, 128], strides = [1, 1]} : vector<8x512xf32> to vector<8x128xf32>
    %74 = math.tanh %73 : vector<8x128xf32>
    %75 = vector.extract_strided_slice %60 {offsets = [0, 384], sizes = [8, 128], strides = [1, 1]} : vector<8x512xf32> to vector<8x128xf32>
    %76 = arith.negf %75 : vector<8x128xf32>
    %77 = math.exp %76 : vector<8x128xf32>
    %cst_43 = arith.constant 1.000000e+00 : f32
    %78 = vector.broadcast %cst_43 : f32 to vector<8x128xf32>
    %79 = arith.addf %78, %77 : vector<8x128xf32>
    %80 = arith.divf %78, %79 : vector<8x128xf32>
    %c0_44 = arith.constant 0 : index
    %c0_45 = arith.constant 0 : index
    %81 = vector.load %arg10[%c0_44, %c0_45] : memref<8x128xf32, #tpu.memory_space<vmem>>, vector<8x128xf32>
    %82 = arith.mulf %72, %81 : vector<8x128xf32>
    %83 = arith.mulf %66, %74 : vector<8x128xf32>
    %84 = arith.addf %82, %83 : vector<8x128xf32>
    %85 = math.tanh %84 : vector<8x128xf32>
    %86 = arith.mulf %80, %85 : vector<8x128xf32>
    %c0_46 = arith.constant 0 : index
    %c0_47 = arith.constant 0 : index
    %87 = vector.load %arg10[%c0_46, %c0_47] : memref<8x128xf32, #tpu.memory_space<vmem>>, vector<8x128xf32>
    tpu.vector_store %arg10[%c0_46, %c0_47], %84 {strides = array<i32>} : memref<8x128xf32, #tpu.memory_space<vmem>>, vector<8x128xf32>,
    %c0_48 = arith.constant 0 : index
    %c0_49 = arith.constant 0 : index
    %88 = vector.load %arg9[%c0_48, %c0_49] : memref<8x128xf32, #tpu.memory_space<vmem>>, vector<8x128xf32>
    tpu.vector_store %arg9[%c0_48, %c0_49], %86 {strides = array<i32>} : memref<8x128xf32, #tpu.memory_space<vmem>>, vector<8x128xf32>,
    %89 = arith.index_cast %55 : i32 to index
    %c0_50 = arith.constant 0 : index
    %90 = vector.load %arg7[%89, %c0_50] : memref<64x128xf32, #tpu.memory_space<vmem>>, vector<8x128xf32>
    tpu.vector_store %arg7[%89, %c0_50], %86 {strides = array<i32>} : memref<64x128xf32, #tpu.memory_space<vmem>>, vector<8x128xf32>,
    %c2_i32 = arith.constant 2 : i32
    %c8_i32_51 = arith.constant 8 : i32
    %91 = arith.muli %c2_i32, %c8_i32_51 : i32
    %92 = tpu.assume_multiple %91, 8 : i32
    %c0_52 = arith.constant 0 : index
    %c0_53 = arith.constant 0 : index
    %93 = vector.load %arg9[%c0_52, %c0_53] : memref<8x128xf32, #tpu.memory_space<vmem>>, vector<8x128xf32>
    %94 = arith.index_cast %92 : i32 to index
    %c0_54 = arith.constant 0 : index
    %95 = vector.load %arg8[%94, %c0_54] : memref<64x512xf32, #tpu.memory_space<vmem>>, vector<8x512xf32>
    %cst_55 = arith.constant dense<0.000000e+00> : vector<8x512xf32>
    %96 = tpu.matmul %93, %3, %cst_55 {dimension_numbers = #tpu.dot_dimension_numbers<[1], [0], [0], [1], [0, 0, 1, 1], [], []>} : vector<8x128xf32>, vector<128x512xf32>, vector<8x512xf32> -> vector<8x512xf32>
    %97 = arith.addf %95, %96 : vector<8x512xf32>
    %98 = vector.extract_strided_slice %97 {offsets = [0, 0], sizes = [8, 128], strides = [1, 1]} : vector<8x512xf32> to vector<8x128xf32>
    %99 = arith.negf %98 : vector<8x128xf32>
    %100 = math.exp %99 : vector<8x128xf32>
    %cst_56 = arith.constant 1.000000e+00 : f32
    %101 = vector.broadcast %cst_56 : f32 to vector<8x128xf32>
    %102 = arith.addf %101, %100 : vector<8x128xf32>
    %103 = arith.divf %101, %102 : vector<8x128xf32>
    %104 = vector.extract_strided_slice %97 {offsets = [0, 128], sizes = [8, 128], strides = [1, 1]} : vector<8x512xf32> to vector<8x128xf32>
    %105 = arith.negf %104 : vector<8x128xf32>
    %106 = math.exp %105 : vector<8x128xf32>
    %cst_57 = arith.constant 1.000000e+00 : f32
    %107 = vector.broadcast %cst_57 : f32 to vector<8x128xf32>
    %108 = arith.addf %107, %106 : vector<8x128xf32>
    %109 = arith.divf %107, %108 : vector<8x128xf32>
    %110 = vector.extract_strided_slice %97 {offsets = [0, 256], sizes = [8, 128], strides = [1, 1]} : vector<8x512xf32> to vector<8x128xf32>
    %111 = math.tanh %110 : vector<8x128xf32>
    %112 = vector.extract_strided_slice %97 {offsets = [0, 384], sizes = [8, 128], strides = [1, 1]} : vector<8x512xf32> to vector<8x128xf32>
    %113 = arith.negf %112 : vector<8x128xf32>
    %114 = math.exp %113 : vector<8x128xf32>
    %cst_58 = arith.constant 1.000000e+00 : f32
    %115 = vector.broadcast %cst_58 : f32 to vector<8x128xf32>
    %116 = arith.addf %115, %114 : vector<8x128xf32>
    %117 = arith.divf %115, %116 : vector<8x128xf32>
    %c0_59 = arith.constant 0 : index
    %c0_60 = arith.constant 0 : index
    %118 = vector.load %arg10[%c0_59, %c0_60] : memref<8x128xf32, #tpu.memory_space<vmem>>, vector<8x128xf32>
    %119 = arith.mulf %109, %118 : vector<8x128xf32>
    %120 = arith.mulf %103, %111 : vector<8x128xf32>
    %121 = arith.addf %119, %120 : vector<8x128xf32>
    %122 = math.tanh %121 : vector<8x128xf32>
    %123 = arith.mulf %117, %122 : vector<8x128xf32>
    %c0_61 = arith.constant 0 : index
    %c0_62 = arith.constant 0 : index
    %124 = vector.load %arg10[%c0_61, %c0_62] : memref<8x128xf32, #tpu.memory_space<vmem>>, vector<8x128xf32>
    tpu.vector_store %arg10[%c0_61, %c0_62], %121 {strides = array<i32>} : memref<8x128xf32, #tpu.memory_space<vmem>>, vector<8x128xf32>,
    %c0_63 = arith.constant 0 : index
    %c0_64 = arith.constant 0 : index
    %125 = vector.load %arg9[%c0_63, %c0_64] : memref<8x128xf32, #tpu.memory_space<vmem>>, vector<8x128xf32>
    tpu.vector_store %arg9[%c0_63, %c0_64], %123 {strides = array<i32>} : memref<8x128xf32, #tpu.memory_space<vmem>>, vector<8x128xf32>,
    %126 = arith.index_cast %92 : i32 to index
    %c0_65 = arith.constant 0 : index
    %127 = vector.load %arg7[%126, %c0_65] : memref<64x128xf32, #tpu.memory_space<vmem>>, vector<8x128xf32>
    tpu.vector_store %arg7[%126, %c0_65], %123 {strides = array<i32>} : memref<64x128xf32, #tpu.memory_space<vmem>>, vector<8x128xf32>,
    %c3_i32 = arith.constant 3 : i32
    %c8_i32_66 = arith.constant 8 : i32
    %128 = arith.muli %c3_i32, %c8_i32_66 : i32
    %129 = tpu.assume_multiple %128, 8 : i32
    %c0_67 = arith.constant 0 : index
    %c0_68 = arith.constant 0 : index
    %130 = vector.load %arg9[%c0_67, %c0_68] : memref<8x128xf32, #tpu.memory_space<vmem>>, vector<8x128xf32>
    %131 = arith.index_cast %129 : i32 to index
    %c0_69 = arith.constant 0 : index
    %132 = vector.load %arg8[%131, %c0_69] : memref<64x512xf32, #tpu.memory_space<vmem>>, vector<8x512xf32>
    %cst_70 = arith.constant dense<0.000000e+00> : vector<8x512xf32>
    %133 = tpu.matmul %130, %3, %cst_70 {dimension_numbers = #tpu.dot_dimension_numbers<[1], [0], [0], [1], [0, 0, 1, 1], [], []>} : vector<8x128xf32>, vector<128x512xf32>, vector<8x512xf32> -> vector<8x512xf32>
    %134 = arith.addf %132, %133 : vector<8x512xf32>
    %135 = vector.extract_strided_slice %134 {offsets = [0, 0], sizes = [8, 128], strides = [1, 1]} : vector<8x512xf32> to vector<8x128xf32>
    %136 = arith.negf %135 : vector<8x128xf32>
    %137 = math.exp %136 : vector<8x128xf32>
    %cst_71 = arith.constant 1.000000e+00 : f32
    %138 = vector.broadcast %cst_71 : f32 to vector<8x128xf32>
    %139 = arith.addf %138, %137 : vector<8x128xf32>
    %140 = arith.divf %138, %139 : vector<8x128xf32>
    %141 = vector.extract_strided_slice %134 {offsets = [0, 128], sizes = [8, 128], strides = [1, 1]} : vector<8x512xf32> to vector<8x128xf32>
    %142 = arith.negf %141 : vector<8x128xf32>
    %143 = math.exp %142 : vector<8x128xf32>
    %cst_72 = arith.constant 1.000000e+00 : f32
    %144 = vector.broadcast %cst_72 : f32 to vector<8x128xf32>
    %145 = arith.addf %144, %143 : vector<8x128xf32>
    %146 = arith.divf %144, %145 : vector<8x128xf32>
    %147 = vector.extract_strided_slice %134 {offsets = [0, 256], sizes = [8, 128], strides = [1, 1]} : vector<8x512xf32> to vector<8x128xf32>
    %148 = math.tanh %147 : vector<8x128xf32>
    %149 = vector.extract_strided_slice %134 {offsets = [0, 384], sizes = [8, 128], strides = [1, 1]} : vector<8x512xf32> to vector<8x128xf32>
    %150 = arith.negf %149 : vector<8x128xf32>
    %151 = math.exp %150 : vector<8x128xf32>
    %cst_73 = arith.constant 1.000000e+00 : f32
    %152 = vector.broadcast %cst_73 : f32 to vector<8x128xf32>
    %153 = arith.addf %152, %151 : vector<8x128xf32>
    %154 = arith.divf %152, %153 : vector<8x128xf32>
    %c0_74 = arith.constant 0 : index
    %c0_75 = arith.constant 0 : index
    %155 = vector.load %arg10[%c0_74, %c0_75] : memref<8x128xf32, #tpu.memory_space<vmem>>, vector<8x128xf32>
    %156 = arith.mulf %146, %155 : vector<8x128xf32>
    %157 = arith.mulf %140, %148 : vector<8x128xf32>
    %158 = arith.addf %156, %157 : vector<8x128xf32>
    %159 = math.tanh %158 : vector<8x128xf32>
    %160 = arith.mulf %154, %159 : vector<8x128xf32>
    %c0_76 = arith.constant 0 : index
    %c0_77 = arith.constant 0 : index
    %161 = vector.load %arg10[%c0_76, %c0_77] : memref<8x128xf32, #tpu.memory_space<vmem>>, vector<8x128xf32>
    tpu.vector_store %arg10[%c0_76, %c0_77], %158 {strides = array<i32>} : memref<8x128xf32, #tpu.memory_space<vmem>>, vector<8x128xf32>,
    %c0_78 = arith.constant 0 : index
    %c0_79 = arith.constant 0 : index
    %162 = vector.load %arg9[%c0_78, %c0_79] : memref<8x128xf32, #tpu.memory_space<vmem>>, vector<8x128xf32>
    tpu.vector_store %arg9[%c0_78, %c0_79], %160 {strides = array<i32>} : memref<8x128xf32, #tpu.memory_space<vmem>>, vector<8x128xf32>,
    %163 = arith.index_cast %129 : i32 to index
    %c0_80 = arith.constant 0 : index
    %164 = vector.load %arg7[%163, %c0_80] : memref<64x128xf32, #tpu.memory_space<vmem>>, vector<8x128xf32>
    tpu.vector_store %arg7[%163, %c0_80], %160 {strides = array<i32>} : memref<64x128xf32, #tpu.memory_space<vmem>>, vector<8x128xf32>,
    %c4_i32 = arith.constant 4 : i32
    %c8_i32_81 = arith.constant 8 : i32
    %165 = arith.muli %c4_i32, %c8_i32_81 : i32
    %166 = tpu.assume_multiple %165, 8 : i32
    %c0_82 = arith.constant 0 : index
    %c0_83 = arith.constant 0 : index
    %167 = vector.load %arg9[%c0_82, %c0_83] : memref<8x128xf32, #tpu.memory_space<vmem>>, vector<8x128xf32>
    %168 = arith.index_cast %166 : i32 to index
    %c0_84 = arith.constant 0 : index
    %169 = vector.load %arg8[%168, %c0_84] : memref<64x512xf32, #tpu.memory_space<vmem>>, vector<8x512xf32>
    %cst_85 = arith.constant dense<0.000000e+00> : vector<8x512xf32>
    %170 = tpu.matmul %167, %3, %cst_85 {dimension_numbers = #tpu.dot_dimension_numbers<[1], [0], [0], [1], [0, 0, 1, 1], [], []>} : vector<8x128xf32>, vector<128x512xf32>, vector<8x512xf32> -> vector<8x512xf32>
    %171 = arith.addf %169, %170 : vector<8x512xf32>
    %172 = vector.extract_strided_slice %171 {offsets = [0, 0], sizes = [8, 128], strides = [1, 1]} : vector<8x512xf32> to vector<8x128xf32>
    %173 = arith.negf %172 : vector<8x128xf32>
    %174 = math.exp %173 : vector<8x128xf32>
    %cst_86 = arith.constant 1.000000e+00 : f32
    %175 = vector.broadcast %cst_86 : f32 to vector<8x128xf32>
    %176 = arith.addf %175, %174 : vector<8x128xf32>
    %177 = arith.divf %175, %176 : vector<8x128xf32>
    %178 = vector.extract_strided_slice %171 {offsets = [0, 128], sizes = [8, 128], strides = [1, 1]} : vector<8x512xf32> to vector<8x128xf32>
    %179 = arith.negf %178 : vector<8x128xf32>
    %180 = math.exp %179 : vector<8x128xf32>
    %cst_87 = arith.constant 1.000000e+00 : f32
    %181 = vector.broadcast %cst_87 : f32 to vector<8x128xf32>
    %182 = arith.addf %181, %180 : vector<8x128xf32>
    %183 = arith.divf %181, %182 : vector<8x128xf32>
    %184 = vector.extract_strided_slice %171 {offsets = [0, 256], sizes = [8, 128], strides = [1, 1]} : vector<8x512xf32> to vector<8x128xf32>
    %185 = math.tanh %184 : vector<8x128xf32>
    %186 = vector.extract_strided_slice %171 {offsets = [0, 384], sizes = [8, 128], strides = [1, 1]} : vector<8x512xf32> to vector<8x128xf32>
    %187 = arith.negf %186 : vector<8x128xf32>
    %188 = math.exp %187 : vector<8x128xf32>
    %cst_88 = arith.constant 1.000000e+00 : f32
    %189 = vector.broadcast %cst_88 : f32 to vector<8x128xf32>
    %190 = arith.addf %189, %188 : vector<8x128xf32>
    %191 = arith.divf %189, %190 : vector<8x128xf32>
    %c0_89 = arith.constant 0 : index
    %c0_90 = arith.constant 0 : index
    %192 = vector.load %arg10[%c0_89, %c0_90] : memref<8x128xf32, #tpu.memory_space<vmem>>, vector<8x128xf32>
    %193 = arith.mulf %183, %192 : vector<8x128xf32>
    %194 = arith.mulf %177, %185 : vector<8x128xf32>
    %195 = arith.addf %193, %194 : vector<8x128xf32>
    %196 = math.tanh %195 : vector<8x128xf32>
    %197 = arith.mulf %191, %196 : vector<8x128xf32>
    %c0_91 = arith.constant 0 : index
    %c0_92 = arith.constant 0 : index
    %198 = vector.load %arg10[%c0_91, %c0_92] : memref<8x128xf32, #tpu.memory_space<vmem>>, vector<8x128xf32>
    tpu.vector_store %arg10[%c0_91, %c0_92], %195 {strides = array<i32>} : memref<8x128xf32, #tpu.memory_space<vmem>>, vector<8x128xf32>,
    %c0_93 = arith.constant 0 : index
    %c0_94 = arith.constant 0 : index
    %199 = vector.load %arg9[%c0_93, %c0_94] : memref<8x128xf32, #tpu.memory_space<vmem>>, vector<8x128xf32>
    tpu.vector_store %arg9[%c0_93, %c0_94], %197 {strides = array<i32>} : memref<8x128xf32, #tpu.memory_space<vmem>>, vector<8x128xf32>,
    %200 = arith.index_cast %166 : i32 to index
    %c0_95 = arith.constant 0 : index
    %201 = vector.load %arg7[%200, %c0_95] : memref<64x128xf32, #tpu.memory_space<vmem>>, vector<8x128xf32>
    tpu.vector_store %arg7[%200, %c0_95], %197 {strides = array<i32>} : memref<64x128xf32, #tpu.memory_space<vmem>>, vector<8x128xf32>,
    %c5_i32 = arith.constant 5 : i32
    %c8_i32_96 = arith.constant 8 : i32
    %202 = arith.muli %c5_i32, %c8_i32_96 : i32
    %203 = tpu.assume_multiple %202, 8 : i32
    %c0_97 = arith.constant 0 : index
    %c0_98 = arith.constant 0 : index
    %204 = vector.load %arg9[%c0_97, %c0_98] : memref<8x128xf32, #tpu.memory_space<vmem>>, vector<8x128xf32>
    %205 = arith.index_cast %203 : i32 to index
    %c0_99 = arith.constant 0 : index
    %206 = vector.load %arg8[%205, %c0_99] : memref<64x512xf32, #tpu.memory_space<vmem>>, vector<8x512xf32>
    %cst_100 = arith.constant dense<0.000000e+00> : vector<8x512xf32>
    %207 = tpu.matmul %204, %3, %cst_100 {dimension_numbers = #tpu.dot_dimension_numbers<[1], [0], [0], [1], [0, 0, 1, 1], [], []>} : vector<8x128xf32>, vector<128x512xf32>, vector<8x512xf32> -> vector<8x512xf32>
    %208 = arith.addf %206, %207 : vector<8x512xf32>
    %209 = vector.extract_strided_slice %208 {offsets = [0, 0], sizes = [8, 128], strides = [1, 1]} : vector<8x512xf32> to vector<8x128xf32>
    %210 = arith.negf %209 : vector<8x128xf32>
    %211 = math.exp %210 : vector<8x128xf32>
    %cst_101 = arith.constant 1.000000e+00 : f32
    %212 = vector.broadcast %cst_101 : f32 to vector<8x128xf32>
    %213 = arith.addf %212, %211 : vector<8x128xf32>
    %214 = arith.divf %212, %213 : vector<8x128xf32>
    %215 = vector.extract_strided_slice %208 {offsets = [0, 128], sizes = [8, 128], strides = [1, 1]} : vector<8x512xf32> to vector<8x128xf32>
    %216 = arith.negf %215 : vector<8x128xf32>
    %217 = math.exp %216 : vector<8x128xf32>
    %cst_102 = arith.constant 1.000000e+00 : f32
    %218 = vector.broadcast %cst_102 : f32 to vector<8x128xf32>
    %219 = arith.addf %218, %217 : vector<8x128xf32>
    %220 = arith.divf %218, %219 : vector<8x128xf32>
    %221 = vector.extract_strided_slice %208 {offsets = [0, 256], sizes = [8, 128], strides = [1, 1]} : vector<8x512xf32> to vector<8x128xf32>
    %222 = math.tanh %221 : vector<8x128xf32>
    %223 = vector.extract_strided_slice %208 {offsets = [0, 384], sizes = [8, 128], strides = [1, 1]} : vector<8x512xf32> to vector<8x128xf32>
    %224 = arith.negf %223 : vector<8x128xf32>
    %225 = math.exp %224 : vector<8x128xf32>
    %cst_103 = arith.constant 1.000000e+00 : f32
    %226 = vector.broadcast %cst_103 : f32 to vector<8x128xf32>
    %227 = arith.addf %226, %225 : vector<8x128xf32>
    %228 = arith.divf %226, %227 : vector<8x128xf32>
    %c0_104 = arith.constant 0 : index
    %c0_105 = arith.constant 0 : index
    %229 = vector.load %arg10[%c0_104, %c0_105] : memref<8x128xf32, #tpu.memory_space<vmem>>, vector<8x128xf32>
    %230 = arith.mulf %220, %229 : vector<8x128xf32>
    %231 = arith.mulf %214, %222 : vector<8x128xf32>
    %232 = arith.addf %230, %231 : vector<8x128xf32>
    %233 = math.tanh %232 : vector<8x128xf32>
    %234 = arith.mulf %228, %233 : vector<8x128xf32>
    %c0_106 = arith.constant 0 : index
    %c0_107 = arith.constant 0 : index
    %235 = vector.load %arg10[%c0_106, %c0_107] : memref<8x128xf32, #tpu.memory_space<vmem>>, vector<8x128xf32>
    tpu.vector_store %arg10[%c0_106, %c0_107], %232 {strides = array<i32>} : memref<8x128xf32, #tpu.memory_space<vmem>>, vector<8x128xf32>,
    %c0_108 = arith.constant 0 : index
    %c0_109 = arith.constant 0 : index
    %236 = vector.load %arg9[%c0_108, %c0_109] : memref<8x128xf32, #tpu.memory_space<vmem>>, vector<8x128xf32>
    tpu.vector_store %arg9[%c0_108, %c0_109], %234 {strides = array<i32>} : memref<8x128xf32, #tpu.memory_space<vmem>>, vector<8x128xf32>,
    %237 = arith.index_cast %203 : i32 to index
    %c0_110 = arith.constant 0 : index
    %238 = vector.load %arg7[%237, %c0_110] : memref<64x128xf32, #tpu.memory_space<vmem>>, vector<8x128xf32>
    tpu.vector_store %arg7[%237, %c0_110], %234 {strides = array<i32>} : memref<64x128xf32, #tpu.memory_space<vmem>>, vector<8x128xf32>,
    %c6_i32 = arith.constant 6 : i32
    %c8_i32_111 = arith.constant 8 : i32
    %239 = arith.muli %c6_i32, %c8_i32_111 : i32
    %240 = tpu.assume_multiple %239, 8 : i32
    %c0_112 = arith.constant 0 : index
    %c0_113 = arith.constant 0 : index
    %241 = vector.load %arg9[%c0_112, %c0_113] : memref<8x128xf32, #tpu.memory_space<vmem>>, vector<8x128xf32>
    %242 = arith.index_cast %240 : i32 to index
    %c0_114 = arith.constant 0 : index
    %243 = vector.load %arg8[%242, %c0_114] : memref<64x512xf32, #tpu.memory_space<vmem>>, vector<8x512xf32>
    %cst_115 = arith.constant dense<0.000000e+00> : vector<8x512xf32>
    %244 = tpu.matmul %241, %3, %cst_115 {dimension_numbers = #tpu.dot_dimension_numbers<[1], [0], [0], [1], [0, 0, 1, 1], [], []>} : vector<8x128xf32>, vector<128x512xf32>, vector<8x512xf32> -> vector<8x512xf32>
    %245 = arith.addf %243, %244 : vector<8x512xf32>
    %246 = vector.extract_strided_slice %245 {offsets = [0, 0], sizes = [8, 128], strides = [1, 1]} : vector<8x512xf32> to vector<8x128xf32>
    %247 = arith.negf %246 : vector<8x128xf32>
    %248 = math.exp %247 : vector<8x128xf32>
    %cst_116 = arith.constant 1.000000e+00 : f32
    %249 = vector.broadcast %cst_116 : f32 to vector<8x128xf32>
    %250 = arith.addf %249, %248 : vector<8x128xf32>
    %251 = arith.divf %249, %250 : vector<8x128xf32>
    %252 = vector.extract_strided_slice %245 {offsets = [0, 128], sizes = [8, 128], strides = [1, 1]} : vector<8x512xf32> to vector<8x128xf32>
    %253 = arith.negf %252 : vector<8x128xf32>
    %254 = math.exp %253 : vector<8x128xf32>
    %cst_117 = arith.constant 1.000000e+00 : f32
    %255 = vector.broadcast %cst_117 : f32 to vector<8x128xf32>
    %256 = arith.addf %255, %254 : vector<8x128xf32>
    %257 = arith.divf %255, %256 : vector<8x128xf32>
    %258 = vector.extract_strided_slice %245 {offsets = [0, 256], sizes = [8, 128], strides = [1, 1]} : vector<8x512xf32> to vector<8x128xf32>
    %259 = math.tanh %258 : vector<8x128xf32>
    %260 = vector.extract_strided_slice %245 {offsets = [0, 384], sizes = [8, 128], strides = [1, 1]} : vector<8x512xf32> to vector<8x128xf32>
    %261 = arith.negf %260 : vector<8x128xf32>
    %262 = math.exp %261 : vector<8x128xf32>
    %cst_118 = arith.constant 1.000000e+00 : f32
    %263 = vector.broadcast %cst_118 : f32 to vector<8x128xf32>
    %264 = arith.addf %263, %262 : vector<8x128xf32>
    %265 = arith.divf %263, %264 : vector<8x128xf32>
    %c0_119 = arith.constant 0 : index
    %c0_120 = arith.constant 0 : index
    %266 = vector.load %arg10[%c0_119, %c0_120] : memref<8x128xf32, #tpu.memory_space<vmem>>, vector<8x128xf32>
    %267 = arith.mulf %257, %266 : vector<8x128xf32>
    %268 = arith.mulf %251, %259 : vector<8x128xf32>
    %269 = arith.addf %267, %268 : vector<8x128xf32>
    %270 = math.tanh %269 : vector<8x128xf32>
    %271 = arith.mulf %265, %270 : vector<8x128xf32>
    %c0_121 = arith.constant 0 : index
    %c0_122 = arith.constant 0 : index
    %272 = vector.load %arg10[%c0_121, %c0_122] : memref<8x128xf32, #tpu.memory_space<vmem>>, vector<8x128xf32>
    tpu.vector_store %arg10[%c0_121, %c0_122], %269 {strides = array<i32>} : memref<8x128xf32, #tpu.memory_space<vmem>>, vector<8x128xf32>,
    %c0_123 = arith.constant 0 : index
    %c0_124 = arith.constant 0 : index
    %273 = vector.load %arg9[%c0_123, %c0_124] : memref<8x128xf32, #tpu.memory_space<vmem>>, vector<8x128xf32>
    tpu.vector_store %arg9[%c0_123, %c0_124], %271 {strides = array<i32>} : memref<8x128xf32, #tpu.memory_space<vmem>>, vector<8x128xf32>,
    %274 = arith.index_cast %240 : i32 to index
    %c0_125 = arith.constant 0 : index
    %275 = vector.load %arg7[%274, %c0_125] : memref<64x128xf32, #tpu.memory_space<vmem>>, vector<8x128xf32>
    tpu.vector_store %arg7[%274, %c0_125], %271 {strides = array<i32>} : memref<64x128xf32, #tpu.memory_space<vmem>>, vector<8x128xf32>,
    %c7_i32 = arith.constant 7 : i32
    %c8_i32_126 = arith.constant 8 : i32
    %276 = arith.muli %c7_i32, %c8_i32_126 : i32
    %277 = tpu.assume_multiple %276, 8 : i32
    %c0_127 = arith.constant 0 : index
    %c0_128 = arith.constant 0 : index
    %278 = vector.load %arg9[%c0_127, %c0_128] : memref<8x128xf32, #tpu.memory_space<vmem>>, vector<8x128xf32>
    %279 = arith.index_cast %277 : i32 to index
    %c0_129 = arith.constant 0 : index
    %280 = vector.load %arg8[%279, %c0_129] : memref<64x512xf32, #tpu.memory_space<vmem>>, vector<8x512xf32>
    %cst_130 = arith.constant dense<0.000000e+00> : vector<8x512xf32>
    %281 = tpu.matmul %278, %3, %cst_130 {dimension_numbers = #tpu.dot_dimension_numbers<[1], [0], [0], [1], [0, 0, 1, 1], [], []>} : vector<8x128xf32>, vector<128x512xf32>, vector<8x512xf32> -> vector<8x512xf32>
    %282 = arith.addf %280, %281 : vector<8x512xf32>
    %283 = vector.extract_strided_slice %282 {offsets = [0, 0], sizes = [8, 128], strides = [1, 1]} : vector<8x512xf32> to vector<8x128xf32>
    %284 = arith.negf %283 : vector<8x128xf32>
    %285 = math.exp %284 : vector<8x128xf32>
    %cst_131 = arith.constant 1.000000e+00 : f32
    %286 = vector.broadcast %cst_131 : f32 to vector<8x128xf32>
    %287 = arith.addf %286, %285 : vector<8x128xf32>
    %288 = arith.divf %286, %287 : vector<8x128xf32>
    %289 = vector.extract_strided_slice %282 {offsets = [0, 128], sizes = [8, 128], strides = [1, 1]} : vector<8x512xf32> to vector<8x128xf32>
    %290 = arith.negf %289 : vector<8x128xf32>
    %291 = math.exp %290 : vector<8x128xf32>
    %cst_132 = arith.constant 1.000000e+00 : f32
    %292 = vector.broadcast %cst_132 : f32 to vector<8x128xf32>
    %293 = arith.addf %292, %291 : vector<8x128xf32>
    %294 = arith.divf %292, %293 : vector<8x128xf32>
    %295 = vector.extract_strided_slice %282 {offsets = [0, 256], sizes = [8, 128], strides = [1, 1]} : vector<8x512xf32> to vector<8x128xf32>
    %296 = math.tanh %295 : vector<8x128xf32>
    %297 = vector.extract_strided_slice %282 {offsets = [0, 384], sizes = [8, 128], strides = [1, 1]} : vector<8x512xf32> to vector<8x128xf32>
    %298 = arith.negf %297 : vector<8x128xf32>
    %299 = math.exp %298 : vector<8x128xf32>
    %cst_133 = arith.constant 1.000000e+00 : f32
    %300 = vector.broadcast %cst_133 : f32 to vector<8x128xf32>
    %301 = arith.addf %300, %299 : vector<8x128xf32>
    %302 = arith.divf %300, %301 : vector<8x128xf32>
    %c0_134 = arith.constant 0 : index
    %c0_135 = arith.constant 0 : index
    %303 = vector.load %arg10[%c0_134, %c0_135] : memref<8x128xf32, #tpu.memory_space<vmem>>, vector<8x128xf32>
    %304 = arith.mulf %294, %303 : vector<8x128xf32>
    %305 = arith.mulf %288, %296 : vector<8x128xf32>
    %306 = arith.addf %304, %305 : vector<8x128xf32>
    %307 = math.tanh %306 : vector<8x128xf32>
    %308 = arith.mulf %302, %307 : vector<8x128xf32>
    %c0_136 = arith.constant 0 : index
    %c0_137 = arith.constant 0 : index
    %309 = vector.load %arg10[%c0_136, %c0_137] : memref<8x128xf32, #tpu.memory_space<vmem>>, vector<8x128xf32>
    tpu.vector_store %arg10[%c0_136, %c0_137], %306 {strides = array<i32>} : memref<8x128xf32, #tpu.memory_space<vmem>>, vector<8x128xf32>,
    %c0_138 = arith.constant 0 : index
    %c0_139 = arith.constant 0 : index
    %310 = vector.load %arg9[%c0_138, %c0_139] : memref<8x128xf32, #tpu.memory_space<vmem>>, vector<8x128xf32>
    tpu.vector_store %arg9[%c0_138, %c0_139], %308 {strides = array<i32>} : memref<8x128xf32, #tpu.memory_space<vmem>>, vector<8x128xf32>,
    %311 = arith.index_cast %277 : i32 to index
    %c0_140 = arith.constant 0 : index
    %312 = vector.load %arg7[%311, %c0_140] : memref<64x128xf32, #tpu.memory_space<vmem>>, vector<8x128xf32>
    tpu.vector_store %arg7[%311, %c0_140], %308 {strides = array<i32>} : memref<64x128xf32, #tpu.memory_space<vmem>>, vector<8x128xf32>,
    %c8_i32_141 = arith.constant 8 : i32
    %c1 = arith.constant 1 : index
    %c0_142 = arith.constant 0 : index
    %c0_143 = arith.constant 0 : index
    %313 = vector.load %arg2[%c1, %c0_142, %c0_143] : memref<2x128x512xf32, #tpu.memory_space<vmem>>, vector<1x128x512xf32>
    %314 = vector.shape_cast %313 : vector<1x128x512xf32> to vector<128x512xf32>
    %c0_144 = arith.constant 0 : index
    %c0_145 = arith.constant 0 : index
    %315 = vector.load %arg7[%c0_144, %c0_145] : memref<64x128xf32, #tpu.memory_space<vmem>>, vector<64x128xf32>
    %c1_146 = arith.constant 1 : index
    %c0_147 = arith.constant 0 : index
    %c0_148 = arith.constant 0 : index
    %316 = vector.load %arg1[%c1_146, %c0_147, %c0_148] : memref<2x128x512xf32, #tpu.memory_space<vmem>>, vector<1x128x512xf32>
    %317 = vector.shape_cast %316 : vector<1x128x512xf32> to vector<128x512xf32>
    %cst_149 = arith.constant dense<0.000000e+00> : vector<64x512xf32>
    %318 = tpu.matmul %315, %317, %cst_149 {dimension_numbers = #tpu.dot_dimension_numbers<[1], [0], [0], [1], [0, 0, 1, 1], [], []>} : vector<64x128xf32>, vector<128x512xf32>, vector<64x512xf32> -> vector<64x512xf32>
    %c1_150 = arith.constant 1 : index
    %c0_151 = arith.constant 0 : index
    %c0_152 = arith.constant 0 : index
    %319 = vector.load %arg3[%c1_150, %c0_151, %c0_152] : memref<2x1x512xf32, #tpu.memory_space<vmem>>, vector<1x1x512xf32>
    %320 = vector.shape_cast %319 : vector<1x1x512xf32> to vector<1x512xf32>
    %321 = vector.broadcast %320 : vector<1x512xf32> to vector<64x512xf32>
    %322 = arith.addf %318, %321 : vector<64x512xf32>
    %c0_153 = arith.constant 0 : index
    %c0_154 = arith.constant 0 : index
    %323 = vector.load %arg8[%c0_153, %c0_154] : memref<64x512xf32, #tpu.memory_space<vmem>>, vector<64x512xf32>
    tpu.vector_store %arg8[%c0_153, %c0_154], %322 {strides = array<i32>} : memref<64x512xf32, #tpu.memory_space<vmem>>, vector<64x512xf32>,
    %cst_155 = arith.constant 0.000000e+00 : f32
    %324 = vector.broadcast %cst_155 : f32 to vector<8x128xf32>
    %c0_156 = arith.constant 0 : index
    %c0_157 = arith.constant 0 : index
    %325 = vector.load %arg9[%c0_156, %c0_157] : memref<8x128xf32, #tpu.memory_space<vmem>>, vector<8x128xf32>
    tpu.vector_store %arg9[%c0_156, %c0_157], %324 {strides = array<i32>} : memref<8x128xf32, #tpu.memory_space<vmem>>, vector<8x128xf32>,
    %cst_158 = arith.constant 0.000000e+00 : f32
    %326 = vector.broadcast %cst_158 : f32 to vector<8x128xf32>
    %c0_159 = arith.constant 0 : index
    %c0_160 = arith.constant 0 : index
    %327 = vector.load %arg10[%c0_159, %c0_160] : memref<8x128xf32, #tpu.memory_space<vmem>>, vector<8x128xf32>
    tpu.vector_store %arg10[%c0_159, %c0_160], %326 {strides = array<i32>} : memref<8x128xf32, #tpu.memory_space<vmem>>, vector<8x128xf32>,
    %c0_i32_161 = arith.constant 0 : i32
    %c8_i32_162 = arith.constant 8 : i32
    %328 = arith.muli %c0_i32_161, %c8_i32_162 : i32
    %329 = tpu.assume_multiple %328, 8 : i32
    %c0_163 = arith.constant 0 : index
    %c0_164 = arith.constant 0 : index
    %330 = vector.load %arg9[%c0_163, %c0_164] : memref<8x128xf32, #tpu.memory_space<vmem>>, vector<8x128xf32>
    %331 = arith.index_cast %329 : i32 to index
    %c0_165 = arith.constant 0 : index
    %332 = vector.load %arg8[%331, %c0_165] : memref<64x512xf32, #tpu.memory_space<vmem>>, vector<8x512xf32>
    %cst_166 = arith.constant dense<0.000000e+00> : vector<8x512xf32>
    %333 = tpu.matmul %330, %314, %cst_166 {dimension_numbers = #tpu.dot_dimension_numbers<[1], [0], [0], [1], [0, 0, 1, 1], [], []>} : vector<8x128xf32>, vector<128x512xf32>, vector<8x512xf32> -> vector<8x512xf32>
    %334 = arith.addf %332, %333 : vector<8x512xf32>
    %335 = vector.extract_strided_slice %334 {offsets = [0, 0], sizes = [8, 128], strides = [1, 1]} : vector<8x512xf32> to vector<8x128xf32>
    %336 = arith.negf %335 : vector<8x128xf32>
    %337 = math.exp %336 : vector<8x128xf32>
    %cst_167 = arith.constant 1.000000e+00 : f32
    %338 = vector.broadcast %cst_167 : f32 to vector<8x128xf32>
    %339 = arith.addf %338, %337 : vector<8x128xf32>
    %340 = arith.divf %338, %339 : vector<8x128xf32>
    %341 = vector.extract_strided_slice %334 {offsets = [0, 128], sizes = [8, 128], strides = [1, 1]} : vector<8x512xf32> to vector<8x128xf32>
    %342 = arith.negf %341 : vector<8x128xf32>
    %343 = math.exp %342 : vector<8x128xf32>
    %cst_168 = arith.constant 1.000000e+00 : f32
    %344 = vector.broadcast %cst_168 : f32 to vector<8x128xf32>
    %345 = arith.addf %344, %343 : vector<8x128xf32>
    %346 = arith.divf %344, %345 : vector<8x128xf32>
    %347 = vector.extract_strided_slice %334 {offsets = [0, 256], sizes = [8, 128], strides = [1, 1]} : vector<8x512xf32> to vector<8x128xf32>
    %348 = math.tanh %347 : vector<8x128xf32>
    %349 = vector.extract_strided_slice %334 {offsets = [0, 384], sizes = [8, 128], strides = [1, 1]} : vector<8x512xf32> to vector<8x128xf32>
    %350 = arith.negf %349 : vector<8x128xf32>
    %351 = math.exp %350 : vector<8x128xf32>
    %cst_169 = arith.constant 1.000000e+00 : f32
    %352 = vector.broadcast %cst_169 : f32 to vector<8x128xf32>
    %353 = arith.addf %352, %351 : vector<8x128xf32>
    %354 = arith.divf %352, %353 : vector<8x128xf32>
    %c0_170 = arith.constant 0 : index
    %c0_171 = arith.constant 0 : index
    %355 = vector.load %arg10[%c0_170, %c0_171] : memref<8x128xf32, #tpu.memory_space<vmem>>, vector<8x128xf32>
    %356 = arith.mulf %346, %355 : vector<8x128xf32>
    %357 = arith.mulf %340, %348 : vector<8x128xf32>
    %358 = arith.addf %356, %357 : vector<8x128xf32>
    %359 = math.tanh %358 : vector<8x128xf32>
    %360 = arith.mulf %354, %359 : vector<8x128xf32>
    %c0_172 = arith.constant 0 : index
    %c0_173 = arith.constant 0 : index
    %361 = vector.load %arg10[%c0_172, %c0_173] : memref<8x128xf32, #tpu.memory_space<vmem>>, vector<8x128xf32>
    tpu.vector_store %arg10[%c0_172, %c0_173], %358 {strides = array<i32>} : memref<8x128xf32, #tpu.memory_space<vmem>>, vector<8x128xf32>,
    %c0_174 = arith.constant 0 : index
    %c0_175 = arith.constant 0 : index
    %362 = vector.load %arg9[%c0_174, %c0_175] : memref<8x128xf32, #tpu.memory_space<vmem>>, vector<8x128xf32>
    tpu.vector_store %arg9[%c0_174, %c0_175], %360 {strides = array<i32>} : memref<8x128xf32, #tpu.memory_space<vmem>>, vector<8x128xf32>,
    %363 = arith.index_cast %329 : i32 to index
    %c0_176 = arith.constant 0 : index
    %364 = vector.load %arg7[%363, %c0_176] : memref<64x128xf32, #tpu.memory_space<vmem>>, vector<8x128xf32>
    tpu.vector_store %arg7[%363, %c0_176], %360 {strides = array<i32>} : memref<64x128xf32, #tpu.memory_space<vmem>>, vector<8x128xf32>,
    %c1_i32_177 = arith.constant 1 : i32
    %c8_i32_178 = arith.constant 8 : i32
    %365 = arith.muli %c1_i32_177, %c8_i32_178 : i32
    %366 = tpu.assume_multiple %365, 8 : i32
    %c0_179 = arith.constant 0 : index
    %c0_180 = arith.constant 0 : index
    %367 = vector.load %arg9[%c0_179, %c0_180] : memref<8x128xf32, #tpu.memory_space<vmem>>, vector<8x128xf32>
    %368 = arith.index_cast %366 : i32 to index
    %c0_181 = arith.constant 0 : index
    %369 = vector.load %arg8[%368, %c0_181] : memref<64x512xf32, #tpu.memory_space<vmem>>, vector<8x512xf32>
    %cst_182 = arith.constant dense<0.000000e+00> : vector<8x512xf32>
    %370 = tpu.matmul %367, %314, %cst_182 {dimension_numbers = #tpu.dot_dimension_numbers<[1], [0], [0], [1], [0, 0, 1, 1], [], []>} : vector<8x128xf32>, vector<128x512xf32>, vector<8x512xf32> -> vector<8x512xf32>
    %371 = arith.addf %369, %370 : vector<8x512xf32>
    %372 = vector.extract_strided_slice %371 {offsets = [0, 0], sizes = [8, 128], strides = [1, 1]} : vector<8x512xf32> to vector<8x128xf32>
    %373 = arith.negf %372 : vector<8x128xf32>
    %374 = math.exp %373 : vector<8x128xf32>
    %cst_183 = arith.constant 1.000000e+00 : f32
    %375 = vector.broadcast %cst_183 : f32 to vector<8x128xf32>
    %376 = arith.addf %375, %374 : vector<8x128xf32>
    %377 = arith.divf %375, %376 : vector<8x128xf32>
    %378 = vector.extract_strided_slice %371 {offsets = [0, 128], sizes = [8, 128], strides = [1, 1]} : vector<8x512xf32> to vector<8x128xf32>
    %379 = arith.negf %378 : vector<8x128xf32>
    %380 = math.exp %379 : vector<8x128xf32>
    %cst_184 = arith.constant 1.000000e+00 : f32
    %381 = vector.broadcast %cst_184 : f32 to vector<8x128xf32>
    %382 = arith.addf %381, %380 : vector<8x128xf32>
    %383 = arith.divf %381, %382 : vector<8x128xf32>
    %384 = vector.extract_strided_slice %371 {offsets = [0, 256], sizes = [8, 128], strides = [1, 1]} : vector<8x512xf32> to vector<8x128xf32>
    %385 = math.tanh %384 : vector<8x128xf32>
    %386 = vector.extract_strided_slice %371 {offsets = [0, 384], sizes = [8, 128], strides = [1, 1]} : vector<8x512xf32> to vector<8x128xf32>
    %387 = arith.negf %386 : vector<8x128xf32>
    %388 = math.exp %387 : vector<8x128xf32>
    %cst_185 = arith.constant 1.000000e+00 : f32
    %389 = vector.broadcast %cst_185 : f32 to vector<8x128xf32>
    %390 = arith.addf %389, %388 : vector<8x128xf32>
    %391 = arith.divf %389, %390 : vector<8x128xf32>
    %c0_186 = arith.constant 0 : index
    %c0_187 = arith.constant 0 : index
    %392 = vector.load %arg10[%c0_186, %c0_187] : memref<8x128xf32, #tpu.memory_space<vmem>>, vector<8x128xf32>
    %393 = arith.mulf %383, %392 : vector<8x128xf32>
    %394 = arith.mulf %377, %385 : vector<8x128xf32>
    %395 = arith.addf %393, %394 : vector<8x128xf32>
    %396 = math.tanh %395 : vector<8x128xf32>
    %397 = arith.mulf %391, %396 : vector<8x128xf32>
    %c0_188 = arith.constant 0 : index
    %c0_189 = arith.constant 0 : index
    %398 = vector.load %arg10[%c0_188, %c0_189] : memref<8x128xf32, #tpu.memory_space<vmem>>, vector<8x128xf32>
    tpu.vector_store %arg10[%c0_188, %c0_189], %395 {strides = array<i32>} : memref<8x128xf32, #tpu.memory_space<vmem>>, vector<8x128xf32>,
    %c0_190 = arith.constant 0 : index
    %c0_191 = arith.constant 0 : index
    %399 = vector.load %arg9[%c0_190, %c0_191] : memref<8x128xf32, #tpu.memory_space<vmem>>, vector<8x128xf32>
    tpu.vector_store %arg9[%c0_190, %c0_191], %397 {strides = array<i32>} : memref<8x128xf32, #tpu.memory_space<vmem>>, vector<8x128xf32>,
    %400 = arith.index_cast %366 : i32 to index
    %c0_192 = arith.constant 0 : index
    %401 = vector.load %arg7[%400, %c0_192] : memref<64x128xf32, #tpu.memory_space<vmem>>, vector<8x128xf32>
    tpu.vector_store %arg7[%400, %c0_192], %397 {strides = array<i32>} : memref<64x128xf32, #tpu.memory_space<vmem>>, vector<8x128xf32>,
    %c2_i32_193 = arith.constant 2 : i32
    %c8_i32_194 = arith.constant 8 : i32
    %402 = arith.muli %c2_i32_193, %c8_i32_194 : i32
    %403 = tpu.assume_multiple %402, 8 : i32
    %c0_195 = arith.constant 0 : index
    %c0_196 = arith.constant 0 : index
    %404 = vector.load %arg9[%c0_195, %c0_196] : memref<8x128xf32, #tpu.memory_space<vmem>>, vector<8x128xf32>
    %405 = arith.index_cast %403 : i32 to index
    %c0_197 = arith.constant 0 : index
    %406 = vector.load %arg8[%405, %c0_197] : memref<64x512xf32, #tpu.memory_space<vmem>>, vector<8x512xf32>
    %cst_198 = arith.constant dense<0.000000e+00> : vector<8x512xf32>
    %407 = tpu.matmul %404, %314, %cst_198 {dimension_numbers = #tpu.dot_dimension_numbers<[1], [0], [0], [1], [0, 0, 1, 1], [], []>} : vector<8x128xf32>, vector<128x512xf32>, vector<8x512xf32> -> vector<8x512xf32>
    %408 = arith.addf %406, %407 : vector<8x512xf32>
    %409 = vector.extract_strided_slice %408 {offsets = [0, 0], sizes = [8, 128], strides = [1, 1]} : vector<8x512xf32> to vector<8x128xf32>
    %410 = arith.negf %409 : vector<8x128xf32>
    %411 = math.exp %410 : vector<8x128xf32>
    %cst_199 = arith.constant 1.000000e+00 : f32
    %412 = vector.broadcast %cst_199 : f32 to vector<8x128xf32>
    %413 = arith.addf %412, %411 : vector<8x128xf32>
    %414 = arith.divf %412, %413 : vector<8x128xf32>
    %415 = vector.extract_strided_slice %408 {offsets = [0, 128], sizes = [8, 128], strides = [1, 1]} : vector<8x512xf32> to vector<8x128xf32>
    %416 = arith.negf %415 : vector<8x128xf32>
    %417 = math.exp %416 : vector<8x128xf32>
    %cst_200 = arith.constant 1.000000e+00 : f32
    %418 = vector.broadcast %cst_200 : f32 to vector<8x128xf32>
    %419 = arith.addf %418, %417 : vector<8x128xf32>
    %420 = arith.divf %418, %419 : vector<8x128xf32>
    %421 = vector.extract_strided_slice %408 {offsets = [0, 256], sizes = [8, 128], strides = [1, 1]} : vector<8x512xf32> to vector<8x128xf32>
    %422 = math.tanh %421 : vector<8x128xf32>
    %423 = vector.extract_strided_slice %408 {offsets = [0, 384], sizes = [8, 128], strides = [1, 1]} : vector<8x512xf32> to vector<8x128xf32>
    %424 = arith.negf %423 : vector<8x128xf32>
    %425 = math.exp %424 : vector<8x128xf32>
    %cst_201 = arith.constant 1.000000e+00 : f32
    %426 = vector.broadcast %cst_201 : f32 to vector<8x128xf32>
    %427 = arith.addf %426, %425 : vector<8x128xf32>
    %428 = arith.divf %426, %427 : vector<8x128xf32>
    %c0_202 = arith.constant 0 : index
    %c0_203 = arith.constant 0 : index
    %429 = vector.load %arg10[%c0_202, %c0_203] : memref<8x128xf32, #tpu.memory_space<vmem>>, vector<8x128xf32>
    %430 = arith.mulf %420, %429 : vector<8x128xf32>
    %431 = arith.mulf %414, %422 : vector<8x128xf32>
    %432 = arith.addf %430, %431 : vector<8x128xf32>
    %433 = math.tanh %432 : vector<8x128xf32>
    %434 = arith.mulf %428, %433 : vector<8x128xf32>
    %c0_204 = arith.constant 0 : index
    %c0_205 = arith.constant 0 : index
    %435 = vector.load %arg10[%c0_204, %c0_205] : memref<8x128xf32, #tpu.memory_space<vmem>>, vector<8x128xf32>
    tpu.vector_store %arg10[%c0_204, %c0_205], %432 {strides = array<i32>} : memref<8x128xf32, #tpu.memory_space<vmem>>, vector<8x128xf32>,
    %c0_206 = arith.constant 0 : index
    %c0_207 = arith.constant 0 : index
    %436 = vector.load %arg9[%c0_206, %c0_207] : memref<8x128xf32, #tpu.memory_space<vmem>>, vector<8x128xf32>
    tpu.vector_store %arg9[%c0_206, %c0_207], %434 {strides = array<i32>} : memref<8x128xf32, #tpu.memory_space<vmem>>, vector<8x128xf32>,
    %437 = arith.index_cast %403 : i32 to index
    %c0_208 = arith.constant 0 : index
    %438 = vector.load %arg7[%437, %c0_208] : memref<64x128xf32, #tpu.memory_space<vmem>>, vector<8x128xf32>
    tpu.vector_store %arg7[%437, %c0_208], %434 {strides = array<i32>} : memref<64x128xf32, #tpu.memory_space<vmem>>, vector<8x128xf32>,
    %c3_i32_209 = arith.constant 3 : i32
    %c8_i32_210 = arith.constant 8 : i32
    %439 = arith.muli %c3_i32_209, %c8_i32_210 : i32
    %440 = tpu.assume_multiple %439, 8 : i32
    %c0_211 = arith.constant 0 : index
    %c0_212 = arith.constant 0 : index
    %441 = vector.load %arg9[%c0_211, %c0_212] : memref<8x128xf32, #tpu.memory_space<vmem>>, vector<8x128xf32>
    %442 = arith.index_cast %440 : i32 to index
    %c0_213 = arith.constant 0 : index
    %443 = vector.load %arg8[%442, %c0_213] : memref<64x512xf32, #tpu.memory_space<vmem>>, vector<8x512xf32>
    %cst_214 = arith.constant dense<0.000000e+00> : vector<8x512xf32>
    %444 = tpu.matmul %441, %314, %cst_214 {dimension_numbers = #tpu.dot_dimension_numbers<[1], [0], [0], [1], [0, 0, 1, 1], [], []>} : vector<8x128xf32>, vector<128x512xf32>, vector<8x512xf32> -> vector<8x512xf32>
    %445 = arith.addf %443, %444 : vector<8x512xf32>
    %446 = vector.extract_strided_slice %445 {offsets = [0, 0], sizes = [8, 128], strides = [1, 1]} : vector<8x512xf32> to vector<8x128xf32>
    %447 = arith.negf %446 : vector<8x128xf32>
    %448 = math.exp %447 : vector<8x128xf32>
    %cst_215 = arith.constant 1.000000e+00 : f32
    %449 = vector.broadcast %cst_215 : f32 to vector<8x128xf32>
    %450 = arith.addf %449, %448 : vector<8x128xf32>
    %451 = arith.divf %449, %450 : vector<8x128xf32>
    %452 = vector.extract_strided_slice %445 {offsets = [0, 128], sizes = [8, 128], strides = [1, 1]} : vector<8x512xf32> to vector<8x128xf32>
    %453 = arith.negf %452 : vector<8x128xf32>
    %454 = math.exp %453 : vector<8x128xf32>
    %cst_216 = arith.constant 1.000000e+00 : f32
    %455 = vector.broadcast %cst_216 : f32 to vector<8x128xf32>
    %456 = arith.addf %455, %454 : vector<8x128xf32>
    %457 = arith.divf %455, %456 : vector<8x128xf32>
    %458 = vector.extract_strided_slice %445 {offsets = [0, 256], sizes = [8, 128], strides = [1, 1]} : vector<8x512xf32> to vector<8x128xf32>
    %459 = math.tanh %458 : vector<8x128xf32>
    %460 = vector.extract_strided_slice %445 {offsets = [0, 384], sizes = [8, 128], strides = [1, 1]} : vector<8x512xf32> to vector<8x128xf32>
    %461 = arith.negf %460 : vector<8x128xf32>
    %462 = math.exp %461 : vector<8x128xf32>
    %cst_217 = arith.constant 1.000000e+00 : f32
    %463 = vector.broadcast %cst_217 : f32 to vector<8x128xf32>
    %464 = arith.addf %463, %462 : vector<8x128xf32>
    %465 = arith.divf %463, %464 : vector<8x128xf32>
    %c0_218 = arith.constant 0 : index
    %c0_219 = arith.constant 0 : index
    %466 = vector.load %arg10[%c0_218, %c0_219] : memref<8x128xf32, #tpu.memory_space<vmem>>, vector<8x128xf32>
    %467 = arith.mulf %457, %466 : vector<8x128xf32>
    %468 = arith.mulf %451, %459 : vector<8x128xf32>
    %469 = arith.addf %467, %468 : vector<8x128xf32>
    %470 = math.tanh %469 : vector<8x128xf32>
    %471 = arith.mulf %465, %470 : vector<8x128xf32>
    %c0_220 = arith.constant 0 : index
    %c0_221 = arith.constant 0 : index
    %472 = vector.load %arg10[%c0_220, %c0_221] : memref<8x128xf32, #tpu.memory_space<vmem>>, vector<8x128xf32>
    tpu.vector_store %arg10[%c0_220, %c0_221], %469 {strides = array<i32>} : memref<8x128xf32, #tpu.memory_space<vmem>>, vector<8x128xf32>,
    %c0_222 = arith.constant 0 : index
    %c0_223 = arith.constant 0 : index
    %473 = vector.load %arg9[%c0_222, %c0_223] : memref<8x128xf32, #tpu.memory_space<vmem>>, vector<8x128xf32>
    tpu.vector_store %arg9[%c0_222, %c0_223], %471 {strides = array<i32>} : memref<8x128xf32, #tpu.memory_space<vmem>>, vector<8x128xf32>,
    %474 = arith.index_cast %440 : i32 to index
    %c0_224 = arith.constant 0 : index
    %475 = vector.load %arg7[%474, %c0_224] : memref<64x128xf32, #tpu.memory_space<vmem>>, vector<8x128xf32>
    tpu.vector_store %arg7[%474, %c0_224], %471 {strides = array<i32>} : memref<64x128xf32, #tpu.memory_space<vmem>>, vector<8x128xf32>,
    %c4_i32_225 = arith.constant 4 : i32
    %c8_i32_226 = arith.constant 8 : i32
    %476 = arith.muli %c4_i32_225, %c8_i32_226 : i32
    %477 = tpu.assume_multiple %476, 8 : i32
    %c0_227 = arith.constant 0 : index
    %c0_228 = arith.constant 0 : index
    %478 = vector.load %arg9[%c0_227, %c0_228] : memref<8x128xf32, #tpu.memory_space<vmem>>, vector<8x128xf32>
    %479 = arith.index_cast %477 : i32 to index
    %c0_229 = arith.constant 0 : index
    %480 = vector.load %arg8[%479, %c0_229] : memref<64x512xf32, #tpu.memory_space<vmem>>, vector<8x512xf32>
    %cst_230 = arith.constant dense<0.000000e+00> : vector<8x512xf32>
    %481 = tpu.matmul %478, %314, %cst_230 {dimension_numbers = #tpu.dot_dimension_numbers<[1], [0], [0], [1], [0, 0, 1, 1], [], []>} : vector<8x128xf32>, vector<128x512xf32>, vector<8x512xf32> -> vector<8x512xf32>
    %482 = arith.addf %480, %481 : vector<8x512xf32>
    %483 = vector.extract_strided_slice %482 {offsets = [0, 0], sizes = [8, 128], strides = [1, 1]} : vector<8x512xf32> to vector<8x128xf32>
    %484 = arith.negf %483 : vector<8x128xf32>
    %485 = math.exp %484 : vector<8x128xf32>
    %cst_231 = arith.constant 1.000000e+00 : f32
    %486 = vector.broadcast %cst_231 : f32 to vector<8x128xf32>
    %487 = arith.addf %486, %485 : vector<8x128xf32>
    %488 = arith.divf %486, %487 : vector<8x128xf32>
    %489 = vector.extract_strided_slice %482 {offsets = [0, 128], sizes = [8, 128], strides = [1, 1]} : vector<8x512xf32> to vector<8x128xf32>
    %490 = arith.negf %489 : vector<8x128xf32>
    %491 = math.exp %490 : vector<8x128xf32>
    %cst_232 = arith.constant 1.000000e+00 : f32
    %492 = vector.broadcast %cst_232 : f32 to vector<8x128xf32>
    %493 = arith.addf %492, %491 : vector<8x128xf32>
    %494 = arith.divf %492, %493 : vector<8x128xf32>
    %495 = vector.extract_strided_slice %482 {offsets = [0, 256], sizes = [8, 128], strides = [1, 1]} : vector<8x512xf32> to vector<8x128xf32>
    %496 = math.tanh %495 : vector<8x128xf32>
    %497 = vector.extract_strided_slice %482 {offsets = [0, 384], sizes = [8, 128], strides = [1, 1]} : vector<8x512xf32> to vector<8x128xf32>
    %498 = arith.negf %497 : vector<8x128xf32>
    %499 = math.exp %498 : vector<8x128xf32>
    %cst_233 = arith.constant 1.000000e+00 : f32
    %500 = vector.broadcast %cst_233 : f32 to vector<8x128xf32>
    %501 = arith.addf %500, %499 : vector<8x128xf32>
    %502 = arith.divf %500, %501 : vector<8x128xf32>
    %c0_234 = arith.constant 0 : index
    %c0_235 = arith.constant 0 : index
    %503 = vector.load %arg10[%c0_234, %c0_235] : memref<8x128xf32, #tpu.memory_space<vmem>>, vector<8x128xf32>
    %504 = arith.mulf %494, %503 : vector<8x128xf32>
    %505 = arith.mulf %488, %496 : vector<8x128xf32>
    %506 = arith.addf %504, %505 : vector<8x128xf32>
    %507 = math.tanh %506 : vector<8x128xf32>
    %508 = arith.mulf %502, %507 : vector<8x128xf32>
    %c0_236 = arith.constant 0 : index
    %c0_237 = arith.constant 0 : index
    %509 = vector.load %arg10[%c0_236, %c0_237] : memref<8x128xf32, #tpu.memory_space<vmem>>, vector<8x128xf32>
    tpu.vector_store %arg10[%c0_236, %c0_237], %506 {strides = array<i32>} : memref<8x128xf32, #tpu.memory_space<vmem>>, vector<8x128xf32>,
    %c0_238 = arith.constant 0 : index
    %c0_239 = arith.constant 0 : index
    %510 = vector.load %arg9[%c0_238, %c0_239] : memref<8x128xf32, #tpu.memory_space<vmem>>, vector<8x128xf32>
    tpu.vector_store %arg9[%c0_238, %c0_239], %508 {strides = array<i32>} : memref<8x128xf32, #tpu.memory_space<vmem>>, vector<8x128xf32>,
    %511 = arith.index_cast %477 : i32 to index
    %c0_240 = arith.constant 0 : index
    %512 = vector.load %arg7[%511, %c0_240] : memref<64x128xf32, #tpu.memory_space<vmem>>, vector<8x128xf32>
    tpu.vector_store %arg7[%511, %c0_240], %508 {strides = array<i32>} : memref<64x128xf32, #tpu.memory_space<vmem>>, vector<8x128xf32>,
    %c5_i32_241 = arith.constant 5 : i32
    %c8_i32_242 = arith.constant 8 : i32
    %513 = arith.muli %c5_i32_241, %c8_i32_242 : i32
    %514 = tpu.assume_multiple %513, 8 : i32
    %c0_243 = arith.constant 0 : index
    %c0_244 = arith.constant 0 : index
    %515 = vector.load %arg9[%c0_243, %c0_244] : memref<8x128xf32, #tpu.memory_space<vmem>>, vector<8x128xf32>
    %516 = arith.index_cast %514 : i32 to index
    %c0_245 = arith.constant 0 : index
    %517 = vector.load %arg8[%516, %c0_245] : memref<64x512xf32, #tpu.memory_space<vmem>>, vector<8x512xf32>
    %cst_246 = arith.constant dense<0.000000e+00> : vector<8x512xf32>
    %518 = tpu.matmul %515, %314, %cst_246 {dimension_numbers = #tpu.dot_dimension_numbers<[1], [0], [0], [1], [0, 0, 1, 1], [], []>} : vector<8x128xf32>, vector<128x512xf32>, vector<8x512xf32> -> vector<8x512xf32>
    %519 = arith.addf %517, %518 : vector<8x512xf32>
    %520 = vector.extract_strided_slice %519 {offsets = [0, 0], sizes = [8, 128], strides = [1, 1]} : vector<8x512xf32> to vector<8x128xf32>
    %521 = arith.negf %520 : vector<8x128xf32>
    %522 = math.exp %521 : vector<8x128xf32>
    %cst_247 = arith.constant 1.000000e+00 : f32
    %523 = vector.broadcast %cst_247 : f32 to vector<8x128xf32>
    %524 = arith.addf %523, %522 : vector<8x128xf32>
    %525 = arith.divf %523, %524 : vector<8x128xf32>
    %526 = vector.extract_strided_slice %519 {offsets = [0, 128], sizes = [8, 128], strides = [1, 1]} : vector<8x512xf32> to vector<8x128xf32>
    %527 = arith.negf %526 : vector<8x128xf32>
    %528 = math.exp %527 : vector<8x128xf32>
    %cst_248 = arith.constant 1.000000e+00 : f32
    %529 = vector.broadcast %cst_248 : f32 to vector<8x128xf32>
    %530 = arith.addf %529, %528 : vector<8x128xf32>
    %531 = arith.divf %529, %530 : vector<8x128xf32>
    %532 = vector.extract_strided_slice %519 {offsets = [0, 256], sizes = [8, 128], strides = [1, 1]} : vector<8x512xf32> to vector<8x128xf32>
    %533 = math.tanh %532 : vector<8x128xf32>
    %534 = vector.extract_strided_slice %519 {offsets = [0, 384], sizes = [8, 128], strides = [1, 1]} : vector<8x512xf32> to vector<8x128xf32>
    %535 = arith.negf %534 : vector<8x128xf32>
    %536 = math.exp %535 : vector<8x128xf32>
    %cst_249 = arith.constant 1.000000e+00 : f32
    %537 = vector.broadcast %cst_249 : f32 to vector<8x128xf32>
    %538 = arith.addf %537, %536 : vector<8x128xf32>
    %539 = arith.divf %537, %538 : vector<8x128xf32>
    %c0_250 = arith.constant 0 : index
    %c0_251 = arith.constant 0 : index
    %540 = vector.load %arg10[%c0_250, %c0_251] : memref<8x128xf32, #tpu.memory_space<vmem>>, vector<8x128xf32>
    %541 = arith.mulf %531, %540 : vector<8x128xf32>
    %542 = arith.mulf %525, %533 : vector<8x128xf32>
    %543 = arith.addf %541, %542 : vector<8x128xf32>
    %544 = math.tanh %543 : vector<8x128xf32>
    %545 = arith.mulf %539, %544 : vector<8x128xf32>
    %c0_252 = arith.constant 0 : index
    %c0_253 = arith.constant 0 : index
    %546 = vector.load %arg10[%c0_252, %c0_253] : memref<8x128xf32, #tpu.memory_space<vmem>>, vector<8x128xf32>
    tpu.vector_store %arg10[%c0_252, %c0_253], %543 {strides = array<i32>} : memref<8x128xf32, #tpu.memory_space<vmem>>, vector<8x128xf32>,
    %c0_254 = arith.constant 0 : index
    %c0_255 = arith.constant 0 : index
    %547 = vector.load %arg9[%c0_254, %c0_255] : memref<8x128xf32, #tpu.memory_space<vmem>>, vector<8x128xf32>
    tpu.vector_store %arg9[%c0_254, %c0_255], %545 {strides = array<i32>} : memref<8x128xf32, #tpu.memory_space<vmem>>, vector<8x128xf32>,
    %548 = arith.index_cast %514 : i32 to index
    %c0_256 = arith.constant 0 : index
    %549 = vector.load %arg7[%548, %c0_256] : memref<64x128xf32, #tpu.memory_space<vmem>>, vector<8x128xf32>
    tpu.vector_store %arg7[%548, %c0_256], %545 {strides = array<i32>} : memref<64x128xf32, #tpu.memory_space<vmem>>, vector<8x128xf32>,
    %c6_i32_257 = arith.constant 6 : i32
    %c8_i32_258 = arith.constant 8 : i32
    %550 = arith.muli %c6_i32_257, %c8_i32_258 : i32
    %551 = tpu.assume_multiple %550, 8 : i32
    %c0_259 = arith.constant 0 : index
    %c0_260 = arith.constant 0 : index
    %552 = vector.load %arg9[%c0_259, %c0_260] : memref<8x128xf32, #tpu.memory_space<vmem>>, vector<8x128xf32>
    %553 = arith.index_cast %551 : i32 to index
    %c0_261 = arith.constant 0 : index
    %554 = vector.load %arg8[%553, %c0_261] : memref<64x512xf32, #tpu.memory_space<vmem>>, vector<8x512xf32>
    %cst_262 = arith.constant dense<0.000000e+00> : vector<8x512xf32>
    %555 = tpu.matmul %552, %314, %cst_262 {dimension_numbers = #tpu.dot_dimension_numbers<[1], [0], [0], [1], [0, 0, 1, 1], [], []>} : vector<8x128xf32>, vector<128x512xf32>, vector<8x512xf32> -> vector<8x512xf32>
    %556 = arith.addf %554, %555 : vector<8x512xf32>
    %557 = vector.extract_strided_slice %556 {offsets = [0, 0], sizes = [8, 128], strides = [1, 1]} : vector<8x512xf32> to vector<8x128xf32>
    %558 = arith.negf %557 : vector<8x128xf32>
    %559 = math.exp %558 : vector<8x128xf32>
    %cst_263 = arith.constant 1.000000e+00 : f32
    %560 = vector.broadcast %cst_263 : f32 to vector<8x128xf32>
    %561 = arith.addf %560, %559 : vector<8x128xf32>
    %562 = arith.divf %560, %561 : vector<8x128xf32>
    %563 = vector.extract_strided_slice %556 {offsets = [0, 128], sizes = [8, 128], strides = [1, 1]} : vector<8x512xf32> to vector<8x128xf32>
    %564 = arith.negf %563 : vector<8x128xf32>
    %565 = math.exp %564 : vector<8x128xf32>
    %cst_264 = arith.constant 1.000000e+00 : f32
    %566 = vector.broadcast %cst_264 : f32 to vector<8x128xf32>
    %567 = arith.addf %566, %565 : vector<8x128xf32>
    %568 = arith.divf %566, %567 : vector<8x128xf32>
    %569 = vector.extract_strided_slice %556 {offsets = [0, 256], sizes = [8, 128], strides = [1, 1]} : vector<8x512xf32> to vector<8x128xf32>
    %570 = math.tanh %569 : vector<8x128xf32>
    %571 = vector.extract_strided_slice %556 {offsets = [0, 384], sizes = [8, 128], strides = [1, 1]} : vector<8x512xf32> to vector<8x128xf32>
    %572 = arith.negf %571 : vector<8x128xf32>
    %573 = math.exp %572 : vector<8x128xf32>
    %cst_265 = arith.constant 1.000000e+00 : f32
    %574 = vector.broadcast %cst_265 : f32 to vector<8x128xf32>
    %575 = arith.addf %574, %573 : vector<8x128xf32>
    %576 = arith.divf %574, %575 : vector<8x128xf32>
    %c0_266 = arith.constant 0 : index
    %c0_267 = arith.constant 0 : index
    %577 = vector.load %arg10[%c0_266, %c0_267] : memref<8x128xf32, #tpu.memory_space<vmem>>, vector<8x128xf32>
    %578 = arith.mulf %568, %577 : vector<8x128xf32>
    %579 = arith.mulf %562, %570 : vector<8x128xf32>
    %580 = arith.addf %578, %579 : vector<8x128xf32>
    %581 = math.tanh %580 : vector<8x128xf32>
    %582 = arith.mulf %576, %581 : vector<8x128xf32>
    %c0_268 = arith.constant 0 : index
    %c0_269 = arith.constant 0 : index
    %583 = vector.load %arg10[%c0_268, %c0_269] : memref<8x128xf32, #tpu.memory_space<vmem>>, vector<8x128xf32>
    tpu.vector_store %arg10[%c0_268, %c0_269], %580 {strides = array<i32>} : memref<8x128xf32, #tpu.memory_space<vmem>>, vector<8x128xf32>,
    %c0_270 = arith.constant 0 : index
    %c0_271 = arith.constant 0 : index
    %584 = vector.load %arg9[%c0_270, %c0_271] : memref<8x128xf32, #tpu.memory_space<vmem>>, vector<8x128xf32>
    tpu.vector_store %arg9[%c0_270, %c0_271], %582 {strides = array<i32>} : memref<8x128xf32, #tpu.memory_space<vmem>>, vector<8x128xf32>,
    %585 = arith.index_cast %551 : i32 to index
    %c0_272 = arith.constant 0 : index
    %586 = vector.load %arg7[%585, %c0_272] : memref<64x128xf32, #tpu.memory_space<vmem>>, vector<8x128xf32>
    tpu.vector_store %arg7[%585, %c0_272], %582 {strides = array<i32>} : memref<64x128xf32, #tpu.memory_space<vmem>>, vector<8x128xf32>,
    %c7_i32_273 = arith.constant 7 : i32
    %c8_i32_274 = arith.constant 8 : i32
    %587 = arith.muli %c7_i32_273, %c8_i32_274 : i32
    %588 = tpu.assume_multiple %587, 8 : i32
    %c0_275 = arith.constant 0 : index
    %c0_276 = arith.constant 0 : index
    %589 = vector.load %arg9[%c0_275, %c0_276] : memref<8x128xf32, #tpu.memory_space<vmem>>, vector<8x128xf32>
    %590 = arith.index_cast %588 : i32 to index
    %c0_277 = arith.constant 0 : index
    %591 = vector.load %arg8[%590, %c0_277] : memref<64x512xf32, #tpu.memory_space<vmem>>, vector<8x512xf32>
    %cst_278 = arith.constant dense<0.000000e+00> : vector<8x512xf32>
    %592 = tpu.matmul %589, %314, %cst_278 {dimension_numbers = #tpu.dot_dimension_numbers<[1], [0], [0], [1], [0, 0, 1, 1], [], []>} : vector<8x128xf32>, vector<128x512xf32>, vector<8x512xf32> -> vector<8x512xf32>
    %593 = arith.addf %591, %592 : vector<8x512xf32>
    %594 = vector.extract_strided_slice %593 {offsets = [0, 0], sizes = [8, 128], strides = [1, 1]} : vector<8x512xf32> to vector<8x128xf32>
    %595 = arith.negf %594 : vector<8x128xf32>
    %596 = math.exp %595 : vector<8x128xf32>
    %cst_279 = arith.constant 1.000000e+00 : f32
    %597 = vector.broadcast %cst_279 : f32 to vector<8x128xf32>
    %598 = arith.addf %597, %596 : vector<8x128xf32>
    %599 = arith.divf %597, %598 : vector<8x128xf32>
    %600 = vector.extract_strided_slice %593 {offsets = [0, 128], sizes = [8, 128], strides = [1, 1]} : vector<8x512xf32> to vector<8x128xf32>
    %601 = arith.negf %600 : vector<8x128xf32>
    %602 = math.exp %601 : vector<8x128xf32>
    %cst_280 = arith.constant 1.000000e+00 : f32
    %603 = vector.broadcast %cst_280 : f32 to vector<8x128xf32>
    %604 = arith.addf %603, %602 : vector<8x128xf32>
    %605 = arith.divf %603, %604 : vector<8x128xf32>
    %606 = vector.extract_strided_slice %593 {offsets = [0, 256], sizes = [8, 128], strides = [1, 1]} : vector<8x512xf32> to vector<8x128xf32>
    %607 = math.tanh %606 : vector<8x128xf32>
    %608 = vector.extract_strided_slice %593 {offsets = [0, 384], sizes = [8, 128], strides = [1, 1]} : vector<8x512xf32> to vector<8x128xf32>
    %609 = arith.negf %608 : vector<8x128xf32>
    %610 = math.exp %609 : vector<8x128xf32>
    %cst_281 = arith.constant 1.000000e+00 : f32
    %611 = vector.broadcast %cst_281 : f32 to vector<8x128xf32>
    %612 = arith.addf %611, %610 : vector<8x128xf32>
    %613 = arith.divf %611, %612 : vector<8x128xf32>
    %c0_282 = arith.constant 0 : index
    %c0_283 = arith.constant 0 : index
    %614 = vector.load %arg10[%c0_282, %c0_283] : memref<8x128xf32, #tpu.memory_space<vmem>>, vector<8x128xf32>
    %615 = arith.mulf %605, %614 : vector<8x128xf32>
    %616 = arith.mulf %599, %607 : vector<8x128xf32>
    %617 = arith.addf %615, %616 : vector<8x128xf32>
    %618 = math.tanh %617 : vector<8x128xf32>
    %619 = arith.mulf %613, %618 : vector<8x128xf32>
    %c0_284 = arith.constant 0 : index
    %c0_285 = arith.constant 0 : index
    %620 = vector.load %arg10[%c0_284, %c0_285] : memref<8x128xf32, #tpu.memory_space<vmem>>, vector<8x128xf32>
    tpu.vector_store %arg10[%c0_284, %c0_285], %617 {strides = array<i32>} : memref<8x128xf32, #tpu.memory_space<vmem>>, vector<8x128xf32>,
    %c0_286 = arith.constant 0 : index
    %c0_287 = arith.constant 0 : index
    %621 = vector.load %arg9[%c0_286, %c0_287] : memref<8x128xf32, #tpu.memory_space<vmem>>, vector<8x128xf32>
    tpu.vector_store %arg9[%c0_286, %c0_287], %619 {strides = array<i32>} : memref<8x128xf32, #tpu.memory_space<vmem>>, vector<8x128xf32>,
    %622 = arith.index_cast %588 : i32 to index
    %c0_288 = arith.constant 0 : index
    %623 = vector.load %arg7[%622, %c0_288] : memref<64x128xf32, #tpu.memory_space<vmem>>, vector<8x128xf32>
    tpu.vector_store %arg7[%622, %c0_288], %619 {strides = array<i32>} : memref<64x128xf32, #tpu.memory_space<vmem>>, vector<8x128xf32>,
    %c8_i32_289 = arith.constant 8 : i32
    %c0_290 = arith.constant 0 : index
    %c0_291 = arith.constant 0 : index
    %624 = vector.load %arg7[%c0_290, %c0_291] : memref<64x128xf32, #tpu.memory_space<vmem>>, vector<64x128xf32>
    %c0_292 = arith.constant 0 : index
    %c0_293 = arith.constant 0 : index
    %625 = vector.load %arg4[%c0_292, %c0_293] : memref<128x128xf32, #tpu.memory_space<vmem>>, vector<128x128xf32>
    %cst_294 = arith.constant dense<0.000000e+00> : vector<64x128xf32>
    %626 = tpu.matmul %624, %625, %cst_294 {dimension_numbers = #tpu.dot_dimension_numbers<[1], [0], [0], [1], [0, 0, 1, 1], [], []>} : vector<64x128xf32>, vector<128x128xf32>, vector<64x128xf32> -> vector<64x128xf32>
    %c0_295 = arith.constant 0 : index
    %c0_296 = arith.constant 0 : index
    %627 = vector.load %arg5[%c0_295, %c0_296] : memref<1x128xf32, #tpu.memory_space<vmem>>, vector<1x128xf32>
    %628 = vector.broadcast %627 : vector<1x128xf32> to vector<64x128xf32>
    %629 = arith.addf %626, %628 : vector<64x128xf32>
    %c0_297 = arith.constant 0 : index
    %c0_298 = arith.constant 0 : index
    %630 = vector.load %arg6[%c0_297, %c0_298] : memref<64x128xf32, #tpu.memory_space<vmem>>, vector<64x128xf32>
    tpu.vector_store %arg6[%c0_297, %c0_298], %629 {strides = array<i32>} : memref<64x128xf32, #tpu.memory_space<vmem>>, vector<64x128xf32>,
    return
  }
}

</mosaic_0001>

<bundles_post_ra>
// kernel: tpu_custom_call.1
= control target key start
LH: loop header
LB: loop body
LE: loop exit
PB: predicated region body
PF: predicated region fallthrough
CT: control target
= control target key end

     0   :  { %11 = vsyncpa [#allocation7], 0  ;;  %s6941_s0 = inlined_call_operand.hbm [shape: f32[64,128], index: 0, kind: input, shape index: {}]   ;;  %s6942_s1 = inlined_call_operand.hbm [shape: f32[2,128,512], index: 1, kind: input, shape index: {}]   ;;  %s6943_s2 = inlined_call_operand.hbm [shape: f32[2,128,512], index: 2, kind: input, shape index: {}]   ;;  %s6944_s3 = inlined_call_operand.vmem [shape: f32[2,1,512], index: 3, kind: input, shape index: {}]   ;;  %s6945_s4 = inlined_call_operand.hbm [shape: f32[128,128], index: 4, kind: input, shape index: {}]   ;;  %s6946_s5 = inlined_call_operand.vmem [shape: f32[1,128], index: 5, kind: input, shape index: {}]   ;;  %s6947_s6 = inlined_call_operand.hbm [shape: f32[64,128], index: 6, kind: output, shape index: {}]  }
   0x1   :  { %12 = vsyncpa [#allocation10], 0 }
   0x2   :  { %13 = vsyncpa [#allocation13], 0 }
   0x3   :  { %14 = vsyncpa [#allocation8], 0  ;;  %s5813_s21 = smov [#allocation9]   ;;  %s5695_s25 = scalar_lea.hbm %s6942_s1, 16384 }
   0x4   :  { %s32_s22 = sshll.u32 %s5813_s21, 4  ;;  %p5696_p0 = scmp.ne.s32.totalorder %s6942_s1, %s5695_s25  ;;  %s33_s22 = int_to_ptr.vmem [resolvable:$true] %s32_s22 }
   0x5   :  { %p5699_p1 = scmp.lt.u32.totalorder %s5695_s25, %s6942_s1 }
   0x7   :  { %p5701_p2 = pnand %p5699_p1, %p5696_p0 }
   0x9   :  { %5704 = shalt.err (!%p5701_p2)
}
   0xa   :  { %s5705_s30 = scalar_lea.vmem %s33_s22, 16384  ;;  %p5710_p4 = scmp.lt.s32.totalorder %s33_s22, %s33_s22 }
   0xb   :  { %p5706_p3 = scmp.ne.s32.totalorder %s33_s22, %s5705_s30  ;;  %p5711_p5 = scmp.lt.s32.totalorder %s5705_s30, %s5705_s30 }
   0xd   :  { %p5712_p6 = por %p5711_p5, %p5710_p4 }
   0xf   :  { %p5713_p7 = pnand %p5712_p6, %p5706_p3 }
  0x11   :  { %5716 = shalt.err (!%p5713_p7)
}
  0x12   :  { %s5814_s7 = smov 512   ;;  %s5815_s8 = smov 32  }
  0x13   :  { %38 = dma.hbm_to_vmem [thread:$0]  %s6942_s1, 16384, %s33_s22, [#allocation10], %s5814_s7, %s5814_s7, %s5815_s8  }
  0x14   :  { %s5816_s11 = smov [#allocation6]   ;;  %s5717_s15 = scalar_lea.hbm %s6941_s0, 1024 }
  0x15   :  { %s20_s12 = sshll.u32 %s5816_s11, 4  ;;  %p5718_p8 = scmp.ne.s32.totalorder %s6941_s0, %s5717_s15  ;;  %s21_s12 = int_to_ptr.vmem [resolvable:$true] %s20_s12 }
  0x16   :  { %p5721_p9 = scmp.lt.u32.totalorder %s5717_s15, %s6941_s0 }
  0x18   :  { %p5723_p10 = pnand %p5721_p9, %p5718_p8 }
  0x1a   :  { %5726 = shalt.err (!%p5723_p10)
}
  0x1b   :  { %s5727_s20 = scalar_lea.vmem %s21_s12, 1024  ;;  %p5732_p12 = scmp.lt.s32.totalorder %s21_s12, %s21_s12 }
  0x1c   :  { %p5728_p11 = scmp.ne.s32.totalorder %s21_s12, %s5727_s20  ;;  %p5733_p13 = scmp.lt.s32.totalorder %s5727_s20, %s5727_s20 }
  0x1e   :  { %p5734_p0 = por %p5733_p13, %p5732_p12 }
  0x20   :  { %p5735_p1 = pnand %p5734_p0, %p5728_p11 }
  0x22   :  { %5738 = shalt.err (!%p5735_p1)
}
  0x23   :  { %s5817_s1 = smov 128   ;;  %s5818_s21 = smov 8  }
  0x24   :  { %26 = dma.hbm_to_vmem [thread:$0]  %s6941_s0, 1024, %s21_s12, [#allocation7], %s5817_s1, %s5817_s1, %s5818_s21  }
  0x25   :  { %s5819_s24 = smov [#allocation11]   ;;  %s5820_s26 = smov [#allocation12]  }
  0x26   :  { %s44_s25 = sshll.u32 %s5819_s24, 4  ;;  %s58_s27 = sshll.u32 %s5820_s26, 4  ;;  %s45_s25 = int_to_ptr.vmem [resolvable:$true] %s44_s25  ;;  %s5888_s27 = int_to_ptr.vmem [resolvable:$true] %s58_s27 }
  0x27   :  { %s5739_s30 = scalar_lea.hbm %s6943_s2, 16384 }
  0x28   :  { %p5740_p2 = scmp.ne.s32.totalorder %s6943_s2, %s5739_s30  ;;  %p5743_p3 = scmp.lt.u32.totalorder %s5739_s30, %s6943_s2 }
  0x2a   :  { %p5745_p4 = pnand %p5743_p3, %p5740_p2 }
  0x2c   :  { %5748 = shalt.err (!%p5745_p4)
}
  0x2d   :  { %s5749_s0 = scalar_lea.vmem %s45_s25, 16384  ;;  %p5754_p6 = scmp.lt.s32.totalorder %s45_s25, %s45_s25 }
  0x2e   :  { %p5750_p5 = scmp.ne.s32.totalorder %s45_s25, %s5749_s0  ;;  %p5755_p7 = scmp.lt.s32.totalorder %s5749_s0, %s5749_s0 }
  0x30   :  { %p5756_p8 = por %p5755_p7, %p5754_p6 }
  0x32   :  { %p5757_p9 = pnand %p5756_p8, %p5750_p5 }
  0x34   :  { %5760 = shalt.err (!%p5757_p9)
}
  0x35   :  { %50 = dma.hbm_to_vmem [thread:$0]  %s6943_s2, 16384, %s45_s25, [#allocation10], %s5814_s7, %s5814_s7, %s5815_s8  }
  0x36   :  { %s5761_s17 = scalar_lea.hbm %s6945_s4, 2048 }
  0x37   :  { %p5762_p10 = scmp.ne.s32.totalorder %s6945_s4, %s5761_s17  ;;  %p5765_p11 = scmp.lt.u32.totalorder %s5761_s17, %s6945_s4 }
  0x39   :  { %p5767_p12 = pnand %p5765_p11, %p5762_p10 }
  0x3b   :  { %5770 = shalt.err (!%p5767_p12)
}
  0x3c   :  { %s5771_s23 = scalar_lea.vmem %s5888_s27, 2048  ;;  %p5776_p0 = scmp.lt.s32.totalorder %s5888_s27, %s5888_s27 }
  0x3d   :  { %p5772_p13 = scmp.ne.s32.totalorder %s5888_s27, %s5771_s23  ;;  %p5777_p1 = scmp.lt.s32.totalorder %s5771_s23, %s5771_s23 }
  0x3f   :  { %p5778_p2 = por %p5777_p1, %p5776_p0 }
  0x41   :  { %p5779_p3 = pnand %p5778_p2, %p5772_p13 }
  0x43   :  { %5782 = shalt.err (!%p5779_p3)
}
  0x44   :  { %64 = dma.hbm_to_vmem [thread:$0]  %s6945_s4, 2048, %s5888_s27, [#allocation13], %s5817_s1, %s5817_s1, %s5818_s21  }
  0x45   :  { %5805 = dma.done.wait [#allocation7], 1024  }
  0x46   :  { %5806 = vsyncadd [#allocation7], 4294966272 }
  0x47   :  { %5807 = dma.done.wait [#allocation10], 32768  }
  0x48   :  { %5808 = vsyncadd [#allocation10], 4294934528 }
  0x49   :  { %5809 = dma.done.wait [#allocation13], 2048  }
  0x4a   :  { %5810 = vsyncadd [#allocation13], 4294965248  ;;  %v6951_v0 = vmov 0.0   ;;  %v168_v1 = vld [vmem:[#allocation9 + $0x8] sm:$0xff]  ;;  %v167_v3 = vld [vmem:[#allocation9] sm:$0xff] }
  0x4b   :  { %317 = vmatprep.mubr.f32.mxu1 %v6951_v0  ;;  %585 = vmatprep.mubr.f32.mxu0 %v6951_v0  ;;  %v172_v2 = vld [vmem:[#allocation9 + $0x28] sm:$0xff]  ;;  %v171_v5 = vld [vmem:[#allocation9 + $0x20] sm:$0xff] }
  0x4c   :  { %v4117_v4 = vpack.c.bf16 %v172_v2, %v168_v1  ;;  %v96_v6 = vld [vmem:[#allocation11 + $0x8] sm:$0xff]  ;;  %v4119_v8 = vpack.c.bf16 %v171_v5, %v167_v3  ;;  %v95_v10 = vld [vmem:[#allocation11] sm:$0xff] }
  0x4d   :  { %v100_v7 = vld [vmem:[#allocation11 + $0x28] sm:$0xff]  ;;  %v99_v11 = vld [vmem:[#allocation11 + $0x20] sm:$0xff] }
  0x4e   :  { %v5927_v9 = vpack.c.bf16 %v100_v7, %v96_v6  ;;  %v176_v12 = vld [vmem:[#allocation9 + $0x48] sm:$0xff]  ;;  %4118 = vmatprep.subr.bf16.mxu1 %v4117_v4  ;;  %v5929_v13 = vpack.c.bf16 %v99_v11, %v95_v10  ;;  %v175_v15 = vld [vmem:[#allocation9 + $0x40] sm:$0xff] }
  0x4f   :  { %v180_v14 = vld [vmem:[#allocation9 + $0x68] sm:$0xff]  ;;  %v179_v16 = vld [vmem:[#allocation9 + $0x60] sm:$0xff]  ;;  %4120 = vmatpush1.bf16.msra.mxu1 %v4119_v8 }
  0x50   :  { %4182 = vmatprep.subr.bf16.mxu0 %v5927_v9  ;;  %v4121_v17 = vpack.c.bf16 %v180_v14, %v176_v12  ;;  %v4123_v18 = vpack.c.bf16 %v179_v16, %v175_v15  ;;  %v104_v19 = vld [vmem:[#allocation11 + $0x48] sm:$0xff]  ;;  %v103_v21 = vld [vmem:[#allocation11 + $0x40] sm:$0xff] }
  0x51   :  { %v108_v20 = vld [vmem:[#allocation11 + $0x68] sm:$0xff]  ;;  %4184 = vmatpush1.bf16.msra.mxu0 %v5929_v13  ;;  %v107_v23 = vld [vmem:[#allocation11 + $0x60] sm:$0xff] }
  0x52   :  { %v5933_v22 = vpack.c.bf16 %v108_v20, %v104_v19  ;;  %v184_v24 = vld [vmem:[#allocation9 + $0x88] sm:$0xff]  ;;  %4122 = vmatprep.subr.bf16.mxu1 %v4121_v17  ;;  %v5935_v26 = vpack.c.bf16 %v107_v23, %v103_v21  ;;  %v183_v28 = vld [vmem:[#allocation9 + $0x80] sm:$0xff] }
  0x53   :  { %v188_v25 = vld [vmem:[#allocation9 + $0xa8] sm:$0xff]  ;;  %v187_v29 = vld [vmem:[#allocation9 + $0xa0] sm:$0xff]  ;;  %4124 = vmatpush1.bf16.msra.mxu1 %v4123_v18 }
  0x54   :  { %v4125_v27 = vpack.c.bf16 %v188_v25, %v184_v24  ;;  %v112_v30 = vld [vmem:[#allocation11 + $0x88] sm:$0xff]  ;;  %4186 = vmatprep.subr.bf16.mxu0 %v5933_v22  ;;  %v111_v32 = vld [vmem:[#allocation11 + $0x80] sm:$0xff]  ;;  %v4127_v34 = vpack.c.bf16 %v187_v29, %v183_v28 }
  0x55   :  { %v116_v31 = vld [vmem:[#allocation11 + $0xa8] sm:$0xff]  ;;  %v115_v33 = vld [vmem:[#allocation11 + $0xa0] sm:$0xff]  ;;  %4188 = vmatpush1.bf16.msra.mxu0 %v5935_v26 }
  0x56   :  { %v5938_v35 = vpack.c.bf16 %v116_v31, %v112_v30  ;;  %v192_v36 = vld [vmem:[#allocation9 + $0xc8] sm:$0xff]  ;;  %v191_v38 = vld [vmem:[#allocation9 + $0xc0] sm:$0xff]  ;;  %4126 = vmatprep.subr.bf16.mxu1 %v4125_v27  ;;  %v5941_v39 = vpack.c.bf16 %v115_v33, %v111_v32 }
  0x57   :  { %v196_v37 = vld [vmem:[#allocation9 + $0xe8] sm:$0xff]  ;;  %v195_v41 = vld [vmem:[#allocation9 + $0xe0] sm:$0xff]  ;;  %4128 = vmatpush1.bf16.msra.mxu1 %v4127_v34 }
  0x58   :  { %v4129_v40 = vpack.c.bf16 %v196_v37, %v192_v36  ;;  %v120_v42 = vld [vmem:[#allocation11 + $0xc8] sm:$0xff]  ;;  %4190 = vmatprep.subr.bf16.mxu0 %v5938_v35  ;;  %v119_v45 = vld [vmem:[#allocation11 + $0xc0] sm:$0xff]  ;;  %v4131_v49 = vpack.c.bf16 %v195_v41, %v191_v38  ;;  %v170_v37 = vld [vmem:[#allocation9 + $0x18] sm:$0xff] }
  0x59   :  { %v124_v43 = vld [vmem:[#allocation11 + $0xe8] sm:$0xff]  ;;  %v123_v46 = vld [vmem:[#allocation11 + $0xe0] sm:$0xff]  ;;  %4192 = vmatpush1.bf16.msra.mxu0 %v5941_v39  ;;  %v174_v38 = vld [vmem:[#allocation9 + $0x38] sm:$0xff] }
  0x5a   :  { %v5944_v44 = vpack.c.bf16 %v124_v43, %v120_v42  ;;  %v200_v47 = vld [vmem:[#allocation9 + $0x108] sm:$0xff]  ;;  %4130 = vmatprep.subr.bf16.mxu1 %v4129_v40  ;;  %v5947_v52 = vpack.c.bf16 %v123_v46, %v119_v45  ;;  %v199_v54 = vld [vmem:[#allocation9 + $0x100] sm:$0xff]  ;;  %v4149_v42 = vpack.c.bf16 %v174_v38, %v170_v37  ;;  %v169_v43 = vld [vmem:[#allocation9 + $0x10] sm:$0xff] }
  0x5b   :  { %v204_v48 = vld [vmem:[#allocation9 + $0x128] sm:$0xff]  ;;  %v203_v55 = vld [vmem:[#allocation9 + $0x120] sm:$0xff]  ;;  %4132 = vmatpush1.bf16.msra.mxu1 %v4131_v49  ;;  %v173_v45 = vld [vmem:[#allocation9 + $0x30] sm:$0xff] }
  0x5c   :  { %v128_v50 = vld [vmem:[#allocation11 + $0x108] sm:$0xff]  ;;  %v4133_v53 = vpack.c.bf16 %v204_v48, %v200_v47  ;;  %v127_v56 = vld [vmem:[#allocation11 + $0x100] sm:$0xff]  ;;  %4194 = vmatprep.subr.bf16.mxu0 %v5944_v44  ;;  %v4135_v63 = vpack.c.bf16 %v203_v55, %v199_v54  ;;  %v178_v46 = vld [vmem:[#allocation9 + $0x58] sm:$0xff]  ;;  %v4151_v49 = vpack.c.bf16 %v173_v45, %v169_v43 }
  0x5d   :  { %v132_v51 = vld [vmem:[#allocation11 + $0x128] sm:$0xff]  ;;  %v131_v58 = vld [vmem:[#allocation11 + $0x120] sm:$0xff]  ;;  %4196 = vmatpush1.bf16.msra.mxu0 %v5947_v52  ;;  %v182_v47 = vld [vmem:[#allocation9 + $0x78] sm:$0xff] }
  0x5e   :  { %v5950_v57 = vpack.c.bf16 %v132_v51, %v128_v50  ;;  %v208_v59 = vld [vmem:[#allocation9 + $0x148] sm:$0xff]  ;;  %4134 = vmatprep.subr.bf16.mxu1 %v4133_v53  ;;  %v5953_v1 = vpack.c.bf16 %v131_v58, %v127_v56  ;;  %v207_v3 = vld [vmem:[#allocation9 + $0x140] sm:$0xff]  ;;  %v4153_v50 = vpack.c.bf16 %v182_v47, %v178_v46  ;;  %v177_v51 = vld [vmem:[#allocation9 + $0x50] sm:$0xff] }
  0x5f   :  { %v212_v60 = vld [vmem:[#allocation9 + $0x168] sm:$0xff]  ;;  %v211_v4 = vld [vmem:[#allocation9 + $0x160] sm:$0xff]  ;;  %4136 = vmatpush1.bf16.msra.mxu1 %v4135_v63  ;;  %v181_v53 = vld [vmem:[#allocation9 + $0x70] sm:$0xff] }
  0x60   :  { %v136_v61 = vld [vmem:[#allocation11 + $0x148] sm:$0xff]  ;;  %v4137_v2 = vpack.c.bf16 %v212_v60, %v208_v59  ;;  %v135_v5 = vld [vmem:[#allocation11 + $0x140] sm:$0xff]  ;;  %4198 = vmatprep.subr.bf16.mxu0 %v5950_v57  ;;  %v4139_v14 = vpack.c.bf16 %v211_v4, %v207_v3  ;;  %v186_v54 = vld [vmem:[#allocation9 + $0x98] sm:$0xff]  ;;  %v4155_v58 = vpack.c.bf16 %v181_v53, %v177_v51 }
  0x61   :  { %v140_v62 = vld [vmem:[#allocation11 + $0x168] sm:$0xff]  ;;  %v139_v7 = vld [vmem:[#allocation11 + $0x160] sm:$0xff]  ;;  %4200 = vmatpush1.bf16.msra.mxu0 %v5953_v1  ;;  %v190_v55 = vld [vmem:[#allocation9 + $0xb8] sm:$0xff] }
  0x62   :  { %v5956_v6 = vpack.c.bf16 %v140_v62, %v136_v61  ;;  %v216_v8 = vld [vmem:[#allocation9 + $0x188] sm:$0xff]  ;;  %4138 = vmatprep.subr.bf16.mxu1 %v4137_v2  ;;  %v5959_v15 = vpack.c.bf16 %v139_v7, %v135_v5  ;;  %v215_v17 = vld [vmem:[#allocation9 + $0x180] sm:$0xff]  ;;  %v4157_v59 = vpack.c.bf16 %v190_v55, %v186_v54  ;;  %v185_v60 = vld [vmem:[#allocation9 + $0x90] sm:$0xff] }
  0x63   :  { %v220_v10 = vld [vmem:[#allocation9 + $0x1a8] sm:$0xff]  ;;  %v219_v18 = vld [vmem:[#allocation9 + $0x1a0] sm:$0xff]  ;;  %4140 = vmatpush1.bf16.msra.mxu1 %v4139_v14  ;;  %v189_v61 = vld [vmem:[#allocation9 + $0xb0] sm:$0xff] }
  0x64   :  { %v144_v11 = vld [vmem:[#allocation11 + $0x188] sm:$0xff]  ;;  %v4141_v16 = vpack.c.bf16 %v220_v10, %v216_v8  ;;  %v143_v19 = vld [vmem:[#allocation11 + $0x180] sm:$0xff]  ;;  %4202 = vmatprep.subr.bf16.mxu0 %v5956_v6  ;;  %v4143_v28 = vpack.c.bf16 %v219_v18, %v215_v17  ;;  %v194_v62 = vld [vmem:[#allocation9 + $0xd8] sm:$0xff]  ;;  %v4159_v3 = vpack.c.bf16 %v189_v61, %v185_v60 }
  0x65   :  { %v148_v12 = vld [vmem:[#allocation11 + $0x1a8] sm:$0xff]  ;;  %v147_v21 = vld [vmem:[#allocation11 + $0x1a0] sm:$0xff]  ;;  %4204 = vmatpush1.bf16.msra.mxu0 %v5959_v15  ;;  %v198_v63 = vld [vmem:[#allocation9 + $0xf8] sm:$0xff] }
  0x66   :  { %v5962_v20 = vpack.c.bf16 %v148_v12, %v144_v11  ;;  %v224_v23 = vld [vmem:[#allocation9 + $0x1c8] sm:$0xff]  ;;  %4142 = vmatprep.subr.bf16.mxu1 %v4141_v16  ;;  %v5965_v29 = vpack.c.bf16 %v147_v21, %v143_v19  ;;  %v223_v31 = vld [vmem:[#allocation9 + $0x1c0] sm:$0xff]  ;;  %v5988_v2 = vld [vmem:[#allocation6 + $0x10] sm:$0xff]  ;;  %v4161_v4 = vpack.c.bf16 %v198_v63, %v194_v62 }
  0x67   :  { %v228_v24 = vld [vmem:[#allocation9 + $0x1e8] sm:$0xff]  ;;  %v227_v32 = vld [vmem:[#allocation9 + $0x1e0] sm:$0xff]  ;;  %4144 = vmatpush1.bf16.msra.mxu1 %v4143_v28  ;;  %v193_v5 = vld [vmem:[#allocation9 + $0xd0] sm:$0xff] }
  0x68   :  { %v152_v25 = vld [vmem:[#allocation11 + $0x1c8] sm:$0xff]  ;;  %v4145_v30 = vpack.c.bf16 %v228_v24, %v224_v23  ;;  %v151_v33 = vld [vmem:[#allocation11 + $0x1c0] sm:$0xff]  ;;  %4206 = vmatprep.subr.bf16.mxu0 %v5962_v20  ;;  %v4147_v40 = vpack.c.bf16 %v227_v32, %v223_v31  ;;  %v197_v7 = vld [vmem:[#allocation9 + $0xf0] sm:$0xff] }
  0x69   :  { %v156_v27 = vld [vmem:[#allocation11 + $0x1e8] sm:$0xff]  ;;  %v155_v36 = vld [vmem:[#allocation11 + $0x1e0] sm:$0xff]  ;;  %4208 = vmatpush1.bf16.msra.mxu0 %v5965_v29  ;;  %v202_v8 = vld [vmem:[#allocation9 + $0x118] sm:$0xff]  ;;  %v4163_v12 = vpack.c.bf16 %v197_v7, %v193_v5 }
  0x6a   :  { %v5968_v34 = vpack.c.bf16 %v156_v27, %v152_v25  ;;  %4146 = vmatprep.subr.bf16.mxu1 %v4145_v30  ;;  %v5971_v41 = vpack.c.bf16 %v155_v36, %v151_v33  ;;  %v5974_v48 = vld [vmem:[#allocation6] sm:$0xff]  ;;  %v5980_v56 = vld [vmem:[#allocation6 + $0x8] sm:$0xff]  ;;  %v206_v10 = vld [vmem:[#allocation9 + $0x138] sm:$0xff] }
  0x6b   :  { %4148 = vmatpush1.bf16.msra.mxu1 %v4147_v40  ;;  %v5994_v11 = vld [vmem:[#allocation6 + $0x18] sm:$0xff]  ;;  %v4165_v14 = vpack.c.bf16 %v206_v10, %v202_v8  ;;  %v201_v16 = vld [vmem:[#allocation9 + $0x110] sm:$0xff]  ;;  %v6000_v21 = vld [vmem:[#allocation6 + $0x20] sm:$0xff] }
  0x6c   :  { %4210 = vmatprep.subr.bf16.mxu0 %v5968_v34  ;;  %4150 = vmatprep.subr.bf16.mxu1 %v4149_v42  ;;  %v205_v17 = vld [vmem:[#allocation9 + $0x130] sm:$0xff]  ;;  %v210_v18 = vld [vmem:[#allocation9 + $0x158] sm:$0xff]  ;;  %v6006_v31 = vld [vmem:[#allocation6 + $0x28] sm:$0xff] }
  0x6d   :  { %4212 = vmatpush1.bf16.msra.mxu0 %v5971_v41  ;;  %v214_v19 = vld [vmem:[#allocation9 + $0x178] sm:$0xff]  ;;  %v4167_v23 = vpack.c.bf16 %v205_v17, %v201_v16  ;;  %v209_v25 = vld [vmem:[#allocation9 + $0x150] sm:$0xff] }
  0x6e   :  { %4246 = vmatprep.subr.bf16.mxu0 %v5927_v9  ;;  %318 = vmatmul.mubr.f32.vlgmr.msra.gmra.mrb[0].mxu1 %v5974_v48  ;;  %v4169_v24 = vpack.c.bf16 %v214_v19, %v210_v18  ;;  %v213_v27 = vld [vmem:[#allocation9 + $0x170] sm:$0xff]  ;;  %v218_v28 = vld [vmem:[#allocation9 + $0x198] sm:$0xff] }
  0x6f   :  { %4152 = vmatpush1.bf16.msra.mxu1 %v4151_v49  ;;  %323 = vmatprep.mubr.f32.mxu1 %v6951_v0  ;;  %v222_v30 = vld [vmem:[#allocation9 + $0x1b8] sm:$0xff]  ;;  %v4171_v32 = vpack.c.bf16 %v213_v27, %v209_v25  ;;  %v217_v36 = vld [vmem:[#allocation9 + $0x190] sm:$0xff] }
  0x70   :  { %586 = vmatmul.mubr.f32.vlgmr.msra.gmra.mrb[0].mxu0 %v6951_v0  ;;  %4154 = vmatprep.subr.bf16.mxu1 %v4153_v50  ;;  %v4173_v33 = vpack.c.bf16 %v222_v30, %v218_v28  ;;  %v221_v37 = vld [vmem:[#allocation9 + $0x1b0] sm:$0xff]  ;;  %v226_v38 = vld [vmem:[#allocation9 + $0x1d8] sm:$0xff] }
  0x71   :  { %4248 = vmatpush1.bf16.msra.mxu0 %v5929_v13  ;;  %767 = vmatprep.mubr.f32.mxu0 %v6951_v0  ;;  %v230_v40 = vld [vmem:[#allocation9 + $0x1f8] sm:$0xff]  ;;  %v6012_v42 = vld [vmem:[#allocation6 + $0x30] sm:$0xff]  ;;  %v4175_v43 = vpack.c.bf16 %v221_v37, %v217_v36 }
  0x72   :  { %324 = vmatmul.mubr.f32.gmra.mrb[2].mxu1 %v5980_v56  ;;  %4250 = vmatprep.subr.bf16.mxu0 %v5933_v22  ;;  %v4177_v45 = vpack.c.bf16 %v230_v40, %v226_v38  ;;  %v225_v46 = vld [vmem:[#allocation9 + $0x1d0] sm:$0xff]  ;;  %v98_v49 = vld [vmem:[#allocation11 + $0x18] sm:$0xff] }
  0x73   :  { %4156 = vmatpush1.bf16.msra.mxu1 %v4155_v58  ;;  %329 = vmatprep.mubr.f32.mxu1 %v6951_v0  ;;  %v229_v47 = vld [vmem:[#allocation9 + $0x1f0] sm:$0xff]  ;;  %v102_v50 = vld [vmem:[#allocation11 + $0x38] sm:$0xff] }
  0x74   :  { %4158 = vmatprep.subr.bf16.mxu1 %v4157_v59  ;;  %v6018_v51 = vld [vmem:[#allocation6 + $0x38] sm:$0xff]  ;;  %v4179_v53 = vpack.c.bf16 %v229_v47, %v225_v46  ;;  %v6020_v54 = vpack.c.bf16 %v102_v50, %v98_v49  ;;  %v97_v55 = vld [vmem:[#allocation11 + $0x10] sm:$0xff] }
  0x75   :  { %4252 = vmatpush1.bf16.msra.mxu0 %v5935_v26  ;;  %v101_v58 = vld [vmem:[#allocation11 + $0x30] sm:$0xff]  ;;  %v106_v59 = vld [vmem:[#allocation11 + $0x58] sm:$0xff] }
  0x76   :  { %330 = vmatmul.mubr.f32.gmra.mrb[4].mxu1 %v5988_v2  ;;  %4254 = vmatprep.subr.bf16.mxu0 %v5938_v35  ;;  %v110_v60 = vld [vmem:[#allocation11 + $0x78] sm:$0xff]  ;;  %v6026_v61 = vpack.c.bf16 %v101_v58, %v97_v55  ;;  %v105_v63 = vld [vmem:[#allocation11 + $0x50] sm:$0xff] }
  0x77   :  { %4160 = vmatpush1.bf16.msra.mxu1 %v4159_v3  ;;  %335 = vmatprep.mubr.f32.mxu1 %v6951_v0  ;;  %v6029_v62 = vpack.c.bf16 %v110_v60, %v106_v59  ;;  %v109_v3 = vld [vmem:[#allocation11 + $0x70] sm:$0xff]  ;;  %v118_v5 = vld [vmem:[#allocation11 + $0xb8] sm:$0xff]  ;;  %v231_v59 = vld [vmem:[%s6944_s3] sm:$0xf] }
  0x78   :  { %4162 = vmatprep.subr.bf16.mxu1 %v4161_v4  ;;  %v114_v4 = vld [vmem:[#allocation11 + $0x98] sm:$0xff]  ;;  %v6036_v7 = vpack.c.bf16 %v109_v3, %v105_v63  ;;  %v113_v10 = vld [vmem:[#allocation11 + $0x90] sm:$0xff] }
  0x79   :  { %4256 = vmatpush1.bf16.msra.mxu0 %v5941_v39  ;;  %v6039_v8 = vpack.c.bf16 %v118_v5, %v114_v4  ;;  %v126_v16 = vld [vmem:[#allocation11 + $0xf8] sm:$0xff]  ;;  %v121_v18 = vld [vmem:[#allocation11 + $0xd0] sm:$0xff] }
  0x7a   :  { %336 = vmatmul.mubr.f32.gmra.mrb[6].mxu1 %v5994_v11  ;;  %4258 = vmatprep.subr.bf16.mxu0 %v5944_v44  ;;  %v125_v19 = vld [vmem:[#allocation11 + $0xf0] sm:$0xff]  ;;  %v138_v30 = vld [vmem:[#allocation11 + $0x158] sm:$0xff] }
  0x7b   :  { %4164 = vmatpush1.bf16.msra.mxu1 %v4163_v12  ;;  %341 = vmatprep.mubr.f32.mxu1 %v6951_v0  ;;  %v117_v12 = vld [vmem:[#allocation11 + $0xb0] sm:$0xff]  ;;  %v146_v38 = vld [vmem:[#allocation11 + $0x198] sm:$0xff] }
  0x7c   :  { %4166 = vmatprep.subr.bf16.mxu1 %v4165_v14  ;;  %v122_v14 = vld [vmem:[#allocation11 + $0xd8] sm:$0xff]  ;;  %v129_v27 = vld [vmem:[#allocation11 + $0x110] sm:$0xff] }
  0x7d   :  { %4260 = vmatpush1.bf16.msra.mxu0 %v5947_v52  ;;  %v6047_v17 = vpack.c.bf16 %v126_v16, %v122_v14  ;;  %v133_v28 = vld [vmem:[#allocation11 + $0x130] sm:$0xff]  ;;  %v150_v40 = vld [vmem:[#allocation11 + $0x1b8] sm:$0xff] }
  0x7e   :  { %342 = vmatmul.mubr.f32.gmra.mrb[8].mxu1 %v6000_v21  ;;  %4262 = vmatprep.subr.bf16.mxu0 %v5950_v57  ;;  %v137_v36 = vld [vmem:[#allocation11 + $0x150] sm:$0xff]  ;;  %v154_v47 = vld [vmem:[#allocation11 + $0x1d8] sm:$0xff] }
  0x7f   :  { %4168 = vmatpush1.bf16.msra.mxu1 %v4167_v23  ;;  %347 = vmatprep.mubr.f32.mxu1 %v6951_v0  ;;  %v130_v23 = vld [vmem:[#allocation11 + $0x118] sm:$0xff]  ;;  %v141_v37 = vld [vmem:[#allocation11 + $0x170] sm:$0xff] }
  0x80   :  { %4170 = vmatprep.subr.bf16.mxu1 %v4169_v24  ;;  %v134_v24 = vld [vmem:[#allocation11 + $0x138] sm:$0xff]  ;;  %v149_v46 = vld [vmem:[#allocation11 + $0x1b0] sm:$0xff] }
  0x81   :  { %4264 = vmatpush1.bf16.msra.mxu0 %v5953_v1  ;;  %v6055_v25 = vpack.c.bf16 %v134_v24, %v130_v23  ;;  %v158_v49 = vld [vmem:[#allocation11 + $0x1f8] sm:$0xff]  ;;  %v157_v55 = vld [vmem:[#allocation11 + $0x1f0] sm:$0xff] }
  0x82   :  { %348 = vmatmul.mubr.f32.gmra.mrb[10].mxu1 %v6006_v31  ;;  %4266 = vmatprep.subr.bf16.mxu0 %v5956_v6  ;;  %v6079_v50 = vpack.c.bf16 %v158_v49, %v154_v47 }
  0x83   :  { %4172 = vmatpush1.bf16.msra.mxu1 %v4171_v32  ;;  %353 = vmatprep.mubr.f32.mxu1 %v6951_v0  ;;  %v142_v32 = vld [vmem:[#allocation11 + $0x178] sm:$0xff] }
  0x84   :  { %4174 = vmatprep.subr.bf16.mxu1 %v4173_v33  ;;  %v6063_v33 = vpack.c.bf16 %v142_v32, %v138_v30 }
  0x85   :  { %4268 = vmatpush1.bf16.msra.mxu0 %v5959_v15 }
  0x86   :  { %354 = vmatmul.mubr.f32.gmra.mrb[12].mxu1 %v6012_v42  ;;  %4270 = vmatprep.subr.bf16.mxu0 %v5962_v20 }
  0x87   :  { %4176 = vmatpush1.bf16.msra.mxu1 %v4175_v43  ;;  %359 = vmatprep.mubr.f32.mxu1 %v6951_v0  ;;  %v6071_v43 = vpack.c.bf16 %v150_v40, %v146_v38 }
  0x88   :  { %4178 = vmatprep.subr.bf16.mxu1 %v4177_v45  ;;  %v145_v45 = vld [vmem:[#allocation11 + $0x190] sm:$0xff] }
  0x89   :  { %4272 = vmatpush1.bf16.msra.mxu0 %v5965_v29 }
  0x8a   :  { %360 = vmatmul.mubr.f32.gmra.mrb[14].mxu1 %v6018_v51  ;;  %4274 = vmatprep.subr.bf16.mxu0 %v5968_v34 }
  0x8b   :  { %4180 = vmatpush1.bf16.msra.mxu1 %v4179_v53  ;;  %430 = vmatprep.mubr.f32.mxu1 %v6951_v0  ;;  %v153_v53 = vld [vmem:[#allocation11 + $0x1d0] sm:$0xff] }
  0x8c   :  { %4214 = vmatprep.subr.bf16.mxu1 %v6020_v54  ;;  %v6084_v58 = vpack.c.bf16 %v157_v55, %v153_v53 }
  0x8d   :  { %4276 = vmatpush1.bf16.msra.mxu0 %v5971_v41 }
  0x8e   :  { %431 = vmatmul.mubr.f32.vlgmr.msra.gmra.mrb[16].mxu1 %v5974_v48  ;;  %4310 = vmatprep.subr.bf16.mxu0 %v5927_v9  ;;  %v6044_v48 = vpack.c.bf16 %v117_v12, %v113_v10 }
  0x8f   :  { %4216 = vmatpush1.bf16.msra.mxu1 %v6026_v61  ;;  %436 = vmatprep.mubr.f32.mxu1 %v6951_v0 }
  0x90   :  { %4218 = vmatprep.subr.bf16.mxu1 %v6029_v62 }
  0x92   :  { %437 = vmatmul.mubr.f32.gmra.mrb[18].mxu1 %v5980_v56  ;;  %v6052_v56 = vpack.c.bf16 %v125_v19, %v121_v18 }
  0x93   :  { %4220 = vmatpush1.bf16.msra.mxu1 %v6036_v7  ;;  %442 = vmatprep.mubr.f32.mxu1 %v6951_v0 }
  0x94   :  { %4222 = vmatprep.subr.bf16.mxu1 %v6039_v8 }
  0x96   :  { %443 = vmatmul.mubr.f32.gmra.mrb[20].mxu1 %v5988_v2  ;;  %v6060_v2 = vpack.c.bf16 %v133_v28, %v129_v27 }
  0x97   :  { %4224 = vmatpush1.bf16.msra.mxu1 %v6044_v48  ;;  %448 = vmatprep.mubr.f32.mxu1 %v6951_v0 }
  0x98   :  { %4226 = vmatprep.subr.bf16.mxu1 %v6047_v17 }
  0x9a   :  { %449 = vmatmul.mubr.f32.gmra.mrb[22].mxu1 %v5994_v11  ;;  %v6068_v11 = vpack.c.bf16 %v141_v37, %v137_v36 }
  0x9b   :  { %4228 = vmatpush1.bf16.msra.mxu1 %v6052_v56  ;;  %454 = vmatprep.mubr.f32.mxu1 %v6951_v0 }
  0x9c   :  { %4230 = vmatprep.subr.bf16.mxu1 %v6055_v25 }
  0x9e   :  { %455 = vmatmul.mubr.f32.gmra.mrb[24].mxu1 %v6000_v21  ;;  %v6076_v21 = vpack.c.bf16 %v149_v46, %v145_v45 }
  0x9f   :  { %4232 = vmatpush1.bf16.msra.mxu1 %v6060_v2  ;;  %460 = vmatprep.mubr.f32.mxu1 %v6951_v0 }
  0xa0   :  { %4234 = vmatprep.subr.bf16.mxu1 %v6063_v33 }
  0xa2   :  { %461 = vmatmul.mubr.f32.gmra.mrb[26].mxu1 %v6006_v31  ;;  %v233_v31 = vlaneseq }
  0xa3   :  { %4236 = vmatpush1.bf16.msra.mxu1 %v6068_v11  ;;  %466 = vmatprep.mubr.f32.mxu1 %v6951_v0 }
  0xa4   :  { %4238 = vmatprep.subr.bf16.mxu1 %v6071_v43 }
  0xa6   :  { %467 = vmatmul.mubr.f32.gmra.mrb[28].mxu1 %v6012_v42  ;;  %v6109_v42 = vshrl.u32 %v233_v31, 7 }
  0xa7   :  { %4240 = vmatpush1.bf16.msra.mxu1 %v6076_v21  ;;  %472 = vmatprep.mubr.f32.mxu1 %v6951_v0 }
  0xa8   :  { %4242 = vmatprep.subr.bf16.mxu1 %v6079_v50  ;;  %6956 = vst [vmem:[#allocation19_spill] sm:$0xff] %v6109_v42  ;;  %v6948_v60 = vsub.s32 1, %v6109_v42 }
  0xaa   :  { %473 = vmatmul.mubr.f32.gmra.mrb[30].mxu1 %v6018_v51  ;;  %v6950_v51 = vsub.s32 0, %v6109_v42  ;;  %v240_v3 = vrot.slane %v231_v59, %v6948_v60 }
  0xab   :  { %4244 = vmatpush1.bf16.msra.mxu1 %v6084_v58  ;;  %656 = vmatprep.mubr.f32.mxu1 %v6951_v0 }
  0xac   :  { %4278 = vmatprep.subr.bf16.mxu1 %v6020_v54  ;;  %v236_v63 = vrot.slane %v231_v59, %v6950_v51 }
  0xae   :  { %657 = vmatmul.mubr.f32.vlgmr.msra.gmra.mrb[16].mxu1 %v6951_v0 }
  0xaf   :  { %4280 = vmatpush1.bf16.msra.mxu1 %v6026_v61  ;;  %838 = vmatprep.mubr.f32.mxu1 %v6951_v0 }
  0xb0   :  { %4282 = vmatprep.subr.bf16.mxu1 %v6029_v62 }
  0xb3   :  { %4284 = vmatpush1.bf16.msra.mxu1 %v6036_v7 }
  0xb4   :  { %4286 = vmatprep.subr.bf16.mxu1 %v6039_v8 }
  0xb7   :  { %4288 = vmatpush1.bf16.msra.mxu1 %v6044_v48 }
  0xb8   :  { %4290 = vmatprep.subr.bf16.mxu1 %v6047_v17 }
  0xbb   :  { %4292 = vmatpush1.bf16.msra.mxu1 %v6052_v56 }
  0xbc   :  { %4294 = vmatprep.subr.bf16.mxu1 %v6055_v25 }
  0xbf   :  { %4296 = vmatpush1.bf16.msra.mxu1 %v6060_v2 }
  0xc0   :  { %4298 = vmatprep.subr.bf16.mxu1 %v6063_v33 }
  0xc3   :  { %4300 = vmatpush1.bf16.msra.mxu1 %v6068_v11 }
  0xc4   :  { %4302 = vmatprep.subr.bf16.mxu1 %v6071_v43 }
  0xc7   :  { %4304 = vmatpush1.bf16.msra.mxu1 %v6076_v21 }
  0xc8   :  { %4306 = vmatprep.subr.bf16.mxu1 %v6079_v50 }
  0xcb   :  { %4308 = vmatpush1.bf16.msra.mxu1 %v6084_v58 }
  0xcc   :  { %4342 = vmatprep.subr.bf16.mxu1 %v6020_v54 }
 0x141   :  { %v319_v4 = vpop.f32.mrb[0].mxu1 }
 0x142   :  { %v320_v5 = vadd.f32 %v319_v4, %v236_v63  ;;  %v321_v10 = vpop.f32.mrb[1].mxu1 }
 0x143   :  { %v587_v12 = vpop.f32.mrb[0].mxu0  ;;  %v322_v14 = vadd.f32 %v321_v10, %v240_v3 }
 0x144   :  { %v589_v16 = vpop.f32.mrb[1].mxu0  ;;  %v663_v18 = vadd.f32 %v587_v12, %v320_v5 }
 0x145   :  { %v664_v19 = vadd.f32 %v589_v16, %v322_v14  ;;  %v325_v23 = vpop.f32.mrb[2].mxu1 }
 0x146   :  { %v6120_v24 = vadd.f32 %v325_v23, %v236_v63  ;;  %v327_v27 = vpop.f32.mrb[3].mxu1 }
 0x147   :  { %v6122_v28 = vadd.f32 %v327_v27, %v240_v3 }
 0x149   :  { %v331_v30 = vpop.f32.mrb[4].mxu1 }
 0x14a   :  { %v6124_v32 = vadd.f32 %v331_v30, %v236_v63  ;;  %v333_v36 = vpop.f32.mrb[5].mxu1 }
 0x14b   :  { %v6126_v37 = vadd.f32 %v333_v36, %v240_v3 }
 0x14d   :  { %v337_v38 = vpop.f32.mrb[6].mxu1 }
 0x14e   :  { %v6128_v40 = vadd.f32 %v337_v38, %v236_v63  ;;  %v339_v45 = vpop.f32.mrb[7].mxu1 }
 0x14f   :  { %v6130_v46 = vadd.f32 %v339_v45, %v240_v3  ;;  %v4000_v45 = vmul.f32 -1.442695, %v664_v19 }
 0x151   :  { %v343_v47 = vpop.f32.mrb[8].mxu1  ;;  %5439 = vpow2.f32 %v4000_v45 }
 0x152   :  { %v6132_v49 = vadd.f32 %v343_v47, %v236_v63  ;;  %v345_v53 = vpop.f32.mrb[9].mxu1  ;;  %v3999_v47 = vmul.f32 -1.442695, %v663_v18 }
 0x153   :  { %v6134_v55 = vadd.f32 %v345_v53, %v240_v3  ;;  %v6949_v53 = vsub.s32 2, %v6109_v42 }
 0x154   :  { %5441 = vpow2.f32 %v3999_v47 }
 0x155   :  { %v349_v31 = vpop.f32.mrb[10].mxu1 }
 0x156   :  { %v6136_v4 = vadd.f32 %v349_v31, %v236_v63  ;;  %v351_v5 = vpop.f32.mrb[11].mxu1 }
 0x157   :  { %v6138_v10 = vadd.f32 %v351_v5, %v240_v3  ;;  %v6955_v5 = vsub.s32 3, %v6109_v42 }
 0x159   :  { %v355_v12 = vpop.f32.mrb[12].mxu1 }
 0x15a   :  { %v6140_v14 = vadd.f32 %v355_v12, %v236_v63  ;;  %v357_v16 = vpop.f32.mrb[13].mxu1 }
 0x15b   :  { %v6142_v23 = vadd.f32 %v357_v16, %v240_v3  ;;  %v5440_v31 = vpop.eup %5439  ;;  %v6152_v16 = vrot.slane %v231_v59, %v6949_v53 }
 0x15c   :  { %v676_v60 = vadd.f32 1.0, %v5440_v31 }
 0x15d   :  { %v361_v27 = vpop.f32.mrb[14].mxu1 }
 0x15e   :  { %v6144_v30 = vadd.f32 %v361_v27, %v236_v63  ;;  %v363_v36 = vpop.f32.mrb[15].mxu1  ;;  %v5442_v12 = vpop.eup %5441  ;;  %5443 = vrcp.f32 %v676_v60 }
 0x15f   :  { %v6146_v38 = vadd.f32 %v363_v36, %v240_v3  ;;  %v670_v63 = vadd.f32 1.0, %v5442_v12  ;;  %v6156_v3 = vrot.slane %v231_v59, %v6955_v5 }
 0x160   :  { %6957 = vst [vmem:[#allocation20_spill] sm:$0xff] %v6144_v30 }
 0x161   :  { %6958 = vst [vmem:[#allocation21_spill] sm:$0xff] %v6146_v38  ;;  %5445 = vrcp.f32 %v670_v63 }
 0x168   :  { %v5444_v47 = vpop.eup %5443 }
 0x169   :  { %v687_v51 = vmul.f32 0.0, %v5444_v47 }
 0x16b   :  { %v5446_v31 = vpop.eup %5445 }
 0x181   :  { %v658_v19 = vpop.f32.mrb[16].mxu1 }
 0x182   :  { %v5333_v18 = vadd.f32 %v658_v19, %v6152_v16  ;;  %v660_v27 = vpop.f32.mrb[17].mxu1 }
 0x183   :  { %v5334_v36 = vadd.f32 %v660_v27, %v6156_v3 }
 0x184   :  { %5447 = vtanh.f32 %v5333_v18 }
 0x185   :  { %v4001_v45 = vmul.f32 -1.442695, %v5334_v36 }
 0x187   :  { %5449 = vpow2.f32 %v4001_v45 }
 0x18e   :  { %v5448_v53 = vpop.eup %5447 }
 0x18f   :  { %v688_v12 = vmul.f32 %v5448_v53, %v5446_v31 }
 0x191   :  { %v5450_v0 = vpop.eup %5449  ;;  %v6160_v42 = vadd.f32 %v688_v12, %v687_v51 }
 0x192   :  { %v683_v59 = vadd.f32 1.0, %v5450_v0  ;;  %v6959_v0 = vmov 0.0  }
 0x193   :  { %5451 = vtanh.f32 %v6160_v42 }
 0x194   :  { %5453 = vrcp.f32 %v683_v59 }
 0x19d   :  { %v5452_v60 = vpop.eup %5451 }
 0x19e   :  { %v5454_v19 = vpop.eup %5453 }
 0x19f   :  { %v6163_v63 = vmul.f32 %v5454_v19, %v5452_v60 }
 0x1a1   :  { %768 = vmatmul.mubr.f32.vlgmr.msra.gmra.mrb[2].mxu0 %v6163_v63  ;;  %839 = vmatmul.mubr.f32.vlgmr.msra.gmra.mrb[18].mxu1 %v6163_v63 }
 0x1a2   :  { %4312 = vmatpush1.bf16.msra.mxu0 %v5929_v13  ;;  %4344 = vmatpush1.bf16.msra.mxu1 %v6026_v61 }
 0x1a3   :  { %4314 = vmatprep.subr.bf16.mxu0 %v5933_v22  ;;  %4346 = vmatprep.subr.bf16.mxu1 %v6029_v62 }
 0x1a4   :  { %950 = vmatprep.mubr.f32.mxu0 %v6959_v0  ;;  %1021 = vmatprep.mubr.f32.mxu1 %v6959_v0 }
 0x1a6   :  { %4316 = vmatpush1.bf16.msra.mxu0 %v5935_v26  ;;  %4348 = vmatpush1.bf16.msra.mxu1 %v6036_v7 }
 0x1a7   :  { %4318 = vmatprep.subr.bf16.mxu0 %v5938_v35  ;;  %4350 = vmatprep.subr.bf16.mxu1 %v6039_v8 }
 0x1aa   :  { %4320 = vmatpush1.bf16.msra.mxu0 %v5941_v39  ;;  %4352 = vmatpush1.bf16.msra.mxu1 %v6044_v48 }
 0x1ab   :  { %4322 = vmatprep.subr.bf16.mxu0 %v5944_v44  ;;  %4354 = vmatprep.subr.bf16.mxu1 %v6047_v17 }
 0x1ae   :  { %4324 = vmatpush1.bf16.msra.mxu0 %v5947_v52  ;;  %4356 = vmatpush1.bf16.msra.mxu1 %v6052_v56 }
 0x1af   :  { %4326 = vmatprep.subr.bf16.mxu0 %v5950_v57  ;;  %4358 = vmatprep.subr.bf16.mxu1 %v6055_v25 }
 0x1b2   :  { %4328 = vmatpush1.bf16.msra.mxu0 %v5953_v1  ;;  %4360 = vmatpush1.bf16.msra.mxu1 %v6060_v2 }
 0x1b3   :  { %4330 = vmatprep.subr.bf16.mxu0 %v5956_v6  ;;  %4362 = vmatprep.subr.bf16.mxu1 %v6063_v33 }
 0x1b6   :  { %4332 = vmatpush1.bf16.msra.mxu0 %v5959_v15  ;;  %4364 = vmatpush1.bf16.msra.mxu1 %v6068_v11 }
 0x1b7   :  { %4334 = vmatprep.subr.bf16.mxu0 %v5962_v20  ;;  %4366 = vmatprep.subr.bf16.mxu1 %v6071_v43 }
 0x1ba   :  { %4336 = vmatpush1.bf16.msra.mxu0 %v5965_v29  ;;  %4368 = vmatpush1.bf16.msra.mxu1 %v6076_v21 }
 0x1bb   :  { %4338 = vmatprep.subr.bf16.mxu0 %v5968_v34  ;;  %4370 = vmatprep.subr.bf16.mxu1 %v6079_v50 }
 0x1be   :  { %4340 = vmatpush1.bf16.msra.mxu0 %v5971_v41  ;;  %4372 = vmatpush1.bf16.msra.mxu1 %v6084_v58 }
 0x1bf   :  { %4374 = vmatprep.subr.bf16.mxu0 %v5927_v9  ;;  %4406 = vmatprep.subr.bf16.mxu1 %v6020_v54 }
 0x274   :  { %v769_v51 = vpop.f32.mrb[2].mxu0  ;;  %v840_v53 = vpop.f32.mrb[18].mxu1 }
 0x275   :  { %v845_v18 = vadd.f32 %v769_v51, %v6120_v24  ;;  %v771_v27 = vpop.f32.mrb[3].mxu0  ;;  %v842_v36 = vpop.f32.mrb[19].mxu1  ;;  %v5335_v60 = vadd.f32 %v840_v53, %v6152_v16 }
 0x276   :  { %v846_v45 = vadd.f32 %v771_v27, %v6122_v28  ;;  %v5336_v12 = vadd.f32 %v842_v36, %v6156_v3 }
 0x277   :  { %v4002_v47 = vmul.f32 -1.442695, %v845_v18 }
 0x278   :  { %v4003_v31 = vmul.f32 -1.442695, %v846_v45  ;;  %v4004_v59 = vmul.f32 -1.442695, %v5336_v12 }
 0x279   :  { %5455 = vpow2.f32 %v4002_v47 }
 0x27a   :  { %5457 = vpow2.f32 %v4003_v31 }
 0x27b   :  { %5459 = vpow2.f32 %v4004_v59 }
 0x27c   :  { %5461 = vtanh.f32 %v5335_v60 }
 0x283   :  { %v5456_v19 = vpop.eup %5455 }
 0x284   :  { %v5458_v5 = vpop.eup %5457  ;;  %v852_v38 = vadd.f32 1.0, %v5456_v19 }
 0x285   :  { %v858_v30 = vadd.f32 1.0, %v5458_v5  ;;  %v5460_v24 = vpop.eup %5459 }
 0x286   :  { %5463 = vrcp.f32 %v852_v38  ;;  %v5462_v51 = vpop.eup %5461  ;;  %v865_v45 = vadd.f32 1.0, %v5460_v24 }
 0x287   :  { %5465 = vrcp.f32 %v858_v30 }
 0x288   :  { %5467 = vrcp.f32 %v865_v45 }
 0x290   :  { %v5464_v28 = vpop.eup %5463 }
 0x291   :  { %v5466_v18 = vpop.eup %5465  ;;  %v870_v27 = vmul.f32 %v5464_v28, %v5462_v51 }
 0x292   :  { %v869_v47 = vmul.f32 %v5466_v18, %v6160_v42  ;;  %v5468_v53 = vpop.eup %5467 }
 0x294   :  { %v6206_v36 = vadd.f32 %v870_v27, %v869_v47 }
 0x296   :  { %5469 = vtanh.f32 %v6206_v36 }
 0x2a0   :  { %v5470_v31 = vpop.eup %5469 }
 0x2a1   :  { %v6209_v12 = vmul.f32 %v5470_v31, %v5468_v53 }
 0x2a3   :  { %951 = vmatmul.mubr.f32.vlgmr.msra.gmra.mrb[4].mxu0 %v6209_v12  ;;  %1022 = vmatmul.mubr.f32.vlgmr.msra.gmra.mrb[20].mxu1 %v6209_v12 }
 0x2a4   :  { %4376 = vmatpush1.bf16.msra.mxu0 %v5929_v13  ;;  %4408 = vmatpush1.bf16.msra.mxu1 %v6026_v61 }
 0x2a5   :  { %4378 = vmatprep.subr.bf16.mxu0 %v5933_v22  ;;  %4410 = vmatprep.subr.bf16.mxu1 %v6029_v62 }
 0x2a6   :  { %1133 = vmatprep.mubr.f32.mxu0 %v6959_v0  ;;  %1204 = vmatprep.mubr.f32.mxu1 %v6959_v0 }
 0x2a8   :  { %4380 = vmatpush1.bf16.msra.mxu0 %v5935_v26  ;;  %4412 = vmatpush1.bf16.msra.mxu1 %v6036_v7 }
 0x2a9   :  { %4382 = vmatprep.subr.bf16.mxu0 %v5938_v35  ;;  %4414 = vmatprep.subr.bf16.mxu1 %v6039_v8 }
 0x2ac   :  { %4384 = vmatpush1.bf16.msra.mxu0 %v5941_v39  ;;  %4416 = vmatpush1.bf16.msra.mxu1 %v6044_v48 }
 0x2ad   :  { %4386 = vmatprep.subr.bf16.mxu0 %v5944_v44  ;;  %4418 = vmatprep.subr.bf16.mxu1 %v6047_v17 }
 0x2b0   :  { %4388 = vmatpush1.bf16.msra.mxu0 %v5947_v52  ;;  %4420 = vmatpush1.bf16.msra.mxu1 %v6052_v56 }
 0x2b1   :  { %4390 = vmatprep.subr.bf16.mxu0 %v5950_v57  ;;  %4422 = vmatprep.subr.bf16.mxu1 %v6055_v25 }
 0x2b4   :  { %4392 = vmatpush1.bf16.msra.mxu0 %v5953_v1  ;;  %4424 = vmatpush1.bf16.msra.mxu1 %v6060_v2 }
 0x2b5   :  { %4394 = vmatprep.subr.bf16.mxu0 %v5956_v6  ;;  %4426 = vmatprep.subr.bf16.mxu1 %v6063_v33 }
 0x2b8   :  { %4396 = vmatpush1.bf16.msra.mxu0 %v5959_v15  ;;  %4428 = vmatpush1.bf16.msra.mxu1 %v6068_v11 }
 0x2b9   :  { %4398 = vmatprep.subr.bf16.mxu0 %v5962_v20  ;;  %4430 = vmatprep.subr.bf16.mxu1 %v6071_v43 }
 0x2bc   :  { %4400 = vmatpush1.bf16.msra.mxu0 %v5965_v29  ;;  %4432 = vmatpush1.bf16.msra.mxu1 %v6076_v21 }
 0x2bd   :  { %4402 = vmatprep.subr.bf16.mxu0 %v5968_v34  ;;  %4434 = vmatprep.subr.bf16.mxu1 %v6079_v50 }
 0x2c0   :  { %4404 = vmatpush1.bf16.msra.mxu0 %v5971_v41  ;;  %4436 = vmatpush1.bf16.msra.mxu1 %v6084_v58 }
 0x2c1   :  { %4438 = vmatprep.subr.bf16.mxu0 %v5927_v9  ;;  %4470 = vmatprep.subr.bf16.mxu1 %v6020_v54 }
 0x376   :  { %v952_v42 = vpop.f32.mrb[4].mxu0  ;;  %v1023_v30 = vpop.f32.mrb[20].mxu1 }
 0x377   :  { %v1028_v38 = vadd.f32 %v952_v42, %v6124_v32  ;;  %v954_v5 = vpop.f32.mrb[5].mxu0  ;;  %v1025_v59 = vpop.f32.mrb[21].mxu1  ;;  %v5337_v18 = vadd.f32 %v1023_v30, %v6152_v16 }
 0x378   :  { %v1029_v60 = vadd.f32 %v954_v5, %v6126_v37  ;;  %v5338_v51 = vadd.f32 %v1025_v59, %v6156_v3 }
 0x379   :  { %v4005_v19 = vmul.f32 -1.442695, %v1028_v38 }
 0x37a   :  { %v4006_v24 = vmul.f32 -1.442695, %v1029_v60  ;;  %v4007_v28 = vmul.f32 -1.442695, %v5338_v51 }
 0x37b   :  { %5471 = vpow2.f32 %v4005_v19 }
 0x37c   :  { %5473 = vpow2.f32 %v4006_v24 }
 0x37d   :  { %5475 = vpow2.f32 %v4007_v28 }
 0x37e   :  { %5477 = vtanh.f32 %v5337_v18 }
 0x385   :  { %v5472_v27 = vpop.eup %5471 }
 0x386   :  { %v5474_v45 = vpop.eup %5473  ;;  %v1035_v47 = vadd.f32 1.0, %v5472_v27 }
 0x387   :  { %v1041_v53 = vadd.f32 1.0, %v5474_v45  ;;  %v5476_v32 = vpop.eup %5475 }
 0x388   :  { %5479 = vrcp.f32 %v1035_v47  ;;  %v5478_v31 = vpop.eup %5477  ;;  %v1048_v5 = vadd.f32 1.0, %v5476_v32 }
 0x389   :  { %5481 = vrcp.f32 %v1041_v53 }
 0x38a   :  { %5483 = vrcp.f32 %v1048_v5 }
 0x392   :  { %v5480_v37 = vpop.eup %5479 }
 0x393   :  { %v5482_v42 = vpop.eup %5481  ;;  %v1053_v38 = vmul.f32 %v5480_v37, %v5478_v31 }
 0x394   :  { %v1052_v60 = vmul.f32 %v5482_v42, %v6206_v36  ;;  %v5484_v30 = vpop.eup %5483 }
 0x396   :  { %v6252_v59 = vadd.f32 %v1053_v38, %v1052_v60 }
 0x398   :  { %5485 = vtanh.f32 %v6252_v59 }
 0x3a2   :  { %v5486_v19 = vpop.eup %5485 }
 0x3a3   :  { %v6255_v24 = vmul.f32 %v5486_v19, %v5484_v30 }
 0x3a5   :  { %1134 = vmatmul.mubr.f32.vlgmr.msra.gmra.mrb[6].mxu0 %v6255_v24  ;;  %1205 = vmatmul.mubr.f32.vlgmr.msra.gmra.mrb[22].mxu1 %v6255_v24 }
 0x3a6   :  { %4440 = vmatpush1.bf16.msra.mxu0 %v5929_v13  ;;  %4472 = vmatpush1.bf16.msra.mxu1 %v6026_v61 }
 0x3a7   :  { %4442 = vmatprep.subr.bf16.mxu0 %v5933_v22  ;;  %4474 = vmatprep.subr.bf16.mxu1 %v6029_v62 }
 0x3a8   :  { %1316 = vmatprep.mubr.f32.mxu0 %v6959_v0  ;;  %1387 = vmatprep.mubr.f32.mxu1 %v6959_v0 }
 0x3aa   :  { %4444 = vmatpush1.bf16.msra.mxu0 %v5935_v26  ;;  %4476 = vmatpush1.bf16.msra.mxu1 %v6036_v7 }
 0x3ab   :  { %4446 = vmatprep.subr.bf16.mxu0 %v5938_v35  ;;  %4478 = vmatprep.subr.bf16.mxu1 %v6039_v8 }
 0x3ae   :  { %4448 = vmatpush1.bf16.msra.mxu0 %v5941_v39  ;;  %4480 = vmatpush1.bf16.msra.mxu1 %v6044_v48 }
 0x3af   :  { %4450 = vmatprep.subr.bf16.mxu0 %v5944_v44  ;;  %4482 = vmatprep.subr.bf16.mxu1 %v6047_v17 }
 0x3b2   :  { %4452 = vmatpush1.bf16.msra.mxu0 %v5947_v52  ;;  %4484 = vmatpush1.bf16.msra.mxu1 %v6052_v56 }
 0x3b3   :  { %4454 = vmatprep.subr.bf16.mxu0 %v5950_v57  ;;  %4486 = vmatprep.subr.bf16.mxu1 %v6055_v25 }
 0x3b6   :  { %4456 = vmatpush1.bf16.msra.mxu0 %v5953_v1  ;;  %4488 = vmatpush1.bf16.msra.mxu1 %v6060_v2 }
 0x3b7   :  { %4458 = vmatprep.subr.bf16.mxu0 %v5956_v6  ;;  %4490 = vmatprep.subr.bf16.mxu1 %v6063_v33 }
 0x3ba   :  { %4460 = vmatpush1.bf16.msra.mxu0 %v5959_v15  ;;  %4492 = vmatpush1.bf16.msra.mxu1 %v6068_v11 }
 0x3bb   :  { %4462 = vmatprep.subr.bf16.mxu0 %v5962_v20  ;;  %4494 = vmatprep.subr.bf16.mxu1 %v6071_v43 }
 0x3be   :  { %4464 = vmatpush1.bf16.msra.mxu0 %v5965_v29  ;;  %4496 = vmatpush1.bf16.msra.mxu1 %v6076_v21 }
 0x3bf   :  { %4466 = vmatprep.subr.bf16.mxu0 %v5968_v34  ;;  %4498 = vmatprep.subr.bf16.mxu1 %v6079_v50 }
 0x3c2   :  { %4468 = vmatpush1.bf16.msra.mxu0 %v5971_v41  ;;  %4500 = vmatpush1.bf16.msra.mxu1 %v6084_v58 }
 0x3c3   :  { %4502 = vmatprep.subr.bf16.mxu0 %v5927_v9  ;;  %4534 = vmatprep.subr.bf16.mxu1 %v6020_v54 }
 0x478   :  { %v1135_v36 = vpop.f32.mrb[6].mxu0  ;;  %v1206_v51 = vpop.f32.mrb[22].mxu1 }
 0x479   :  { %v1211_v28 = vadd.f32 %v1135_v36, %v6128_v40  ;;  %v1137_v18 = vpop.f32.mrb[7].mxu0  ;;  %v1208_v27 = vpop.f32.mrb[23].mxu1  ;;  %v5339_v37 = vadd.f32 %v1206_v51, %v6152_v16 }
 0x47a   :  { %v1212_v45 = vadd.f32 %v1137_v18, %v6130_v46  ;;  %v5340_v32 = vadd.f32 %v1208_v27, %v6156_v3 }
 0x47b   :  { %v4008_v47 = vmul.f32 -1.442695, %v1211_v28 }
 0x47c   :  { %v4009_v53 = vmul.f32 -1.442695, %v1212_v45  ;;  %v4010_v31 = vmul.f32 -1.442695, %v5340_v32 }
 0x47d   :  { %5487 = vpow2.f32 %v4008_v47 }
 0x47e   :  { %5489 = vpow2.f32 %v4009_v53 }
 0x47f   :  { %5491 = vpow2.f32 %v4010_v31 }
 0x480   :  { %5493 = vtanh.f32 %v5339_v37 }
 0x487   :  { %v5488_v42 = vpop.eup %5487 }
 0x488   :  { %v5490_v38 = vpop.eup %5489  ;;  %v1218_v5 = vadd.f32 1.0, %v5488_v42 }
 0x489   :  { %v1224_v60 = vadd.f32 1.0, %v5490_v38  ;;  %v5492_v40 = vpop.eup %5491 }
 0x48a   :  { %5495 = vrcp.f32 %v1218_v5  ;;  %v5494_v30 = vpop.eup %5493  ;;  %v1231_v28 = vadd.f32 1.0, %v5492_v40 }
 0x48b   :  { %5497 = vrcp.f32 %v1224_v60 }
 0x48c   :  { %5499 = vrcp.f32 %v1231_v28 }
 0x494   :  { %v5496_v46 = vpop.eup %5495 }
 0x495   :  { %v5498_v19 = vpop.eup %5497  ;;  %v1236_v36 = vmul.f32 %v5496_v46, %v5494_v30 }
 0x496   :  { %v1235_v18 = vmul.f32 %v5498_v19, %v6252_v59  ;;  %v5500_v51 = vpop.eup %5499 }
 0x498   :  { %v6298_v27 = vadd.f32 %v1236_v36, %v1235_v18 }
 0x49a   :  { %5501 = vtanh.f32 %v6298_v27 }
 0x4a4   :  { %v5502_v45 = vpop.eup %5501 }
 0x4a5   :  { %v6301_v47 = vmul.f32 %v5502_v45, %v5500_v51 }
 0x4a7   :  { %1317 = vmatmul.mubr.f32.vlgmr.msra.gmra.mrb[8].mxu0 %v6301_v47  ;;  %1388 = vmatmul.mubr.f32.vlgmr.msra.gmra.mrb[24].mxu1 %v6301_v47 }
 0x4a8   :  { %4504 = vmatpush1.bf16.msra.mxu0 %v5929_v13  ;;  %4536 = vmatpush1.bf16.msra.mxu1 %v6026_v61 }
 0x4a9   :  { %4506 = vmatprep.subr.bf16.mxu0 %v5933_v22  ;;  %4538 = vmatprep.subr.bf16.mxu1 %v6029_v62 }
 0x4aa   :  { %1499 = vmatprep.mubr.f32.mxu0 %v6959_v0  ;;  %1570 = vmatprep.mubr.f32.mxu1 %v6959_v0 }
 0x4ac   :  { %4508 = vmatpush1.bf16.msra.mxu0 %v5935_v26  ;;  %4540 = vmatpush1.bf16.msra.mxu1 %v6036_v7 }
 0x4ad   :  { %4510 = vmatprep.subr.bf16.mxu0 %v5938_v35  ;;  %4542 = vmatprep.subr.bf16.mxu1 %v6039_v8 }
 0x4b0   :  { %4512 = vmatpush1.bf16.msra.mxu0 %v5941_v39  ;;  %4544 = vmatpush1.bf16.msra.mxu1 %v6044_v48 }
 0x4b1   :  { %4514 = vmatprep.subr.bf16.mxu0 %v5944_v44  ;;  %4546 = vmatprep.subr.bf16.mxu1 %v6047_v17 }
 0x4b4   :  { %4516 = vmatpush1.bf16.msra.mxu0 %v5947_v52  ;;  %4548 = vmatpush1.bf16.msra.mxu1 %v6052_v56 }
 0x4b5   :  { %4518 = vmatprep.subr.bf16.mxu0 %v5950_v57  ;;  %4550 = vmatprep.subr.bf16.mxu1 %v6055_v25 }
 0x4b8   :  { %4520 = vmatpush1.bf16.msra.mxu0 %v5953_v1  ;;  %4552 = vmatpush1.bf16.msra.mxu1 %v6060_v2 }
 0x4b9   :  { %4522 = vmatprep.subr.bf16.mxu0 %v5956_v6  ;;  %4554 = vmatprep.subr.bf16.mxu1 %v6063_v33 }
 0x4bc   :  { %4524 = vmatpush1.bf16.msra.mxu0 %v5959_v15  ;;  %4556 = vmatpush1.bf16.msra.mxu1 %v6068_v11 }
 0x4bd   :  { %4526 = vmatprep.subr.bf16.mxu0 %v5962_v20  ;;  %4558 = vmatprep.subr.bf16.mxu1 %v6071_v43 }
 0x4c0   :  { %4528 = vmatpush1.bf16.msra.mxu0 %v5965_v29  ;;  %4560 = vmatpush1.bf16.msra.mxu1 %v6076_v21 }
 0x4c1   :  { %4530 = vmatprep.subr.bf16.mxu0 %v5968_v34  ;;  %4562 = vmatprep.subr.bf16.mxu1 %v6079_v50 }
 0x4c4   :  { %4532 = vmatpush1.bf16.msra.mxu0 %v5971_v41  ;;  %4564 = vmatpush1.bf16.msra.mxu1 %v6084_v58 }
 0x4c5   :  { %4566 = vmatprep.subr.bf16.mxu0 %v5927_v9  ;;  %4598 = vmatprep.subr.bf16.mxu1 %v6020_v54 }
 0x57a   :  { %v1318_v59 = vpop.f32.mrb[8].mxu0  ;;  %v1389_v53 = vpop.f32.mrb[24].mxu1 }
 0x57b   :  { %v1394_v32 = vadd.f32 %v1318_v59, %v6132_v49  ;;  %v1320_v31 = vpop.f32.mrb[9].mxu0  ;;  %v1391_v37 = vpop.f32.mrb[25].mxu1  ;;  %v5341_v30 = vadd.f32 %v1389_v53, %v6152_v16 }
 0x57c   :  { %v1395_v42 = vadd.f32 %v1320_v31, %v6134_v55  ;;  %v5342_v60 = vadd.f32 %v1391_v37, %v6156_v3 }
 0x57d   :  { %v4011_v38 = vmul.f32 -1.442695, %v1394_v32 }
 0x57e   :  { %v4012_v5 = vmul.f32 -1.442695, %v1395_v42  ;;  %v4013_v40 = vmul.f32 -1.442695, %v5342_v60 }
 0x57f   :  { %5503 = vpow2.f32 %v4011_v38 }
 0x580   :  { %5505 = vpow2.f32 %v4012_v5 }
 0x581   :  { %5507 = vpow2.f32 %v4013_v40 }
 0x582   :  { %5509 = vtanh.f32 %v5341_v30 }
 0x589   :  { %v5504_v46 = vpop.eup %5503 }
 0x58a   :  { %v5506_v19 = vpop.eup %5505  ;;  %v1401_v36 = vadd.f32 1.0, %v5504_v46 }
 0x58b   :  { %v1407_v28 = vadd.f32 1.0, %v5506_v19  ;;  %v5508_v49 = vpop.eup %5507 }
 0x58c   :  { %5511 = vrcp.f32 %v1401_v36  ;;  %v5510_v18 = vpop.eup %5509  ;;  %v1414_v59 = vadd.f32 1.0, %v5508_v49 }
 0x58d   :  { %5513 = vrcp.f32 %v1407_v28 }
 0x58e   :  { %5515 = vrcp.f32 %v1414_v59 }
 0x596   :  { %v5512_v55 = vpop.eup %5511 }
 0x597   :  { %v5514_v51 = vpop.eup %5513  ;;  %v1419_v45 = vmul.f32 %v5512_v55, %v5510_v18 }
 0x598   :  { %v1418_v32 = vmul.f32 %v5514_v51, %v6298_v27  ;;  %v5516_v53 = vpop.eup %5515 }
 0x59a   :  { %v6344_v31 = vadd.f32 %v1419_v45, %v1418_v32 }
 0x59c   :  { %5517 = vtanh.f32 %v6344_v31 }
 0x5a6   :  { %v5518_v37 = vpop.eup %5517 }
 0x5a7   :  { %v6347_v42 = vmul.f32 %v5518_v37, %v5516_v53 }
 0x5a9   :  { %1500 = vmatmul.mubr.f32.vlgmr.msra.gmra.mrb[10].mxu0 %v6347_v42  ;;  %1571 = vmatmul.mubr.f32.vlgmr.msra.gmra.mrb[26].mxu1 %v6347_v42 }
 0x5aa   :  { %4568 = vmatpush1.bf16.msra.mxu0 %v5929_v13  ;;  %4600 = vmatpush1.bf16.msra.mxu1 %v6026_v61 }
 0x5ab   :  { %4570 = vmatprep.subr.bf16.mxu0 %v5933_v22  ;;  %4602 = vmatprep.subr.bf16.mxu1 %v6029_v62 }
 0x5ac   :  { %1682 = vmatprep.mubr.f32.mxu0 %v6959_v0  ;;  %1753 = vmatprep.mubr.f32.mxu1 %v6959_v0 }
 0x5ae   :  { %4572 = vmatpush1.bf16.msra.mxu0 %v5935_v26  ;;  %4604 = vmatpush1.bf16.msra.mxu1 %v6036_v7 }
 0x5af   :  { %4574 = vmatprep.subr.bf16.mxu0 %v5938_v35  ;;  %4606 = vmatprep.subr.bf16.mxu1 %v6039_v8 }
 0x5b2   :  { %4576 = vmatpush1.bf16.msra.mxu0 %v5941_v39  ;;  %4608 = vmatpush1.bf16.msra.mxu1 %v6044_v48 }
 0x5b3   :  { %4578 = vmatprep.subr.bf16.mxu0 %v5944_v44  ;;  %4610 = vmatprep.subr.bf16.mxu1 %v6047_v17 }
 0x5b6   :  { %4580 = vmatpush1.bf16.msra.mxu0 %v5947_v52  ;;  %4612 = vmatpush1.bf16.msra.mxu1 %v6052_v56 }
 0x5b7   :  { %4582 = vmatprep.subr.bf16.mxu0 %v5950_v57  ;;  %4614 = vmatprep.subr.bf16.mxu1 %v6055_v25 }
 0x5ba   :  { %4584 = vmatpush1.bf16.msra.mxu0 %v5953_v1  ;;  %4616 = vmatpush1.bf16.msra.mxu1 %v6060_v2 }
 0x5bb   :  { %4586 = vmatprep.subr.bf16.mxu0 %v5956_v6  ;;  %4618 = vmatprep.subr.bf16.mxu1 %v6063_v33 }
 0x5be   :  { %4588 = vmatpush1.bf16.msra.mxu0 %v5959_v15  ;;  %4620 = vmatpush1.bf16.msra.mxu1 %v6068_v11 }
 0x5bf   :  { %4590 = vmatprep.subr.bf16.mxu0 %v5962_v20  ;;  %4622 = vmatprep.subr.bf16.mxu1 %v6071_v43 }
 0x5c2   :  { %4592 = vmatpush1.bf16.msra.mxu0 %v5965_v29  ;;  %4624 = vmatpush1.bf16.msra.mxu1 %v6076_v21 }
 0x5c3   :  { %4594 = vmatprep.subr.bf16.mxu0 %v5968_v34  ;;  %4626 = vmatprep.subr.bf16.mxu1 %v6079_v50 }
 0x5c6   :  { %4596 = vmatpush1.bf16.msra.mxu0 %v5971_v41  ;;  %4628 = vmatpush1.bf16.msra.mxu1 %v6084_v58 }
 0x5c7   :  { %4630 = vmatprep.subr.bf16.mxu0 %v5927_v9  ;;  %4662 = vmatprep.subr.bf16.mxu1 %v6020_v54 }
 0x67c   :  { %v1501_v27 = vpop.f32.mrb[10].mxu0  ;;  %v1572_v38 = vpop.f32.mrb[26].mxu1 }
 0x67d   :  { %v1577_v5 = vadd.f32 %v1501_v27, %v6136_v4  ;;  %v1503_v60 = vpop.f32.mrb[11].mxu0  ;;  %v1574_v40 = vpop.f32.mrb[27].mxu1  ;;  %v5343_v49 = vadd.f32 %v1572_v38, %v6152_v16 }
 0x67e   :  { %v1578_v30 = vadd.f32 %v1503_v60, %v6138_v10  ;;  %v5344_v36 = vadd.f32 %v1574_v40, %v6156_v3  ;;  %v2059_v60 = vld [vmem:[#allocation9 + $0x248] sm:$0xff] }
 0x67f   :  { %v4014_v46 = vmul.f32 -1.442695, %v1577_v5  ;;  %v2063_v40 = vld [vmem:[#allocation9 + $0x268] sm:$0xff] }
 0x680   :  { %v4015_v19 = vmul.f32 -1.442695, %v1578_v30  ;;  %v4016_v28 = vmul.f32 -1.442695, %v5344_v36  ;;  %v2061_v30 = vld [vmem:[#allocation9 + $0x258] sm:$0xff] }
 0x681   :  { %5519 = vpow2.f32 %v4014_v46  ;;  %v2065_v46 = vld [vmem:[#allocation9 + $0x278] sm:$0xff] }
 0x682   :  { %5521 = vpow2.f32 %v4015_v19 }
 0x683   :  { %5523 = vpow2.f32 %v4016_v28 }
 0x684   :  { %5525 = vtanh.f32 %v5343_v49 }
 0x68b   :  { %v5520_v9 = vpop.eup %5519 }
 0x68c   :  { %v5522_v18 = vpop.eup %5521  ;;  %v1584_v54 = vadd.f32 1.0, %v5520_v9  ;;  %v2058_v9 = vld [vmem:[#allocation9 + $0x240] sm:$0xff] }
 0x68d   :  { %v1590_v55 = vadd.f32 1.0, %v5522_v18  ;;  %v5524_v4 = vpop.eup %5523  ;;  %v2062_v18 = vld [vmem:[#allocation9 + $0x260] sm:$0xff] }
 0x68e   :  { %5527 = vrcp.f32 %v1584_v54  ;;  %v5526_v51 = vpop.eup %5525  ;;  %v1597_v32 = vadd.f32 1.0, %v5524_v4  ;;  %v4729_v4 = vpack.c.bf16 %v2065_v46, %v2061_v30  ;;  %v2090_v46 = vld [vmem:[#allocation9 + $0x340] sm:$0xff] }
 0x68f   :  { %5529 = vrcp.f32 %v1590_v55  ;;  %v4697_v55 = vpack.c.bf16 %v2063_v40, %v2059_v60  ;;  %v2097_v60 = vld [vmem:[#allocation9 + $0x378] sm:$0xff] }
 0x690   :  { %5531 = vrcp.f32 %v1597_v32  ;;  %v2069_v32 = vld [vmem:[#allocation9 + $0x298] sm:$0xff] }
 0x698   :  { %v5528_v10 = vpop.eup %5527 }
 0x699   :  { %v5530_v45 = vpop.eup %5529  ;;  %v1602_v59 = vmul.f32 %v5528_v10, %v5526_v51  ;;  %v2060_v51 = vld [vmem:[#allocation9 + $0x250] sm:$0xff] }
 0x69a   :  { %v1601_v53 = vmul.f32 %v5530_v45, %v6344_v31  ;;  %v5532_v27 = vpop.eup %5531  ;;  %v2056_v31 = vld [vmem:[#allocation9 + $0x230] sm:$0xff]  ;;  %v2067_v45 = vld [vmem:[#allocation9 + $0x288] sm:$0xff] }
 0x69b   :  { %v2064_v10 = vld [vmem:[#allocation9 + $0x270] sm:$0xff] }
 0x69c   :  { %v6390_v37 = vadd.f32 %v1602_v59, %v1601_v53  ;;  %v2071_v59 = vld [vmem:[#allocation9 + $0x2a8] sm:$0xff]  ;;  %v2073_v53 = vld [vmem:[#allocation9 + $0x2b8] sm:$0xff] }
 0x69e   :  { %5533 = vtanh.f32 %v6390_v37 }
 0x6a8   :  { %v5534_v38 = vpop.eup %5533 }
 0x6a9   :  { %v6393_v5 = vmul.f32 %v5534_v38, %v5532_v27  ;;  %v4731_v27 = vpack.c.bf16 %v2064_v10, %v2060_v51  ;;  %v2066_v38 = vld [vmem:[#allocation9 + $0x280] sm:$0xff]  ;;  %v2105_v51 = vld [vmem:[#allocation9 + $0x3b8] sm:$0xff] }
 0x6ab   :  { %1683 = vmatmul.mubr.f32.vlgmr.msra.gmra.mrb[12].mxu0 %v6393_v5  ;;  %1754 = vmatmul.mubr.f32.vlgmr.msra.gmra.mrb[28].mxu1 %v6393_v5 }
 0x6ac   :  { %4632 = vmatpush1.bf16.msra.mxu0 %v5929_v13  ;;  %4664 = vmatpush1.bf16.msra.mxu1 %v6026_v61  ;;  %v2051_v13 = vld [vmem:[#allocation9 + $0x208] sm:$0xff] }
 0x6ad   :  { %4634 = vmatprep.subr.bf16.mxu0 %v5933_v22  ;;  %4666 = vmatprep.subr.bf16.mxu1 %v6029_v62  ;;  %v2055_v22 = vld [vmem:[#allocation9 + $0x228] sm:$0xff] }
 0x6ae   :  { %1865 = vmatprep.mubr.f32.mxu0 %v6959_v0  ;;  %1936 = vmatprep.mubr.f32.mxu1 %v6959_v0 }
 0x6b0   :  { %4636 = vmatpush1.bf16.msra.mxu0 %v5935_v26  ;;  %4668 = vmatpush1.bf16.msra.mxu1 %v6036_v7  ;;  %v2053_v26 = vld [vmem:[#allocation9 + $0x218] sm:$0xff] }
 0x6b1   :  { %4638 = vmatprep.subr.bf16.mxu0 %v5938_v35  ;;  %4670 = vmatprep.subr.bf16.mxu1 %v6039_v8  ;;  %v4693_v35 = vpack.c.bf16 %v2055_v22, %v2051_v13  ;;  %v2070_v13 = vld [vmem:[#allocation9 + $0x2a0] sm:$0xff]  ;;  %v4701_v22 = vpack.c.bf16 %v2071_v59, %v2067_v45 }
 0x6b2   :  { %v2098_v59 = vld [vmem:[#allocation9 + $0x380] sm:$0xff] }
 0x6b4   :  { %4640 = vmatpush1.bf16.msra.mxu0 %v5941_v39  ;;  %4672 = vmatpush1.bf16.msra.mxu1 %v6044_v48  ;;  %v2057_v39 = vld [vmem:[#allocation9 + $0x238] sm:$0xff] }
 0x6b5   :  { %4642 = vmatprep.subr.bf16.mxu0 %v5944_v44  ;;  %4674 = vmatprep.subr.bf16.mxu1 %v6047_v17  ;;  %v4725_v44 = vpack.c.bf16 %v2057_v39, %v2053_v26  ;;  %v4733_v26 = vpack.c.bf16 %v2073_v53, %v2069_v32  ;;  %v2072_v39 = vld [vmem:[#allocation9 + $0x2b0] sm:$0xff]  ;;  %v2102_v32 = vld [vmem:[#allocation9 + $0x3a0] sm:$0xff] }
 0x6b8   :  { %4644 = vmatpush1.bf16.msra.mxu0 %v5947_v52  ;;  %4676 = vmatpush1.bf16.msra.mxu1 %v6052_v56 }
 0x6b9   :  { %4646 = vmatprep.subr.bf16.mxu0 %v5950_v57  ;;  %4678 = vmatprep.subr.bf16.mxu1 %v6055_v25 }
 0x6bc   :  { %4648 = vmatpush1.bf16.msra.mxu0 %v5953_v1  ;;  %4680 = vmatpush1.bf16.msra.mxu1 %v6060_v2 }
 0x6bd   :  { %4650 = vmatprep.subr.bf16.mxu0 %v5956_v6  ;;  %4682 = vmatprep.subr.bf16.mxu1 %v6063_v33 }
 0x6c0   :  { %4652 = vmatpush1.bf16.msra.mxu0 %v5959_v15  ;;  %4684 = vmatpush1.bf16.msra.mxu1 %v6068_v11 }
 0x6c1   :  { %4654 = vmatprep.subr.bf16.mxu0 %v5962_v20  ;;  %4686 = vmatprep.subr.bf16.mxu1 %v6071_v43 }
 0x6c4   :  { %4656 = vmatpush1.bf16.msra.mxu0 %v5965_v29  ;;  %4688 = vmatpush1.bf16.msra.mxu1 %v6076_v21 }
 0x6c5   :  { %4658 = vmatprep.subr.bf16.mxu0 %v5968_v34  ;;  %4690 = vmatprep.subr.bf16.mxu1 %v6079_v50 }
 0x6c8   :  { %4660 = vmatpush1.bf16.msra.mxu0 %v5971_v41  ;;  %4692 = vmatpush1.bf16.msra.mxu1 %v6084_v58  ;;  %v2050_v58 = vld [vmem:[#allocation9 + $0x200] sm:$0xff] }
 0x6c9   :  { %4694 = vmatprep.subr.bf16.mxu0 %v4693_v35  ;;  %4726 = vmatprep.subr.bf16.mxu1 %v4725_v44  ;;  %v2068_v35 = vld [vmem:[#allocation9 + $0x290] sm:$0xff]  ;;  %v2075_v44 = vld [vmem:[#allocation9 + $0x2c8] sm:$0xff] }
 0x77e   :  { %v1684_v52 = vpop.f32.mrb[12].mxu0  ;;  %v1755_v57 = vpop.f32.mrb[28].mxu1 }
 0x77f   :  { %v1760_v1 = vadd.f32 %v1684_v52, %v6140_v14  ;;  %v1686_v6 = vpop.f32.mrb[13].mxu0  ;;  %v1757_v15 = vpop.f32.mrb[29].mxu1  ;;  %v5345_v62 = vadd.f32 %v1755_v57, %v6152_v16  ;;  %v2054_v14 = vld [vmem:[#allocation9 + $0x220] sm:$0xff]  ;;  %v2079_v52 = vld [vmem:[#allocation9 + $0x2e8] sm:$0xff]  ;;  %v2077_v57 = vld [vmem:[#allocation9 + $0x2d8] sm:$0xff] }
 0x780   :  { %v1761_v20 = vadd.f32 %v1686_v6, %v6142_v23  ;;  %v5346_v41 = vadd.f32 %v1757_v15, %v6156_v3  ;;  %v2052_v23 = vld [vmem:[#allocation9 + $0x210] sm:$0xff]  ;;  %v4695_v28 = vpack.c.bf16 %v2054_v14, %v2050_v58  ;;  %v4703_v6 = vpack.c.bf16 %v2070_v13, %v2066_v38  ;;  %v2091_v14 = vld [vmem:[#allocation9 + $0x348] sm:$0xff] }
 0x781   :  { %v4017_v29 = vmul.f32 -1.442695, %v1760_v1  ;;  %v4727_v49 = vpack.c.bf16 %v2056_v31, %v2052_v23  ;;  %v2081_v1 = vld [vmem:[#allocation9 + $0x2f8] sm:$0xff]  ;;  %v4735_v15 = vpack.c.bf16 %v2072_v39, %v2068_v35  ;;  %v2088_v58 = vld [vmem:[#allocation9 + $0x330] sm:$0xff]  ;;  %v2095_v23 = vld [vmem:[#allocation9 + $0x368] sm:$0xff]  ;;  %v4719_v39 = vpack.c.bf16 %v2102_v32, %v2098_v59 }
 0x782   :  { %v4018_v34 = vmul.f32 -1.442695, %v1761_v20  ;;  %v4019_v61 = vmul.f32 -1.442695, %v5346_v41  ;;  %v2074_v20 = vld [vmem:[#allocation9 + $0x2c0] sm:$0xff]  ;;  %v4737_v41 = vpack.c.bf16 %v2081_v1, %v2077_v57  ;;  %v2093_v31 = vld [vmem:[#allocation9 + $0x358] sm:$0xff] }
 0x783   :  { %5535 = vpow2.f32 %v4017_v29  ;;  %v2078_v29 = vld [vmem:[#allocation9 + $0x2e0] sm:$0xff]  ;;  %v2104_v38 = vld [vmem:[#allocation9 + $0x3b0] sm:$0xff]  ;;  %v2107_v13 = vld [vmem:[#allocation9 + $0x3c8] sm:$0xff] }
 0x784   :  { %5537 = vpow2.f32 %v4018_v34  ;;  %v4705_v34 = vpack.c.bf16 %v2079_v52, %v2075_v44  ;;  %v2113_v35 = vld [vmem:[#allocation9 + $0x3f8] sm:$0xff]  ;;  %v2106_v52 = vld [vmem:[#allocation9 + $0x3c0] sm:$0xff] }
 0x785   :  { %5539 = vpow2.f32 %v4019_v61  ;;  %v2076_v61 = vld [vmem:[#allocation9 + $0x2d0] sm:$0xff]  ;;  %v2008_v59 = vld [vmem:[#allocation11 + $0x2f8] sm:$0xff]  ;;  %v2001_v32 = vld [vmem:[#allocation11 + $0x2c0] sm:$0xff] }
 0x786   :  { %5541 = vtanh.f32 %v5345_v62  ;;  %v2080_v62 = vld [vmem:[#allocation9 + $0x2f0] sm:$0xff] }
 0x78d   :  { %v5536_v7 = vpop.eup %5535 }
 0x78e   :  { %v5538_v8 = vpop.eup %5537  ;;  %v1767_v48 = vadd.f32 1.0, %v5536_v7  ;;  %v2083_v7 = vld [vmem:[#allocation9 + $0x308] sm:$0xff] }
 0x78f   :  { %v1773_v17 = vadd.f32 1.0, %v5538_v8  ;;  %v5540_v56 = vpop.eup %5539  ;;  %v2087_v8 = vld [vmem:[#allocation9 + $0x328] sm:$0xff] }
 0x790   :  { %5543 = vrcp.f32 %v1767_v48  ;;  %v5542_v25 = vpop.eup %5541  ;;  %v1780_v43 = vadd.f32 1.0, %v5540_v56  ;;  %v2085_v48 = vld [vmem:[#allocation9 + $0x318] sm:$0xff]  ;;  %v4707_v56 = vpack.c.bf16 %v2078_v29, %v2074_v20  ;;  %v2112_v20 = vld [vmem:[#allocation9 + $0x3f0] sm:$0xff] }
 0x791   :  { %5545 = vrcp.f32 %v1773_v17  ;;  %v2089_v17 = vld [vmem:[#allocation9 + $0x338] sm:$0xff] }
 0x792   :  { %5547 = vrcp.f32 %v1780_v43  ;;  %v4741_v43 = vpack.c.bf16 %v2089_v17, %v2085_v48  ;;  %v1986_v48 = vld [vmem:[#allocation11 + $0x248] sm:$0xff] }
 0x793   :  { %v1990_v17 = vld [vmem:[#allocation11 + $0x268] sm:$0xff] }
 0x79a   :  { %v5544_v2 = vpop.eup %5543 }
 0x79b   :  { %v5546_v33 = vpop.eup %5545  ;;  %v1785_v11 = vmul.f32 %v5544_v2, %v5542_v25  ;;  %v4739_v25 = vpack.c.bf16 %v2080_v62, %v2076_v61  ;;  %v2082_v2 = vld [vmem:[#allocation9 + $0x300] sm:$0xff] }
 0x79c   :  { %v1784_v21 = vmul.f32 %v5546_v33, %v6390_v37  ;;  %v5548_v19 = vpop.eup %5547  ;;  %v4699_v37 = vpack.c.bf16 %v2062_v18, %v2058_v9  ;;  %v2086_v33 = vld [vmem:[#allocation9 + $0x320] sm:$0xff]  ;;  %v2096_v9 = vld [vmem:[#allocation9 + $0x370] sm:$0xff]  ;;  %v2099_v18 = vld [vmem:[#allocation9 + $0x388] sm:$0xff] }
 0x79d   :  { %v4711_v40 = vpack.c.bf16 %v2086_v33, %v2082_v2  ;;  %v1992_v2 = vld [vmem:[#allocation11 + $0x278] sm:$0xff]  ;;  %v1985_v33 = vld [vmem:[#allocation11 + $0x240] sm:$0xff] }
 0x79e   :  { %v6434_v50 = vadd.f32 %v1785_v11, %v1784_v21  ;;  %v4709_v11 = vpack.c.bf16 %v2087_v8, %v2083_v7  ;;  %v2084_v21 = vld [vmem:[#allocation9 + $0x310] sm:$0xff] }
 0x79f   :  { %v4743_v30 = vpack.c.bf16 %v2088_v58, %v2084_v21  ;;  %v1979_v7 = vld [vmem:[#allocation11 + $0x210] sm:$0xff] }
 0x7a0   :  { %5549 = vtanh.f32 %v6434_v50  ;;  %v1983_v8 = vld [vmem:[#allocation11 + $0x230] sm:$0xff] }
 0x7a1   :  { %v1987_v58 = vld [vmem:[#allocation11 + $0x250] sm:$0xff] }
 0x7aa   :  { %v5550_v36 = vpop.eup %5549 }
 0x7ab   :  { %v6437_v54 = vmul.f32 %v5550_v36, %v5548_v19  ;;  %v2094_v19 = vld [vmem:[#allocation9 + $0x360] sm:$0xff]  ;;  %v4713_v36 = vpack.c.bf16 %v2095_v23, %v2091_v14  ;;  %v1991_v14 = vld [vmem:[#allocation11 + $0x270] sm:$0xff] }
 0x7ac   :  { %v4715_v10 = vpack.c.bf16 %v2094_v19, %v2090_v46  ;;  %v6490_v23 = vpack.c.bf16 %v1991_v14, %v1987_v58  ;;  %v2000_v46 = vld [vmem:[#allocation11 + $0x2b8] sm:$0xff]  ;;  %v1993_v19 = vld [vmem:[#allocation11 + $0x280] sm:$0xff] }
 0x7ad   :  { %1866 = vmatmul.mubr.f32.vlgmr.msra.gmra.mrb[14].mxu0 %v6437_v54  ;;  %1937 = vmatmul.mubr.f32.vlgmr.msra.gmra.mrb[30].mxu1 %v6437_v54 }
 0x7ae   :  { %4696 = vmatpush1.bf16.msra.mxu0 %v4695_v28  ;;  %4728 = vmatpush1.bf16.msra.mxu1 %v4727_v49  ;;  %v4745_v28 = vpack.c.bf16 %v2097_v60, %v2093_v31  ;;  %v2092_v49 = vld [vmem:[#allocation9 + $0x350] sm:$0xff]  ;;  %v1994_v31 = vld [vmem:[#allocation11 + $0x288] sm:$0xff] }
 0x7af   :  { %4698 = vmatprep.subr.bf16.mxu0 %v4697_v55  ;;  %4730 = vmatprep.subr.bf16.mxu1 %v4729_v4  ;;  %v2103_v55 = vld [vmem:[#allocation9 + $0x3a8] sm:$0xff]  ;;  %v2101_v4 = vld [vmem:[#allocation9 + $0x398] sm:$0xff]  ;;  %v4747_v45 = vpack.c.bf16 %v2096_v9, %v2092_v49  ;;  %v1995_v9 = vld [vmem:[#allocation11 + $0x290] sm:$0xff] }
 0x7b0   :  { %2201 = vmatprep.mubr.f32.mxu0 %v6959_v0  ;;  %2314 = vmatprep.mubr.f32.mxu1 %v6959_v0  ;;  %v4717_v53 = vpack.c.bf16 %v2103_v55, %v2099_v18  ;;  %v1998_v60 = vld [vmem:[#allocation11 + $0x2a8] sm:$0xff]  ;;  %v1999_v18 = vld [vmem:[#allocation11 + $0x2b0] sm:$0xff] }
 0x7b1   :  { %v6502_v55 = vpack.c.bf16 %v1999_v18, %v1995_v9 }
 0x7b2   :  { %4700 = vmatpush1.bf16.msra.mxu0 %v4699_v37  ;;  %4732 = vmatpush1.bf16.msra.mxu1 %v4731_v27  ;;  %v4749_v37 = vpack.c.bf16 %v2105_v51, %v2101_v4  ;;  %v2100_v27 = vld [vmem:[#allocation9 + $0x390] sm:$0xff]  ;;  %v2002_v4 = vld [vmem:[#allocation11 + $0x2c8] sm:$0xff] }
 0x7b3   :  { %4702 = vmatprep.subr.bf16.mxu0 %v4701_v22  ;;  %4734 = vmatprep.subr.bf16.mxu1 %v4733_v26  ;;  %v2111_v22 = vld [vmem:[#allocation9 + $0x3e8] sm:$0xff]  ;;  %v2109_v26 = vld [vmem:[#allocation9 + $0x3d8] sm:$0xff]  ;;  %v4751_v44 = vpack.c.bf16 %v2104_v38, %v2100_v27  ;;  %v2003_v38 = vld [vmem:[#allocation11 + $0x2d0] sm:$0xff] }
 0x7b4   :  { %v4721_v57 = vpack.c.bf16 %v2111_v22, %v2107_v13  ;;  %v4753_v1 = vpack.c.bf16 %v2113_v35, %v2109_v26  ;;  %v2006_v51 = vld [vmem:[#allocation11 + $0x2e8] sm:$0xff]  ;;  %v2007_v13 = vld [vmem:[#allocation11 + $0x2f0] sm:$0xff] }
 0x7b5   :  { %v2010_v22 = vld [vmem:[#allocation11 + $0x308] sm:$0xff]  ;;  %v6514_v26 = vpack.c.bf16 %v2007_v13, %v2003_v38  ;;  %v2037_v38 = vld [vmem:[#allocation11 + $0x3e0] sm:$0xff] }
 0x7b6   :  { %4704 = vmatpush1.bf16.msra.mxu0 %v4703_v6  ;;  %4736 = vmatpush1.bf16.msra.mxu1 %v4735_v15  ;;  %v2110_v6 = vld [vmem:[#allocation9 + $0x3e0] sm:$0xff]  ;;  %v2108_v15 = vld [vmem:[#allocation9 + $0x3d0] sm:$0xff]  ;;  %v2014_v35 = vld [vmem:[#allocation11 + $0x328] sm:$0xff] }
 0x7b7   :  { %4706 = vmatprep.subr.bf16.mxu0 %v4705_v34  ;;  %4738 = vmatprep.subr.bf16.mxu1 %v4737_v41  ;;  %v4723_v29 = vpack.c.bf16 %v2110_v6, %v2106_v52  ;;  %v4755_v34 = vpack.c.bf16 %v2112_v20, %v2108_v15  ;;  %v1977_v41 = vld [vmem:[#allocation11 + $0x200] sm:$0xff]  ;;  %v6518_v52 = vpack.c.bf16 %v2014_v35, %v2010_v22  ;;  %v2011_v15 = vld [vmem:[#allocation11 + $0x310] sm:$0xff] }
 0x7b8   :  { %v2013_v6 = vld [vmem:[#allocation11 + $0x320] sm:$0xff]  ;;  %v2035_v35 = vld [vmem:[#allocation11 + $0x3d0] sm:$0xff] }
 0x7ba   :  { %4708 = vmatpush1.bf16.msra.mxu0 %v4707_v56  ;;  %4740 = vmatpush1.bf16.msra.mxu1 %v4739_v25  ;;  %v1988_v56 = vld [vmem:[#allocation11 + $0x258] sm:$0xff]  ;;  %v6483_v25 = vpack.c.bf16 %v1990_v17, %v1986_v48  ;;  %v2019_v48 = vld [vmem:[#allocation11 + $0x350] sm:$0xff] }
 0x7bb   :  { %4710 = vmatprep.subr.bf16.mxu0 %v4709_v11  ;;  %4742 = vmatprep.subr.bf16.mxu1 %v4741_v43  ;;  %v1989_v11 = vld [vmem:[#allocation11 + $0x260] sm:$0xff]  ;;  %v6485_v43 = vpack.c.bf16 %v1992_v2, %v1988_v56  ;;  %v2023_v17 = vld [vmem:[#allocation11 + $0x370] sm:$0xff]  ;;  %v2026_v2 = vld [vmem:[#allocation11 + $0x388] sm:$0xff] }
 0x7bc   :  { %v6487_v21 = vpack.c.bf16 %v1989_v11, %v1985_v33  ;;  %v2030_v33 = vld [vmem:[#allocation11 + $0x3a8] sm:$0xff]  ;;  %v2028_v11 = vld [vmem:[#allocation11 + $0x398] sm:$0xff]  ;;  %v6538_v58 = vpack.c.bf16 %v2023_v17, %v2019_v48 }
 0x7bd   :  { %v6540_v14 = vpack.c.bf16 %v2030_v33, %v2026_v2 }
 0x7be   :  { %4712 = vmatpush1.bf16.msra.mxu0 %v4711_v40  ;;  %4744 = vmatpush1.bf16.msra.mxu1 %v4743_v30  ;;  %v1996_v40 = vld [vmem:[#allocation11 + $0x298] sm:$0xff]  ;;  %v6495_v30 = vpack.c.bf16 %v1998_v60, %v1994_v31  ;;  %v2025_v60 = vld [vmem:[#allocation11 + $0x380] sm:$0xff] }
 0x7bf   :  { %4714 = vmatprep.subr.bf16.mxu0 %v4713_v36  ;;  %4746 = vmatprep.subr.bf16.mxu1 %v4745_v28  ;;  %v1997_v36 = vld [vmem:[#allocation11 + $0x2a0] sm:$0xff]  ;;  %v6497_v28 = vpack.c.bf16 %v2000_v46, %v1996_v40  ;;  %v2032_v31 = vld [vmem:[#allocation11 + $0x3b8] sm:$0xff] }
 0x7c0   :  { %v6499_v49 = vpack.c.bf16 %v1997_v36, %v1993_v19  ;;  %v2029_v40 = vld [vmem:[#allocation11 + $0x3a0] sm:$0xff]  ;;  %v6543_v46 = vpack.c.bf16 %v2032_v31, %v2028_v11  ;;  %v2027_v19 = vld [vmem:[#allocation11 + $0x390] sm:$0xff] }
 0x7c1   :  { %v2031_v36 = vld [vmem:[#allocation11 + $0x3b0] sm:$0xff]  ;;  %v6546_v9 = vpack.c.bf16 %v2029_v40, %v2025_v60 }
 0x7c2   :  { %4716 = vmatpush1.bf16.msra.mxu0 %v4715_v10  ;;  %4748 = vmatpush1.bf16.msra.mxu1 %v4747_v45  ;;  %v2004_v10 = vld [vmem:[#allocation11 + $0x2d8] sm:$0xff]  ;;  %v6507_v45 = vpack.c.bf16 %v2006_v51, %v2002_v4  ;;  %v6550_v18 = vpack.c.bf16 %v2031_v36, %v2027_v19  ;;  %v2034_v4 = vld [vmem:[#allocation11 + $0x3c8] sm:$0xff] }
 0x7c3   :  { %4718 = vmatprep.subr.bf16.mxu0 %v4717_v53  ;;  %4750 = vmatprep.subr.bf16.mxu1 %v4749_v37  ;;  %v2005_v53 = vld [vmem:[#allocation11 + $0x2e0] sm:$0xff]  ;;  %v6509_v37 = vpack.c.bf16 %v2008_v59, %v2004_v10  ;;  %v2038_v51 = vld [vmem:[#allocation11 + $0x3e8] sm:$0xff]  ;;  %v2036_v10 = vld [vmem:[#allocation11 + $0x3d8] sm:$0xff] }
 0x7c4   :  { %v6511_v27 = vpack.c.bf16 %v2005_v53, %v2001_v32  ;;  %v6555_v59 = vpack.c.bf16 %v2038_v51, %v2034_v4  ;;  %v2040_v32 = vld [vmem:[#allocation11 + $0x3f8] sm:$0xff]  ;;  %v2033_v53 = vld [vmem:[#allocation11 + $0x3c0] sm:$0xff] }
 0x7c5   :  { %v6557_v13 = vpack.c.bf16 %v2040_v32, %v2036_v10  ;;  %v6559_v22 = vpack.c.bf16 %v2037_v38, %v2033_v53 }
 0x7c6   :  { %4720 = vmatpush1.bf16.msra.mxu0 %v4719_v39  ;;  %4752 = vmatpush1.bf16.msra.mxu1 %v4751_v44  ;;  %v2012_v39 = vld [vmem:[#allocation11 + $0x318] sm:$0xff] }
 0x7c7   :  { %4722 = vmatprep.subr.bf16.mxu0 %v4721_v57  ;;  %4754 = vmatprep.subr.bf16.mxu1 %v4753_v1  ;;  %v2016_v44 = vld [vmem:[#allocation11 + $0x338] sm:$0xff]  ;;  %v2009_v1 = vld [vmem:[#allocation11 + $0x300] sm:$0xff] }
 0x7c8   :  { %v6520_v57 = vpack.c.bf16 %v2016_v44, %v2012_v39  ;;  %v6523_v20 = vpack.c.bf16 %v2013_v6, %v2009_v1  ;;  %v2039_v39 = vld [vmem:[#allocation11 + $0x3f0] sm:$0xff] }
 0x7c9   :  { %v6562_v44 = vpack.c.bf16 %v2039_v39, %v2035_v35  ;;  %v6962_v35 = vld [vmem:[#allocation19_spill] sm:$0xff] }
 0x7ca   :  { %4724 = vmatpush1.bf16.msra.mxu0 %v4723_v29  ;;  %4756 = vmatpush1.bf16.msra.mxu1 %v4755_v34  ;;  %v2015_v29 = vld [vmem:[#allocation11 + $0x330] sm:$0xff]  ;;  %v2018_v34 = vld [vmem:[#allocation11 + $0x348] sm:$0xff]  ;;  %v6963_v39 = vsub.s32 0, %v6962_v35 }
 0x7cd   :  { %2202 = vmatmul.mubr.f32.vlgmr.msra.gmra.mrb[16].mxu0 %v6163_v63  ;;  %2315 = vmatmul.mubr.f32.vlgmr.msra.gmra.mrb[32].mxu1 %v6163_v63  ;;  %v1978_v63 = vld [vmem:[#allocation11 + $0x208] sm:$0xff] }
 0x7ce   :  { %2207 = vmatprep.mubr.f32.mxu0 %v6959_v0  ;;  %2320 = vmatprep.mubr.f32.mxu1 %v6959_v0 }
 0x7d1   :  { %2208 = vmatmul.mubr.f32.gmra.mrb[18].mxu0 %v6209_v12  ;;  %2321 = vmatmul.mubr.f32.gmra.mrb[34].mxu1 %v6209_v12  ;;  %v1982_v12 = vld [vmem:[#allocation11 + $0x228] sm:$0xff] }
 0x7d2   :  { %2213 = vmatprep.mubr.f32.mxu0 %v6959_v0  ;;  %2326 = vmatprep.mubr.f32.mxu1 %v6959_v0 }
 0x7d5   :  { %2214 = vmatmul.mubr.f32.gmra.mrb[20].mxu0 %v6255_v24  ;;  %2327 = vmatmul.mubr.f32.gmra.mrb[36].mxu1 %v6255_v24  ;;  %v1980_v24 = vld [vmem:[#allocation11 + $0x218] sm:$0xff] }
 0x7d6   :  { %2219 = vmatprep.mubr.f32.mxu0 %v6959_v0  ;;  %2332 = vmatprep.mubr.f32.mxu1 %v6959_v0 }
 0x7d9   :  { %2220 = vmatmul.mubr.f32.gmra.mrb[22].mxu0 %v6301_v47  ;;  %2333 = vmatmul.mubr.f32.gmra.mrb[38].mxu1 %v6301_v47  ;;  %v6471_v47 = vpack.c.bf16 %v1982_v12, %v1978_v63  ;;  %v2022_v63 = vld [vmem:[#allocation11 + $0x368] sm:$0xff]  ;;  %v6527_v12 = vpack.c.bf16 %v2015_v29, %v2011_v15 }
 0x7da   :  { %2225 = vmatprep.mubr.f32.mxu0 %v6959_v0  ;;  %2338 = vmatprep.mubr.f32.mxu1 %v6959_v0  ;;  %v6960_v15 = vld [vmem:[#allocation20_spill] sm:$0xff] }
 0x7db   :  { %4758 = vmatprep.subr.bf16.mxu0 %v6471_v47 }
 0x7dd   :  { %2226 = vmatmul.mubr.f32.gmra.mrb[24].mxu0 %v6347_v42  ;;  %2339 = vmatmul.mubr.f32.gmra.mrb[40].mxu1 %v6347_v42  ;;  %v1984_v42 = vld [vmem:[#allocation11 + $0x238] sm:$0xff] }
 0x7de   :  { %2231 = vmatprep.mubr.f32.mxu0 %v6959_v0  ;;  %2344 = vmatprep.mubr.f32.mxu1 %v6959_v0  ;;  %v6473_v61 = vpack.c.bf16 %v1984_v42, %v1980_v24  ;;  %v6529_v24 = vpack.c.bf16 %v2022_v63, %v2018_v34  ;;  %v2020_v42 = vld [vmem:[#allocation11 + $0x358] sm:$0xff] }
 0x7e0   :  { %4790 = vmatprep.subr.bf16.mxu1 %v6473_v61 }
 0x7e1   :  { %2232 = vmatmul.mubr.f32.gmra.mrb[26].mxu0 %v6393_v5  ;;  %2345 = vmatmul.mubr.f32.gmra.mrb[42].mxu1 %v6393_v5  ;;  %v1981_v5 = vld [vmem:[#allocation11 + $0x220] sm:$0xff] }
 0x7e2   :  { %2237 = vmatprep.mubr.f32.mxu0 %v6959_v0  ;;  %2350 = vmatprep.mubr.f32.mxu1 %v6959_v0  ;;  %v6475_v62 = vpack.c.bf16 %v1981_v5, %v1977_v41  ;;  %v2024_v41 = vld [vmem:[#allocation11 + $0x378] sm:$0xff]  ;;  %v2017_v5 = vld [vmem:[#allocation11 + $0x340] sm:$0xff] }
 0x7e4   :  { %4760 = vmatpush1.bf16.msra.mxu0 %v6475_v62 }
 0x7e5   :  { %2238 = vmatmul.mubr.f32.gmra.mrb[28].mxu0 %v6437_v54  ;;  %2351 = vmatmul.mubr.f32.gmra.mrb[44].mxu1 %v6437_v54  ;;  %v6478_v54 = vpack.c.bf16 %v1983_v8, %v1979_v7  ;;  %v6531_v7 = vpack.c.bf16 %v2024_v41, %v2020_v42  ;;  %v2021_v8 = vld [vmem:[#allocation11 + $0x360] sm:$0xff]  ;;  %v6961_v42 = vld [vmem:[#allocation21_spill] sm:$0xff] }
 0x7e6   :  { %2243 = vmatprep.mubr.f32.mxu0 %v6959_v0  ;;  %2356 = vmatprep.mubr.f32.mxu1 %v6959_v0  ;;  %v6534_v56 = vpack.c.bf16 %v2021_v8, %v2017_v5 }
 0x7e7   :  { %4792 = vmatpush1.bf16.msra.mxu1 %v6478_v54  ;;  %4762 = vmatprep.subr.bf16.mxu0 %v6483_v25 }
 0x7e8   :  { %4794 = vmatprep.subr.bf16.mxu1 %v6485_v43  ;;  %4764 = vmatpush1.bf16.msra.mxu0 %v6487_v21 }
 0x7e9   :  { %4766 = vmatprep.subr.bf16.mxu0 %v6495_v30 }
 0x7eb   :  { %4796 = vmatpush1.bf16.msra.mxu1 %v6490_v23 }
 0x7ec   :  { %4798 = vmatprep.subr.bf16.mxu1 %v6497_v28  ;;  %4768 = vmatpush1.bf16.msra.mxu0 %v6499_v49 }
 0x7ed   :  { %4770 = vmatprep.subr.bf16.mxu0 %v6507_v45 }
 0x7ef   :  { %4800 = vmatpush1.bf16.msra.mxu1 %v6502_v55 }
 0x7f0   :  { %4802 = vmatprep.subr.bf16.mxu1 %v6509_v37  ;;  %4772 = vmatpush1.bf16.msra.mxu0 %v6511_v27 }
 0x7f1   :  { %4774 = vmatprep.subr.bf16.mxu0 %v6518_v52 }
 0x7f3   :  { %4804 = vmatpush1.bf16.msra.mxu1 %v6514_v26 }
 0x7f4   :  { %4806 = vmatprep.subr.bf16.mxu1 %v6520_v57  ;;  %4776 = vmatpush1.bf16.msra.mxu0 %v6523_v20 }
 0x7f5   :  { %4778 = vmatprep.subr.bf16.mxu0 %v6529_v24 }
 0x7f7   :  { %4808 = vmatpush1.bf16.msra.mxu1 %v6527_v12 }
 0x7f8   :  { %4810 = vmatprep.subr.bf16.mxu1 %v6531_v7  ;;  %4780 = vmatpush1.bf16.msra.mxu0 %v6534_v56 }
 0x7f9   :  { %4782 = vmatprep.subr.bf16.mxu0 %v6540_v14 }
 0x7fb   :  { %4812 = vmatpush1.bf16.msra.mxu1 %v6538_v58 }
 0x7fc   :  { %4814 = vmatprep.subr.bf16.mxu1 %v6543_v46  ;;  %4784 = vmatpush1.bf16.msra.mxu0 %v6546_v9 }
 0x7fd   :  { %4786 = vmatprep.subr.bf16.mxu0 %v6555_v59 }
 0x7ff   :  { %4816 = vmatpush1.bf16.msra.mxu1 %v6550_v18 }
 0x800   :  { %4818 = vmatprep.subr.bf16.mxu1 %v6557_v13  ;;  %4788 = vmatpush1.bf16.msra.mxu0 %v6559_v22 }
 0x801   :  { %4822 = vmatprep.subr.bf16.mxu0 %v6471_v47 }
 0x803   :  { %4820 = vmatpush1.bf16.msra.mxu1 %v6562_v44 }
 0x804   :  { %4854 = vmatprep.subr.bf16.mxu1 %v6473_v61 }
 0x880   :  { %v1867_v1 = vpop.f32.mrb[14].mxu0  ;;  %v1938_v6 = vpop.f32.mrb[30].mxu1 }
 0x881   :  { %v1943_v29 = vadd.f32 %v1867_v1, %v6960_v15  ;;  %v1869_v34 = vpop.f32.mrb[15].mxu0  ;;  %v1940_v63 = vpop.f32.mrb[31].mxu1  ;;  %v5347_v2 = vadd.f32 %v1938_v6, %v6152_v16  ;;  %v6964_v6 = vsub.s32 1, %v6962_v35 }
 0x882   :  { %v1944_v41 = vadd.f32 %v1869_v34, %v6961_v42  ;;  %v5348_v48 = vadd.f32 %v1940_v63, %v6156_v3 }
 0x883   :  { %v4020_v5 = vmul.f32 -1.442695, %v1943_v29 }
 0x884   :  { %v4021_v8 = vmul.f32 -1.442695, %v1944_v41  ;;  %v4022_v17 = vmul.f32 -1.442695, %v5348_v48 }
 0x885   :  { %5551 = vpow2.f32 %v4020_v5 }
 0x886   :  { %5553 = vpow2.f32 %v4021_v8 }
 0x887   :  { %5555 = vpow2.f32 %v4022_v17  ;;  %v6965_v17 = vsub.s32 3, %v6962_v35 }
 0x888   :  { %5557 = vtanh.f32 %v5347_v2 }
 0x88f   :  { %v5552_v33 = vpop.eup %5551 }
 0x890   :  { %v5554_v11 = vpop.eup %5553  ;;  %v1950_v31 = vadd.f32 1.0, %v5552_v33 }
 0x891   :  { %v1956_v60 = vadd.f32 1.0, %v5554_v11  ;;  %v5556_v40 = vpop.eup %5555  ;;  %v6966_v11 = vsub.s32 2, %v6962_v35 }
 0x892   :  { %5559 = vrcp.f32 %v1950_v31  ;;  %v5558_v19 = vpop.eup %5557  ;;  %v1963_v10 = vadd.f32 1.0, %v5556_v40 }
 0x893   :  { %5561 = vrcp.f32 %v1956_v60 }
 0x894   :  { %5563 = vrcp.f32 %v1963_v10 }
 0x89c   :  { %v5560_v36 = vpop.eup %5559 }
 0x89d   :  { %v5562_v4 = vpop.eup %5561  ;;  %v1968_v51 = vmul.f32 %v5560_v36, %v5558_v19 }
 0x89e   :  { %v1967_v32 = vmul.f32 %v5562_v4, %v6434_v50  ;;  %v5564_v16 = vpop.eup %5563  ;;  %v4023_v50 = vld [vmem:[%s6944_s3 + $0x4] sm:$0xf] }
 0x89f   :  { %v6617_v1 = vrot.slane %v4023_v50, %v6963_v39  ;;  %v6621_v15 = vrot.slane %v4023_v50, %v6964_v6  ;;  %v6627_v2 = vrot.slane %v4023_v50, %v6965_v17  ;;  %v6632_v31 = vrot.slane %v4023_v50, %v6966_v11 }
 0x8a0   :  { %v1969_v3 = vadd.f32 %v1968_v51, %v1967_v32 }
 0x8a2   :  { %5565 = vtanh.f32 %v1969_v3 }
 0x8ac   :  { %v5566_v53 = vpop.eup %5565 }
 0x8ad   :  { %v1971_v38 = vmul.f32 %v5566_v53, %v5564_v16 }
 0x8af   :  { %2244 = vmatmul.mubr.f32.gmra.mrb[30].mxu0 %v1971_v38  ;;  %2357 = vmatmul.mubr.f32.gmra.mrb[46].mxu1 %v1971_v38 }
 0x8b0   :  { %2466 = vmatprep.mubr.f32.mxu0 %v6959_v0  ;;  %2537 = vmatprep.mubr.f32.mxu1 %v6959_v0 }
 0x8b3   :  { %2467 = vmatmul.mubr.f32.vlgmr.msra.gmra.mrb[16].mxu0 %v6959_v0  ;;  %2538 = vmatmul.mubr.f32.vlgmr.msra.gmra.mrb[32].mxu1 %v6959_v0 }
 0x8b4   :  { %4824 = vmatpush1.bf16.msra.mxu0 %v6475_v62  ;;  %4856 = vmatpush1.bf16.msra.mxu1 %v6478_v54 }
 0x8b5   :  { %4826 = vmatprep.subr.bf16.mxu0 %v6483_v25  ;;  %4858 = vmatprep.subr.bf16.mxu1 %v6485_v43 }
 0x8b6   :  { %2645 = vmatprep.mubr.f32.mxu0 %v6959_v0  ;;  %2716 = vmatprep.mubr.f32.mxu1 %v6959_v0 }
 0x8b8   :  { %4828 = vmatpush1.bf16.msra.mxu0 %v6487_v21  ;;  %4860 = vmatpush1.bf16.msra.mxu1 %v6490_v23 }
 0x8b9   :  { %4830 = vmatprep.subr.bf16.mxu0 %v6495_v30  ;;  %4862 = vmatprep.subr.bf16.mxu1 %v6497_v28 }
 0x8bc   :  { %4832 = vmatpush1.bf16.msra.mxu0 %v6499_v49  ;;  %4864 = vmatpush1.bf16.msra.mxu1 %v6502_v55 }
 0x8bd   :  { %4834 = vmatprep.subr.bf16.mxu0 %v6507_v45  ;;  %4866 = vmatprep.subr.bf16.mxu1 %v6509_v37 }
 0x8c0   :  { %4836 = vmatpush1.bf16.msra.mxu0 %v6511_v27  ;;  %4868 = vmatpush1.bf16.msra.mxu1 %v6514_v26 }
 0x8c1   :  { %4838 = vmatprep.subr.bf16.mxu0 %v6518_v52  ;;  %4870 = vmatprep.subr.bf16.mxu1 %v6520_v57 }
 0x8c4   :  { %4840 = vmatpush1.bf16.msra.mxu0 %v6523_v20  ;;  %4872 = vmatpush1.bf16.msra.mxu1 %v6527_v12 }
 0x8c5   :  { %4842 = vmatprep.subr.bf16.mxu0 %v6529_v24  ;;  %4874 = vmatprep.subr.bf16.mxu1 %v6531_v7 }
 0x8c8   :  { %4844 = vmatpush1.bf16.msra.mxu0 %v6534_v56  ;;  %4876 = vmatpush1.bf16.msra.mxu1 %v6538_v58 }
 0x8c9   :  { %4846 = vmatprep.subr.bf16.mxu0 %v6540_v14  ;;  %4878 = vmatprep.subr.bf16.mxu1 %v6543_v46 }
 0x8cc   :  { %4848 = vmatpush1.bf16.msra.mxu0 %v6546_v9  ;;  %4880 = vmatpush1.bf16.msra.mxu1 %v6550_v18 }
 0x8cd   :  { %4850 = vmatprep.subr.bf16.mxu0 %v6555_v59  ;;  %4882 = vmatprep.subr.bf16.mxu1 %v6557_v13 }
 0x8d0   :  { %4852 = vmatpush1.bf16.msra.mxu0 %v6559_v22  ;;  %4884 = vmatpush1.bf16.msra.mxu1 %v6562_v44 }
 0x8d1   :  { %4886 = vmatprep.subr.bf16.mxu0 %v6471_v47  ;;  %4918 = vmatprep.subr.bf16.mxu1 %v6473_v61 }
 0x986   :  { %v2468_v29 = vpop.f32.mrb[16].mxu0  ;;  %v2539_v34 = vpop.f32.mrb[32].mxu1 }
 0x987   :  { %v5349_v63 = vadd.f32 %v2468_v29, %v6617_v1  ;;  %v2470_v42 = vpop.f32.mrb[17].mxu0  ;;  %v2541_v41 = vpop.f32.mrb[33].mxu1  ;;  %v5365_v40 = vadd.f32 %v2539_v34, %v6632_v31 }
 0x988   :  { %v5350_v5 = vadd.f32 %v2470_v42, %v6621_v15  ;;  %v5366_v33 = vadd.f32 %v2541_v41, %v6627_v2 }
 0x989   :  { %v4024_v8 = vmul.f32 -1.442695, %v5349_v63 }
 0x98a   :  { %v4025_v48 = vmul.f32 -1.442695, %v5350_v5  ;;  %v4026_v60 = vmul.f32 -1.442695, %v5366_v33 }
 0x98b   :  { %5567 = vpow2.f32 %v4024_v8 }
 0x98c   :  { %5569 = vpow2.f32 %v4025_v48 }
 0x98d   :  { %5571 = vpow2.f32 %v4026_v60 }
 0x98e   :  { %5573 = vtanh.f32 %v5365_v40 }
 0x995   :  { %v5568_v19 = vpop.eup %5567 }
 0x996   :  { %v5570_v36 = vpop.eup %5569  ;;  %v2551_v4 = vadd.f32 1.0, %v5568_v19 }
 0x997   :  { %v2557_v51 = vadd.f32 1.0, %v5570_v36  ;;  %v5572_v10 = vpop.eup %5571 }
 0x998   :  { %5575 = vrcp.f32 %v2551_v4  ;;  %v5574_v32 = vpop.eup %5573  ;;  %v2564_v38 = vadd.f32 1.0, %v5572_v10 }
 0x999   :  { %5577 = vrcp.f32 %v2557_v51 }
 0x99a   :  { %5579 = vrcp.f32 %v2564_v38 }
 0x9a2   :  { %v5576_v3 = vpop.eup %5575 }
 0x9a3   :  { %v5578_v16 = vpop.eup %5577  ;;  %v2569_v53 = vmul.f32 %v5576_v3, %v5574_v32 }
 0x9a4   :  { %v2568_v35 = vmul.f32 0.0, %v5578_v16  ;;  %v5580_v39 = vpop.eup %5579 }
 0x9a6   :  { %v6635_v50 = vadd.f32 %v2569_v53, %v2568_v35 }
 0x9a8   :  { %5581 = vtanh.f32 %v6635_v50 }
 0x9b2   :  { %v5582_v6 = vpop.eup %5581 }
 0x9b3   :  { %v6638_v29 = vmul.f32 %v5582_v6, %v5580_v39 }
 0x9b5   :  { %2646 = vmatmul.mubr.f32.vlgmr.msra.gmra.mrb[18].mxu0 %v6638_v29  ;;  %2717 = vmatmul.mubr.f32.vlgmr.msra.gmra.mrb[34].mxu1 %v6638_v29 }
 0x9b6   :  { %4888 = vmatpush1.bf16.msra.mxu0 %v6475_v62  ;;  %4920 = vmatpush1.bf16.msra.mxu1 %v6478_v54 }
 0x9b7   :  { %4890 = vmatprep.subr.bf16.mxu0 %v6483_v25  ;;  %4922 = vmatprep.subr.bf16.mxu1 %v6485_v43 }
 0x9b8   :  { %2824 = vmatprep.mubr.f32.mxu0 %v6959_v0  ;;  %2895 = vmatprep.mubr.f32.mxu1 %v6959_v0 }
 0x9ba   :  { %4892 = vmatpush1.bf16.msra.mxu0 %v6487_v21  ;;  %4924 = vmatpush1.bf16.msra.mxu1 %v6490_v23 }
 0x9bb   :  { %4894 = vmatprep.subr.bf16.mxu0 %v6495_v30  ;;  %4926 = vmatprep.subr.bf16.mxu1 %v6497_v28 }
 0x9be   :  { %4896 = vmatpush1.bf16.msra.mxu0 %v6499_v49  ;;  %4928 = vmatpush1.bf16.msra.mxu1 %v6502_v55 }
 0x9bf   :  { %4898 = vmatprep.subr.bf16.mxu0 %v6507_v45  ;;  %4930 = vmatprep.subr.bf16.mxu1 %v6509_v37 }
 0x9c2   :  { %4900 = vmatpush1.bf16.msra.mxu0 %v6511_v27  ;;  %4932 = vmatpush1.bf16.msra.mxu1 %v6514_v26 }
 0x9c3   :  { %4902 = vmatprep.subr.bf16.mxu0 %v6518_v52  ;;  %4934 = vmatprep.subr.bf16.mxu1 %v6520_v57 }
 0x9c6   :  { %4904 = vmatpush1.bf16.msra.mxu0 %v6523_v20  ;;  %4936 = vmatpush1.bf16.msra.mxu1 %v6527_v12 }
 0x9c7   :  { %4906 = vmatprep.subr.bf16.mxu0 %v6529_v24  ;;  %4938 = vmatprep.subr.bf16.mxu1 %v6531_v7 }
 0x9ca   :  { %4908 = vmatpush1.bf16.msra.mxu0 %v6534_v56  ;;  %4940 = vmatpush1.bf16.msra.mxu1 %v6538_v58 }
 0x9cb   :  { %4910 = vmatprep.subr.bf16.mxu0 %v6540_v14  ;;  %4942 = vmatprep.subr.bf16.mxu1 %v6543_v46 }
 0x9ce   :  { %4912 = vmatpush1.bf16.msra.mxu0 %v6546_v9  ;;  %4944 = vmatpush1.bf16.msra.mxu1 %v6550_v18 }
 0x9cf   :  { %4914 = vmatprep.subr.bf16.mxu0 %v6555_v59  ;;  %4946 = vmatprep.subr.bf16.mxu1 %v6557_v13 }
 0x9d2   :  { %4916 = vmatpush1.bf16.msra.mxu0 %v6559_v22  ;;  %4948 = vmatpush1.bf16.msra.mxu1 %v6562_v44 }
 0x9d3   :  { %4950 = vmatprep.subr.bf16.mxu0 %v6471_v47  ;;  %4982 = vmatprep.subr.bf16.mxu1 %v6473_v61 }
 0xa88   :  { %v2647_v34 = vpop.f32.mrb[18].mxu0  ;;  %v2718_v63 = vpop.f32.mrb[34].mxu1 }
 0xa89   :  { %v5351_v42 = vadd.f32 %v2647_v34, %v6617_v1  ;;  %v2649_v41 = vpop.f32.mrb[19].mxu0  ;;  %v2720_v5 = vpop.f32.mrb[35].mxu1  ;;  %v5367_v60 = vadd.f32 %v2718_v63, %v6632_v31 }
 0xa8a   :  { %v5352_v8 = vadd.f32 %v2649_v41, %v6621_v15  ;;  %v5368_v33 = vadd.f32 %v2720_v5, %v6627_v2 }
 0xa8b   :  { %v4027_v48 = vmul.f32 -1.442695, %v5351_v42 }
 0xa8c   :  { %v4028_v17 = vmul.f32 -1.442695, %v5352_v8  ;;  %v4029_v11 = vmul.f32 -1.442695, %v5368_v33 }
 0xa8d   :  { %5583 = vpow2.f32 %v4027_v48 }
 0xa8e   :  { %5585 = vpow2.f32 %v4028_v17 }
 0xa8f   :  { %5587 = vpow2.f32 %v4029_v11 }
 0xa90   :  { %5589 = vtanh.f32 %v5367_v60 }
 0xa97   :  { %v5584_v40 = vpop.eup %5583 }
 0xa98   :  { %v5586_v19 = vpop.eup %5585  ;;  %v2730_v36 = vadd.f32 1.0, %v5584_v40 }
 0xa99   :  { %v2736_v4 = vadd.f32 1.0, %v5586_v19  ;;  %v5588_v51 = vpop.eup %5587 }
 0xa9a   :  { %5591 = vrcp.f32 %v2730_v36  ;;  %v5590_v10 = vpop.eup %5589  ;;  %v2743_v53 = vadd.f32 1.0, %v5588_v51 }
 0xa9b   :  { %5593 = vrcp.f32 %v2736_v4 }
 0xa9c   :  { %5595 = vrcp.f32 %v2743_v53 }
 0xaa4   :  { %v5592_v32 = vpop.eup %5591 }
 0xaa5   :  { %v5594_v3 = vpop.eup %5593  ;;  %v2748_v16 = vmul.f32 %v5592_v32, %v5590_v10 }
 0xaa6   :  { %v2747_v38 = vmul.f32 %v5594_v3, %v6635_v50  ;;  %v5596_v39 = vpop.eup %5595 }
 0xaa8   :  { %v6681_v35 = vadd.f32 %v2748_v16, %v2747_v38 }
 0xaaa   :  { %5597 = vtanh.f32 %v6681_v35 }
 0xab4   :  { %v5598_v6 = vpop.eup %5597 }
 0xab5   :  { %v6684_v34 = vmul.f32 %v5598_v6, %v5596_v39 }
 0xab7   :  { %2825 = vmatmul.mubr.f32.vlgmr.msra.gmra.mrb[20].mxu0 %v6684_v34  ;;  %2896 = vmatmul.mubr.f32.vlgmr.msra.gmra.mrb[36].mxu1 %v6684_v34 }
 0xab8   :  { %4952 = vmatpush1.bf16.msra.mxu0 %v6475_v62  ;;  %4984 = vmatpush1.bf16.msra.mxu1 %v6478_v54 }
 0xab9   :  { %4954 = vmatprep.subr.bf16.mxu0 %v6483_v25  ;;  %4986 = vmatprep.subr.bf16.mxu1 %v6485_v43 }
 0xaba   :  { %3003 = vmatprep.mubr.f32.mxu0 %v6959_v0  ;;  %3074 = vmatprep.mubr.f32.mxu1 %v6959_v0 }
 0xabc   :  { %4956 = vmatpush1.bf16.msra.mxu0 %v6487_v21  ;;  %4988 = vmatpush1.bf16.msra.mxu1 %v6490_v23 }
 0xabd   :  { %4958 = vmatprep.subr.bf16.mxu0 %v6495_v30  ;;  %4990 = vmatprep.subr.bf16.mxu1 %v6497_v28 }
 0xac0   :  { %4960 = vmatpush1.bf16.msra.mxu0 %v6499_v49  ;;  %4992 = vmatpush1.bf16.msra.mxu1 %v6502_v55 }
 0xac1   :  { %4962 = vmatprep.subr.bf16.mxu0 %v6507_v45  ;;  %4994 = vmatprep.subr.bf16.mxu1 %v6509_v37 }
 0xac4   :  { %4964 = vmatpush1.bf16.msra.mxu0 %v6511_v27  ;;  %4996 = vmatpush1.bf16.msra.mxu1 %v6514_v26 }
 0xac5   :  { %4966 = vmatprep.subr.bf16.mxu0 %v6518_v52  ;;  %4998 = vmatprep.subr.bf16.mxu1 %v6520_v57 }
 0xac8   :  { %4968 = vmatpush1.bf16.msra.mxu0 %v6523_v20  ;;  %5000 = vmatpush1.bf16.msra.mxu1 %v6527_v12 }
 0xac9   :  { %4970 = vmatprep.subr.bf16.mxu0 %v6529_v24  ;;  %5002 = vmatprep.subr.bf16.mxu1 %v6531_v7 }
 0xacc   :  { %4972 = vmatpush1.bf16.msra.mxu0 %v6534_v56  ;;  %5004 = vmatpush1.bf16.msra.mxu1 %v6538_v58 }
 0xacd   :  { %4974 = vmatprep.subr.bf16.mxu0 %v6540_v14  ;;  %5006 = vmatprep.subr.bf16.mxu1 %v6543_v46 }
 0xad0   :  { %4976 = vmatpush1.bf16.msra.mxu0 %v6546_v9  ;;  %5008 = vmatpush1.bf16.msra.mxu1 %v6550_v18 }
 0xad1   :  { %4978 = vmatprep.subr.bf16.mxu0 %v6555_v59  ;;  %5010 = vmatprep.subr.bf16.mxu1 %v6557_v13 }
 0xad4   :  { %4980 = vmatpush1.bf16.msra.mxu0 %v6559_v22  ;;  %5012 = vmatpush1.bf16.msra.mxu1 %v6562_v44 }
 0xad5   :  { %5014 = vmatprep.subr.bf16.mxu0 %v6471_v47  ;;  %5046 = vmatprep.subr.bf16.mxu1 %v6473_v61 }
 0xb8a   :  { %v2826_v50 = vpop.f32.mrb[20].mxu0  ;;  %v2897_v63 = vpop.f32.mrb[36].mxu1 }
 0xb8b   :  { %v5353_v42 = vadd.f32 %v2826_v50, %v6617_v1  ;;  %v2828_v41 = vpop.f32.mrb[21].mxu0  ;;  %v2899_v5 = vpop.f32.mrb[37].mxu1  ;;  %v5369_v60 = vadd.f32 %v2897_v63, %v6632_v31 }
 0xb8c   :  { %v5354_v8 = vadd.f32 %v2828_v41, %v6621_v15  ;;  %v5370_v33 = vadd.f32 %v2899_v5, %v6627_v2 }
 0xb8d   :  { %v4030_v48 = vmul.f32 -1.442695, %v5353_v42 }
 0xb8e   :  { %v4031_v17 = vmul.f32 -1.442695, %v5354_v8  ;;  %v4032_v11 = vmul.f32 -1.442695, %v5370_v33 }
 0xb8f   :  { %5599 = vpow2.f32 %v4030_v48 }
 0xb90   :  { %5601 = vpow2.f32 %v4031_v17 }
 0xb91   :  { %5603 = vpow2.f32 %v4032_v11 }
 0xb92   :  { %5605 = vtanh.f32 %v5369_v60 }
 0xb99   :  { %v5600_v40 = vpop.eup %5599 }
 0xb9a   :  { %v5602_v19 = vpop.eup %5601  ;;  %v2909_v36 = vadd.f32 1.0, %v5600_v40 }
 0xb9b   :  { %v2915_v4 = vadd.f32 1.0, %v5602_v19  ;;  %v5604_v51 = vpop.eup %5603 }
 0xb9c   :  { %5607 = vrcp.f32 %v2909_v36  ;;  %v5606_v10 = vpop.eup %5605  ;;  %v2922_v53 = vadd.f32 1.0, %v5604_v51 }
 0xb9d   :  { %5609 = vrcp.f32 %v2915_v4 }
 0xb9e   :  { %5611 = vrcp.f32 %v2922_v53 }
 0xba6   :  { %v5608_v32 = vpop.eup %5607 }
 0xba7   :  { %v5610_v3 = vpop.eup %5609  ;;  %v2927_v16 = vmul.f32 %v5608_v32, %v5606_v10 }
 0xba8   :  { %v2926_v38 = vmul.f32 %v5610_v3, %v6681_v35  ;;  %v5612_v6 = vpop.eup %5611 }
 0xbaa   :  { %v6727_v39 = vadd.f32 %v2927_v16, %v2926_v38 }
 0xbac   :  { %5613 = vtanh.f32 %v6727_v39 }
 0xbb6   :  { %v5614_v50 = vpop.eup %5613 }
 0xbb7   :  { %v6730_v63 = vmul.f32 %v5614_v50, %v5612_v6 }
 0xbb9   :  { %3004 = vmatmul.mubr.f32.vlgmr.msra.gmra.mrb[22].mxu0 %v6730_v63  ;;  %3075 = vmatmul.mubr.f32.vlgmr.msra.gmra.mrb[38].mxu1 %v6730_v63 }
 0xbba   :  { %5016 = vmatpush1.bf16.msra.mxu0 %v6475_v62  ;;  %5048 = vmatpush1.bf16.msra.mxu1 %v6478_v54 }
 0xbbb   :  { %5018 = vmatprep.subr.bf16.mxu0 %v6483_v25  ;;  %5050 = vmatprep.subr.bf16.mxu1 %v6485_v43 }
 0xbbc   :  { %3182 = vmatprep.mubr.f32.mxu0 %v6959_v0  ;;  %3253 = vmatprep.mubr.f32.mxu1 %v6959_v0 }
 0xbbe   :  { %5020 = vmatpush1.bf16.msra.mxu0 %v6487_v21  ;;  %5052 = vmatpush1.bf16.msra.mxu1 %v6490_v23 }
 0xbbf   :  { %5022 = vmatprep.subr.bf16.mxu0 %v6495_v30  ;;  %5054 = vmatprep.subr.bf16.mxu1 %v6497_v28 }
 0xbc2   :  { %5024 = vmatpush1.bf16.msra.mxu0 %v6499_v49  ;;  %5056 = vmatpush1.bf16.msra.mxu1 %v6502_v55 }
 0xbc3   :  { %5026 = vmatprep.subr.bf16.mxu0 %v6507_v45  ;;  %5058 = vmatprep.subr.bf16.mxu1 %v6509_v37 }
 0xbc6   :  { %5028 = vmatpush1.bf16.msra.mxu0 %v6511_v27  ;;  %5060 = vmatpush1.bf16.msra.mxu1 %v6514_v26 }
 0xbc7   :  { %5030 = vmatprep.subr.bf16.mxu0 %v6518_v52  ;;  %5062 = vmatprep.subr.bf16.mxu1 %v6520_v57 }
 0xbca   :  { %5032 = vmatpush1.bf16.msra.mxu0 %v6523_v20  ;;  %5064 = vmatpush1.bf16.msra.mxu1 %v6527_v12 }
 0xbcb   :  { %5034 = vmatprep.subr.bf16.mxu0 %v6529_v24  ;;  %5066 = vmatprep.subr.bf16.mxu1 %v6531_v7 }
 0xbce   :  { %5036 = vmatpush1.bf16.msra.mxu0 %v6534_v56  ;;  %5068 = vmatpush1.bf16.msra.mxu1 %v6538_v58 }
 0xbcf   :  { %5038 = vmatprep.subr.bf16.mxu0 %v6540_v14  ;;  %5070 = vmatprep.subr.bf16.mxu1 %v6543_v46 }
 0xbd2   :  { %5040 = vmatpush1.bf16.msra.mxu0 %v6546_v9  ;;  %5072 = vmatpush1.bf16.msra.mxu1 %v6550_v18 }
 0xbd3   :  { %5042 = vmatprep.subr.bf16.mxu0 %v6555_v59  ;;  %5074 = vmatprep.subr.bf16.mxu1 %v6557_v13 }
 0xbd6   :  { %5044 = vmatpush1.bf16.msra.mxu0 %v6559_v22  ;;  %5076 = vmatpush1.bf16.msra.mxu1 %v6562_v44 }
 0xbd7   :  { %5078 = vmatprep.subr.bf16.mxu0 %v6471_v47  ;;  %5110 = vmatprep.subr.bf16.mxu1 %v6473_v61 }
 0xc8c   :  { %v3005_v35 = vpop.f32.mrb[22].mxu0  ;;  %v3076_v42 = vpop.f32.mrb[38].mxu1 }
 0xc8d   :  { %v5355_v41 = vadd.f32 %v3005_v35, %v6617_v1  ;;  %v3007_v5 = vpop.f32.mrb[23].mxu0  ;;  %v3078_v8 = vpop.f32.mrb[39].mxu1  ;;  %v5371_v40 = vadd.f32 %v3076_v42, %v6632_v31 }
 0xc8e   :  { %v5356_v48 = vadd.f32 %v3007_v5, %v6621_v15  ;;  %v5372_v11 = vadd.f32 %v3078_v8, %v6627_v2 }
 0xc8f   :  { %v4033_v17 = vmul.f32 -1.442695, %v5355_v41 }
 0xc90   :  { %v4034_v33 = vmul.f32 -1.442695, %v5356_v48  ;;  %v4035_v60 = vmul.f32 -1.442695, %v5372_v11 }
 0xc91   :  { %5615 = vpow2.f32 %v4033_v17 }
 0xc92   :  { %5617 = vpow2.f32 %v4034_v33 }
 0xc93   :  { %5619 = vpow2.f32 %v4035_v60 }
 0xc94   :  { %5621 = vtanh.f32 %v5371_v40 }
 0xc9b   :  { %v5616_v19 = vpop.eup %5615 }
 0xc9c   :  { %v5618_v36 = vpop.eup %5617  ;;  %v3088_v4 = vadd.f32 1.0, %v5616_v19 }
 0xc9d   :  { %v3094_v51 = vadd.f32 1.0, %v5618_v36  ;;  %v5620_v10 = vpop.eup %5619 }
 0xc9e   :  { %5623 = vrcp.f32 %v3088_v4  ;;  %v5622_v32 = vpop.eup %5621  ;;  %v3101_v38 = vadd.f32 1.0, %v5620_v10 }
 0xc9f   :  { %5625 = vrcp.f32 %v3094_v51 }
 0xca0   :  { %5627 = vrcp.f32 %v3101_v38 }
 0xca8   :  { %v5624_v3 = vpop.eup %5623 }
 0xca9   :  { %v5626_v16 = vpop.eup %5625  ;;  %v3106_v53 = vmul.f32 %v5624_v3, %v5622_v32 }
 0xcaa   :  { %v3105_v6 = vmul.f32 %v5626_v16, %v6727_v39  ;;  %v5628_v35 = vpop.eup %5627 }
 0xcac   :  { %v6773_v50 = vadd.f32 %v3106_v53, %v3105_v6 }
 0xcae   :  { %5629 = vtanh.f32 %v6773_v50 }
 0xcb8   :  { %v5630_v42 = vpop.eup %5629 }
 0xcb9   :  { %v6776_v41 = vmul.f32 %v5630_v42, %v5628_v35 }
 0xcbb   :  { %3183 = vmatmul.mubr.f32.vlgmr.msra.gmra.mrb[24].mxu0 %v6776_v41  ;;  %3254 = vmatmul.mubr.f32.vlgmr.msra.gmra.mrb[40].mxu1 %v6776_v41 }
 0xcbc   :  { %5080 = vmatpush1.bf16.msra.mxu0 %v6475_v62  ;;  %5112 = vmatpush1.bf16.msra.mxu1 %v6478_v54 }
 0xcbd   :  { %5082 = vmatprep.subr.bf16.mxu0 %v6483_v25  ;;  %5114 = vmatprep.subr.bf16.mxu1 %v6485_v43 }
 0xcbe   :  { %3361 = vmatprep.mubr.f32.mxu0 %v6959_v0  ;;  %3432 = vmatprep.mubr.f32.mxu1 %v6959_v0 }
 0xcc0   :  { %5084 = vmatpush1.bf16.msra.mxu0 %v6487_v21  ;;  %5116 = vmatpush1.bf16.msra.mxu1 %v6490_v23 }
 0xcc1   :  { %5086 = vmatprep.subr.bf16.mxu0 %v6495_v30  ;;  %5118 = vmatprep.subr.bf16.mxu1 %v6497_v28 }
 0xcc4   :  { %5088 = vmatpush1.bf16.msra.mxu0 %v6499_v49  ;;  %5120 = vmatpush1.bf16.msra.mxu1 %v6502_v55 }
 0xcc5   :  { %5090 = vmatprep.subr.bf16.mxu0 %v6507_v45  ;;  %5122 = vmatprep.subr.bf16.mxu1 %v6509_v37 }
 0xcc8   :  { %5092 = vmatpush1.bf16.msra.mxu0 %v6511_v27  ;;  %5124 = vmatpush1.bf16.msra.mxu1 %v6514_v26 }
 0xcc9   :  { %5094 = vmatprep.subr.bf16.mxu0 %v6518_v52  ;;  %5126 = vmatprep.subr.bf16.mxu1 %v6520_v57 }
 0xccc   :  { %5096 = vmatpush1.bf16.msra.mxu0 %v6523_v20  ;;  %5128 = vmatpush1.bf16.msra.mxu1 %v6527_v12 }
 0xccd   :  { %5098 = vmatprep.subr.bf16.mxu0 %v6529_v24  ;;  %5130 = vmatprep.subr.bf16.mxu1 %v6531_v7 }
 0xcd0   :  { %5100 = vmatpush1.bf16.msra.mxu0 %v6534_v56  ;;  %5132 = vmatpush1.bf16.msra.mxu1 %v6538_v58 }
 0xcd1   :  { %5102 = vmatprep.subr.bf16.mxu0 %v6540_v14  ;;  %5134 = vmatprep.subr.bf16.mxu1 %v6543_v46 }
 0xcd4   :  { %5104 = vmatpush1.bf16.msra.mxu0 %v6546_v9  ;;  %5136 = vmatpush1.bf16.msra.mxu1 %v6550_v18 }
 0xcd5   :  { %5106 = vmatprep.subr.bf16.mxu0 %v6555_v59  ;;  %5138 = vmatprep.subr.bf16.mxu1 %v6557_v13 }
 0xcd8   :  { %5108 = vmatpush1.bf16.msra.mxu0 %v6559_v22  ;;  %5140 = vmatpush1.bf16.msra.mxu1 %v6562_v44 }
 0xcd9   :  { %5142 = vmatprep.subr.bf16.mxu0 %v6471_v47  ;;  %5174 = vmatprep.subr.bf16.mxu1 %v6473_v61 }
 0xd8e   :  { %v3184_v39 = vpop.f32.mrb[24].mxu0  ;;  %v3255_v5 = vpop.f32.mrb[40].mxu1 }
 0xd8f   :  { %v5357_v8 = vadd.f32 %v3184_v39, %v6617_v1  ;;  %v3186_v48 = vpop.f32.mrb[25].mxu0  ;;  %v3257_v17 = vpop.f32.mrb[41].mxu1  ;;  %v5373_v36 = vadd.f32 %v3255_v5, %v6632_v31 }
 0xd90   :  { %v5358_v33 = vadd.f32 %v3186_v48, %v6621_v15  ;;  %v5374_v40 = vadd.f32 %v3257_v17, %v6627_v2 }
 0xd91   :  { %v4036_v11 = vmul.f32 -1.442695, %v5357_v8 }
 0xd92   :  { %v4037_v60 = vmul.f32 -1.442695, %v5358_v33  ;;  %v4038_v19 = vmul.f32 -1.442695, %v5374_v40 }
 0xd93   :  { %5631 = vpow2.f32 %v4036_v11 }
 0xd94   :  { %5633 = vpow2.f32 %v4037_v60 }
 0xd95   :  { %5635 = vpow2.f32 %v4038_v19 }
 0xd96   :  { %5637 = vtanh.f32 %v5373_v36 }
 0xd9d   :  { %v5632_v4 = vpop.eup %5631 }
 0xd9e   :  { %v5634_v51 = vpop.eup %5633  ;;  %v3267_v10 = vadd.f32 1.0, %v5632_v4 }
 0xd9f   :  { %v3273_v32 = vadd.f32 1.0, %v5634_v51  ;;  %v5636_v3 = vpop.eup %5635 }
 0xda0   :  { %5639 = vrcp.f32 %v3267_v10  ;;  %v5638_v16 = vpop.eup %5637  ;;  %v3280_v35 = vadd.f32 1.0, %v5636_v3 }
 0xda1   :  { %5641 = vrcp.f32 %v3273_v32 }
 0xda2   :  { %5643 = vrcp.f32 %v3280_v35 }
 0xdaa   :  { %v5640_v53 = vpop.eup %5639 }
 0xdab   :  { %v5642_v38 = vpop.eup %5641  ;;  %v3285_v6 = vmul.f32 %v5640_v53, %v5638_v16 }
 0xdac   :  { %v3284_v42 = vmul.f32 %v5642_v38, %v6773_v50  ;;  %v5644_v5 = vpop.eup %5643 }
 0xdae   :  { %v6819_v39 = vadd.f32 %v3285_v6, %v3284_v42 }
 0xdb0   :  { %5645 = vtanh.f32 %v6819_v39 }
 0xdba   :  { %v5646_v8 = vpop.eup %5645 }
 0xdbb   :  { %v6822_v48 = vmul.f32 %v5646_v8, %v5644_v5 }
 0xdbd   :  { %3362 = vmatmul.mubr.f32.vlgmr.msra.gmra.mrb[26].mxu0 %v6822_v48  ;;  %3433 = vmatmul.mubr.f32.vlgmr.msra.gmra.mrb[42].mxu1 %v6822_v48 }
 0xdbe   :  { %5144 = vmatpush1.bf16.msra.mxu0 %v6475_v62  ;;  %5176 = vmatpush1.bf16.msra.mxu1 %v6478_v54 }
 0xdbf   :  { %5146 = vmatprep.subr.bf16.mxu0 %v6483_v25  ;;  %5178 = vmatprep.subr.bf16.mxu1 %v6485_v43 }
 0xdc0   :  { %3540 = vmatprep.mubr.f32.mxu0 %v6959_v0  ;;  %3611 = vmatprep.mubr.f32.mxu1 %v6959_v0 }
 0xdc2   :  { %5148 = vmatpush1.bf16.msra.mxu0 %v6487_v21  ;;  %5180 = vmatpush1.bf16.msra.mxu1 %v6490_v23 }
 0xdc3   :  { %5150 = vmatprep.subr.bf16.mxu0 %v6495_v30  ;;  %5182 = vmatprep.subr.bf16.mxu1 %v6497_v28 }
 0xdc6   :  { %5152 = vmatpush1.bf16.msra.mxu0 %v6499_v49  ;;  %5184 = vmatpush1.bf16.msra.mxu1 %v6502_v55 }
 0xdc7   :  { %5154 = vmatprep.subr.bf16.mxu0 %v6507_v45  ;;  %5186 = vmatprep.subr.bf16.mxu1 %v6509_v37 }
 0xdca   :  { %5156 = vmatpush1.bf16.msra.mxu0 %v6511_v27  ;;  %5188 = vmatpush1.bf16.msra.mxu1 %v6514_v26 }
 0xdcb   :  { %5158 = vmatprep.subr.bf16.mxu0 %v6518_v52  ;;  %5190 = vmatprep.subr.bf16.mxu1 %v6520_v57 }
 0xdce   :  { %5160 = vmatpush1.bf16.msra.mxu0 %v6523_v20  ;;  %5192 = vmatpush1.bf16.msra.mxu1 %v6527_v12 }
 0xdcf   :  { %5162 = vmatprep.subr.bf16.mxu0 %v6529_v24  ;;  %5194 = vmatprep.subr.bf16.mxu1 %v6531_v7 }
 0xdd2   :  { %5164 = vmatpush1.bf16.msra.mxu0 %v6534_v56  ;;  %5196 = vmatpush1.bf16.msra.mxu1 %v6538_v58 }
 0xdd3   :  { %5166 = vmatprep.subr.bf16.mxu0 %v6540_v14  ;;  %5198 = vmatprep.subr.bf16.mxu1 %v6543_v46 }
 0xdd6   :  { %5168 = vmatpush1.bf16.msra.mxu0 %v6546_v9  ;;  %5200 = vmatpush1.bf16.msra.mxu1 %v6550_v18 }
 0xdd7   :  { %5170 = vmatprep.subr.bf16.mxu0 %v6555_v59  ;;  %5202 = vmatprep.subr.bf16.mxu1 %v6557_v13 }
 0xdda   :  { %5172 = vmatpush1.bf16.msra.mxu0 %v6559_v22  ;;  %5204 = vmatpush1.bf16.msra.mxu1 %v6562_v44 }
 0xddb   :  { %5206 = vmatprep.subr.bf16.mxu0 %v6471_v47  ;;  %5238 = vmatprep.subr.bf16.mxu1 %v6473_v61 }
 0xe90   :  { %v3363_v50 = vpop.f32.mrb[26].mxu0  ;;  %v3434_v17 = vpop.f32.mrb[42].mxu1 }
 0xe91   :  { %v5359_v33 = vadd.f32 %v3363_v50, %v6617_v1  ;;  %v3365_v11 = vpop.f32.mrb[27].mxu0  ;;  %v3436_v60 = vpop.f32.mrb[43].mxu1  ;;  %v5375_v10 = vadd.f32 %v3434_v17, %v6632_v31 }
 0xe92   :  { %v5360_v40 = vadd.f32 %v3365_v11, %v6621_v15  ;;  %v5376_v4 = vadd.f32 %v3436_v60, %v6627_v2  ;;  %v3841_v11 = vld [vmem:[#allocation12 + $0x20] sm:$0xff]  ;;  %v3842_v60 = vld [vmem:[#allocation12 + $0x28] sm:$0xff] }
 0xe93   :  { %v4039_v19 = vmul.f32 -1.442695, %v5359_v33 }
 0xe94   :  { %v4040_v36 = vmul.f32 -1.442695, %v5360_v40  ;;  %v4041_v51 = vmul.f32 -1.442695, %v5376_v4  ;;  %v5277_v40 = vpack.c.bf16 %v3842_v60, %v3841_v11 }
 0xe95   :  { %5647 = vpow2.f32 %v4039_v19  ;;  %v3843_v19 = vld [vmem:[#allocation12 + $0x30] sm:$0xff] }
 0xe96   :  { %5649 = vpow2.f32 %v4040_v36  ;;  %v3844_v36 = vld [vmem:[#allocation12 + $0x38] sm:$0xff] }
 0xe97   :  { %5651 = vpow2.f32 %v4041_v51  ;;  %v5281_v4 = vpack.c.bf16 %v3844_v36, %v3843_v19  ;;  %v3845_v51 = vld [vmem:[#allocation12 + $0x40] sm:$0xff] }
 0xe98   :  { %5653 = vtanh.f32 %v5375_v10  ;;  %v3846_v10 = vld [vmem:[#allocation12 + $0x48] sm:$0xff] }
 0xe9f   :  { %v5648_v47 = vpop.eup %5647 }
 0xea0   :  { %v5650_v32 = vpop.eup %5649  ;;  %v3446_v61 = vadd.f32 1.0, %v5648_v47  ;;  %v5285_v47 = vpack.c.bf16 %v3846_v10, %v3845_v51 }
 0xea1   :  { %v3452_v3 = vadd.f32 1.0, %v5650_v32  ;;  %v5652_v16 = vpop.eup %5651  ;;  %v3847_v32 = vld [vmem:[#allocation12 + $0x50] sm:$0xff] }
 0xea2   :  { %5655 = vrcp.f32 %v3446_v61  ;;  %v5654_v53 = vpop.eup %5653  ;;  %v3459_v42 = vadd.f32 1.0, %v5652_v16  ;;  %v3848_v61 = vld [vmem:[#allocation12 + $0x58] sm:$0xff]  ;;  %v3849_v16 = vld [vmem:[#allocation12 + $0x60] sm:$0xff] }
 0xea3   :  { %5657 = vrcp.f32 %v3452_v3  ;;  %v5289_v3 = vpack.c.bf16 %v3848_v61, %v3847_v32 }
 0xea4   :  { %5659 = vrcp.f32 %v3459_v42 }
 0xeac   :  { %v5656_v38 = vpop.eup %5655 }
 0xead   :  { %v5658_v6 = vpop.eup %5657  ;;  %v3464_v35 = vmul.f32 %v5656_v38, %v5654_v53  ;;  %v3850_v53 = vld [vmem:[#allocation12 + $0x68] sm:$0xff]  ;;  %v3851_v38 = vld [vmem:[#allocation12 + $0x70] sm:$0xff] }
 0xeae   :  { %v3463_v5 = vmul.f32 %v5658_v6, %v6819_v39  ;;  %v5660_v50 = vpop.eup %5659  ;;  %v3852_v6 = vld [vmem:[#allocation12 + $0x78] sm:$0xff] }
 0xeb0   :  { %v6865_v8 = vadd.f32 %v3464_v35, %v3463_v5  ;;  %v5297_v35 = vpack.c.bf16 %v3852_v6, %v3851_v38 }
 0xeb2   :  { %5661 = vtanh.f32 %v6865_v8 }
 0xebc   :  { %v5662_v17 = vpop.eup %5661 }
 0xebd   :  { %v6868_v33 = vmul.f32 %v5662_v17, %v5660_v50 }
 0xebf   :  { %3541 = vmatmul.mubr.f32.vlgmr.msra.gmra.mrb[28].mxu0 %v6868_v33  ;;  %3612 = vmatmul.mubr.f32.vlgmr.msra.gmra.mrb[44].mxu1 %v6868_v33 }
 0xec0   :  { %5208 = vmatpush1.bf16.msra.mxu0 %v6475_v62  ;;  %5240 = vmatpush1.bf16.msra.mxu1 %v6478_v54  ;;  %v3838_v62 = vld [vmem:[#allocation12 + $0x8] sm:$0xff] }
 0xec1   :  { %5210 = vmatprep.subr.bf16.mxu0 %v6483_v25  ;;  %5242 = vmatprep.subr.bf16.mxu1 %v6485_v43 }
 0xec2   :  { %3719 = vmatprep.mubr.f32.mxu0 %v6959_v0  ;;  %3790 = vmatprep.mubr.f32.mxu1 %v6959_v0  ;;  %v3837_v0 = vld [vmem:[#allocation12] sm:$0xff] }
 0xec3   :  { %v5269_v54 = vpack.c.bf16 %v3838_v62, %v3837_v0 }
 0xec4   :  { %5212 = vmatpush1.bf16.msra.mxu0 %v6487_v21  ;;  %5244 = vmatpush1.bf16.msra.mxu1 %v6490_v23 }
 0xec5   :  { %5214 = vmatprep.subr.bf16.mxu0 %v6495_v30  ;;  %5246 = vmatprep.subr.bf16.mxu1 %v6497_v28 }
 0xec8   :  { %5216 = vmatpush1.bf16.msra.mxu0 %v6499_v49  ;;  %5248 = vmatpush1.bf16.msra.mxu1 %v6502_v55 }
 0xec9   :  { %5218 = vmatprep.subr.bf16.mxu0 %v6507_v45  ;;  %5250 = vmatprep.subr.bf16.mxu1 %v6509_v37 }
 0xecc   :  { %5220 = vmatpush1.bf16.msra.mxu0 %v6511_v27  ;;  %5252 = vmatpush1.bf16.msra.mxu1 %v6514_v26 }
 0xecd   :  { %5222 = vmatprep.subr.bf16.mxu0 %v6518_v52  ;;  %5254 = vmatprep.subr.bf16.mxu1 %v6520_v57 }
 0xed0   :  { %5224 = vmatpush1.bf16.msra.mxu0 %v6523_v20  ;;  %5256 = vmatpush1.bf16.msra.mxu1 %v6527_v12 }
 0xed1   :  { %5226 = vmatprep.subr.bf16.mxu0 %v6529_v24  ;;  %5258 = vmatprep.subr.bf16.mxu1 %v6531_v7 }
 0xed4   :  { %5228 = vmatpush1.bf16.msra.mxu0 %v6534_v56  ;;  %5260 = vmatpush1.bf16.msra.mxu1 %v6538_v58 }
 0xed5   :  { %5230 = vmatprep.subr.bf16.mxu0 %v6540_v14  ;;  %5262 = vmatprep.subr.bf16.mxu1 %v6543_v46 }
 0xed8   :  { %5232 = vmatpush1.bf16.msra.mxu0 %v6546_v9  ;;  %5264 = vmatpush1.bf16.msra.mxu1 %v6550_v18  ;;  %v3839_v18 = vld [vmem:[#allocation12 + $0x10] sm:$0xff] }
 0xed9   :  { %5234 = vmatprep.subr.bf16.mxu0 %v6555_v59  ;;  %5266 = vmatprep.subr.bf16.mxu1 %v6557_v13  ;;  %v3840_v59 = vld [vmem:[#allocation12 + $0x18] sm:$0xff] }
 0xeda   :  { %v5273_v39 = vpack.c.bf16 %v3840_v59, %v3839_v18 }
 0xedc   :  { %5236 = vmatpush1.bf16.msra.mxu0 %v6559_v22  ;;  %5268 = vmatpush1.bf16.msra.mxu1 %v6562_v44 }
 0xedd   :  { %5270 = vmatprep.subr.bf16.mxu0 %v5269_v54 }
 0xf92   :  { %v3542_v25 = vpop.f32.mrb[28].mxu0  ;;  %v3613_v43 = vpop.f32.mrb[44].mxu1 }
 0xf93   :  { %v5361_v21 = vadd.f32 %v3542_v25, %v6617_v1  ;;  %v3544_v23 = vpop.f32.mrb[29].mxu0  ;;  %v3615_v30 = vpop.f32.mrb[45].mxu1  ;;  %v5377_v27 = vadd.f32 %v3613_v43, %v6632_v31 }
 0xf94   :  { %v5362_v28 = vadd.f32 %v3544_v23, %v6621_v15  ;;  %v5378_v45 = vadd.f32 %v3615_v30, %v6627_v2 }
 0xf95   :  { %v4042_v49 = vmul.f32 -1.442695, %v5361_v21 }
 0xf96   :  { %v4043_v55 = vmul.f32 -1.442695, %v5362_v28  ;;  %v4044_v37 = vmul.f32 -1.442695, %v5378_v45 }
 0xf97   :  { %5663 = vpow2.f32 %v4042_v49 }
 0xf98   :  { %5665 = vpow2.f32 %v4043_v55 }
 0xf99   :  { %5667 = vpow2.f32 %v4044_v37 }
 0xf9a   :  { %5669 = vtanh.f32 %v5377_v27 }
 0xfa1   :  { %v5664_v26 = vpop.eup %5663 }
 0xfa2   :  { %v5666_v52 = vpop.eup %5665  ;;  %v3625_v57 = vadd.f32 1.0, %v5664_v26 }
 0xfa3   :  { %v3631_v20 = vadd.f32 1.0, %v5666_v52  ;;  %v5668_v12 = vpop.eup %5667 }
 0xfa4   :  { %5671 = vrcp.f32 %v3625_v57  ;;  %v5670_v24 = vpop.eup %5669  ;;  %v3638_v14 = vadd.f32 1.0, %v5668_v12 }
 0xfa5   :  { %5673 = vrcp.f32 %v3631_v20 }
 0xfa6   :  { %5675 = vrcp.f32 %v3638_v14 }
 0xfae   :  { %v5672_v7 = vpop.eup %5671 }
 0xfaf   :  { %v5674_v56 = vpop.eup %5673  ;;  %v3643_v58 = vmul.f32 %v5672_v7, %v5670_v24 }
 0xfb0   :  { %v3642_v46 = vmul.f32 %v5674_v56, %v6865_v8  ;;  %v5676_v13 = vpop.eup %5675 }
 0xfb2   :  { %v6909_v9 = vadd.f32 %v3643_v58, %v3642_v46 }
 0xfb4   :  { %5677 = vtanh.f32 %v6909_v9 }
 0xfbe   :  { %v5678_v22 = vpop.eup %5677 }
 0xfbf   :  { %v3646_v44 = vmul.f32 %v5678_v22, %v5676_v13 }
 0xfc1   :  { %3720 = vmatmul.mubr.f32.vlgmr.msra.gmra.mrb[30].mxu0 %v3646_v44  ;;  %3791 = vmatmul.mubr.f32.vlgmr.msra.gmra.mrb[46].mxu1 %v3646_v44 }
 0xfc2   :  { %5272 = vmatpush3.bf16.msra.mxu0 %v5269_v54  ;;  %4105 = vmatprep.mubr.f32.mxu0 %v6638_v29  ;;  %v5293_v29 = vpack.c.bf16 %v3850_v53, %v3849_v16 }
 0xfc3   :  { %5274 = vmatprep.subr.bf16.mxu0 %v5273_v39 }
 0xfc6   :  { %5276 = vmatpush3.bf16.msra.mxu0 %v5273_v39 }
 0xfc7   :  { %5278 = vmatprep.subr.bf16.mxu0 %v5277_v40 }
 0xfca   :  { %5280 = vmatpush3.bf16.msra.mxu0 %v5277_v40 }
 0xfcb   :  { %5282 = vmatprep.subr.bf16.mxu0 %v5281_v4 }
 0xfce   :  { %5284 = vmatpush3.bf16.msra.mxu0 %v5281_v4 }
 0xfcf   :  { %5286 = vmatprep.subr.bf16.mxu0 %v5285_v47 }
 0xfd2   :  { %5288 = vmatpush3.bf16.msra.mxu0 %v5285_v47 }
 0xfd3   :  { %5290 = vmatprep.subr.bf16.mxu0 %v5289_v3 }
 0xfd6   :  { %5292 = vmatpush3.bf16.msra.mxu0 %v5289_v3 }
 0xfd7   :  { %5294 = vmatprep.subr.bf16.mxu0 %v5293_v29 }
 0xfda   :  { %5296 = vmatpush3.bf16.msra.mxu0 %v5293_v29 }
 0xfdb   :  { %5298 = vmatprep.subr.bf16.mxu0 %v5297_v35 }
 0xfde   :  { %5300 = vmatpush3.bf16.msra.mxu0 %v5297_v35 }
 0xfe1   :  { %4106 = vmatmul.mubr.f32.vlgmr.msra.gmra.mrb[32].mxu0 %v6684_v34 }
 0xfe2   :  { %4108 = vmatprep.mubr.f32.mxu0 %v6730_v63 }
 0xfe5   :  { %4109 = vmatmul.mubr.f32.gmra.mrb[34].mxu0 %v6776_v41 }
 0xfe6   :  { %4111 = vmatprep.mubr.f32.mxu0 %v6822_v48 }
 0xfe9   :  { %4112 = vmatmul.mubr.f32.gmra.mrb[36].mxu0 %v6868_v33 }
 0xfea   :  { %4114 = vmatprep.mubr.f32.mxu0 %v3646_v44 }
0x1094   :  { %v3721_v42 = vpop.f32.mrb[30].mxu0  ;;  %v3792_v5 = vpop.f32.mrb[46].mxu1 }
0x1095   :  { %v5363_v8 = vadd.f32 %v3721_v42, %v6617_v1  ;;  %v3723_v50 = vpop.f32.mrb[31].mxu0  ;;  %v3794_v17 = vpop.f32.mrb[47].mxu1  ;;  %v5379_v41 = vadd.f32 %v3792_v5, %v6632_v31 }
0x1096   :  { %v5364_v0 = vadd.f32 %v3723_v50, %v6621_v15  ;;  %v5380_v34 = vadd.f32 %v3794_v17, %v6627_v2  ;;  %v4048_v2 = vld [vmem:[%s6946_s5] ss:$0 sm:$0xff]  ;;  %s5822_s5 = smov [#allocation14]  }
0x1097   :  { %v4045_v62 = vmul.f32 -1.442695, %v5363_v8  ;;  %s3978_s27 = sshll.u32 %s5822_s5, 4  ;;  %s3979_s27 = int_to_ptr.vmem [resolvable:$true] %s3978_s27 }
0x1098   :  { %v4046_v54 = vmul.f32 -1.442695, %v5364_v0  ;;  %v4047_v63 = vmul.f32 -1.442695, %v5380_v34  ;;  %s5783_s28 = scalar_lea.vmem %s3979_s27, 1024  ;;  %p5788_p5 = scmp.lt.s32.totalorder %s3979_s27, %s3979_s27 }
0x1099   :  { %5679 = vpow2.f32 %v4045_v62  ;;  %p5784_p4 = scmp.ne.s32.totalorder %s3979_s27, %s5783_s28  ;;  %p5789_p6 = scmp.lt.s32.totalorder %s5783_s28, %s5783_s28 }
0x109a   :  { %5681 = vpow2.f32 %v4046_v54 }
0x109b   :  { %5683 = vpow2.f32 %v4047_v63  ;;  %p5790_p7 = por %p5789_p6, %p5788_p5 }
0x109c   :  { %5685 = vtanh.f32 %v5379_v41 }
0x109d   :  { %p5791_p8 = pnand %p5790_p7, %p5784_p4 }
0x10a3   :  { %v5680_v48 = vpop.eup %5679 }
0x10a4   :  { %v5682_v33 = vpop.eup %5681  ;;  %v3804_v25 = vadd.f32 1.0, %v5680_v48 }
0x10a5   :  { %v3810_v43 = vadd.f32 1.0, %v5682_v33  ;;  %v5684_v1 = vpop.eup %5683 }
0x10a6   :  { %5687 = vrcp.f32 %v3804_v25  ;;  %v5686_v21 = vpop.eup %5685  ;;  %v3817_v28 = vadd.f32 1.0, %v5684_v1 }
0x10a7   :  { %5689 = vrcp.f32 %v3810_v43 }
0x10a8   :  { %5691 = vrcp.f32 %v3817_v28 }
0x10b0   :  { %v5688_v15 = vpop.eup %5687 }
0x10b1   :  { %v5690_v23 = vpop.eup %5689  ;;  %v3822_v30 = vmul.f32 %v5688_v15, %v5686_v21 }
0x10b2   :  { %v3821_v49 = vmul.f32 %v5690_v23, %v6909_v9  ;;  %v5692_v58 = vpop.eup %5691 }
0x10b4   :  { %v4107_v31 = vpop.f32.mrb[32].mxu0  ;;  %v3823_v55 = vadd.f32 %v3822_v30, %v3821_v49 }
0x10b5   :  { %v3932_v45 = vadd.f32 %v4107_v31, %v4048_v2  ;;  %v3926_v37 = vpop.f32.mrb[33].mxu0 }
0x10b6   :  { %v3927_v27 = vadd.f32 %v4048_v2, %v3926_v37  ;;  %5693 = vtanh.f32 %v3823_v55 }
0x10b7   :  { %3966 = vst [vmem:[#allocation14 + $0x8] sm:$0xff] %v3932_v45 }
0x10b8   :  { %3965 = vst [vmem:[#allocation14] sm:$0xff] %v3927_v27  ;;  %v4110_v26 = vpop.f32.mrb[34].mxu0 }
0x10b9   :  { %v3942_v52 = vadd.f32 %v4110_v26, %v4048_v2  ;;  %v3936_v57 = vpop.f32.mrb[35].mxu0 }
0x10ba   :  { %v3937_v20 = vadd.f32 %v4048_v2, %v3936_v57 }
0x10bb   :  { %3968 = vst [vmem:[#allocation14 + $0x18] sm:$0xff] %v3942_v52 }
0x10bc   :  { %3967 = vst [vmem:[#allocation14 + $0x10] sm:$0xff] %v3937_v20  ;;  %v4113_v12 = vpop.f32.mrb[36].mxu0 }
0x10bd   :  { %v3952_v24 = vadd.f32 %v4113_v12, %v4048_v2  ;;  %v3946_v7 = vpop.f32.mrb[37].mxu0 }
0x10be   :  { %v3947_v56 = vadd.f32 %v4048_v2, %v3946_v7 }
0x10bf   :  { %3970 = vst [vmem:[#allocation14 + $0x28] sm:$0xff] %v3952_v24 }
0x10c0   :  { %v5694_v14 = vpop.eup %5693  ;;  %3969 = vst [vmem:[#allocation14 + $0x20] sm:$0xff] %v3947_v56 }
0x10c1   :  { %v3825_v46 = vmul.f32 %v5694_v14, %v5692_v58 }
0x10c3   :  { %4115 = vmatmul.mubr.f32.gmra.mrb[38].mxu0 %v3825_v46 }
0x1196   :  { %v4116_v9 = vpop.f32.mrb[38].mxu0 }
0x1197   :  { %v3962_v18 = vadd.f32 %v4116_v9, %v4048_v2  ;;  %v3956_v59 = vpop.f32.mrb[39].mxu0 }
0x1198   :  { %v3957_v13 = vadd.f32 %v4048_v2, %v3956_v59 }
0x1199   :  { %3972 = vst [vmem:[#allocation14 + $0x38] sm:$0xff] %v3962_v18 }
0x119a   :  { %3971 = vst [vmem:[#allocation14 + $0x30] sm:$0xff] %v3957_v13 }
0x119b   :  { %5794 = shalt.err (!%p5791_p8)
}
0x119c   :  { %s5795_s9 = scalar_lea.hbm %s6947_s6, 1024 }
0x119d   :  { %p5796_p9 = scmp.ne.s32.totalorder %s6947_s6, %s5795_s9  ;;  %p5799_p10 = scmp.lt.u32.totalorder %s5795_s9, %s6947_s6 }
0x119f   :  { %p5801_p11 = pnand %p5799_p10, %p5796_p9 }
0x11a1   :  { %5804 = shalt.err (!%p5801_p11)
}
0x11a2   :  { %3984 = dma.vmem_to_hbm [thread:$0]  %s3979_s27, 1024, %s6947_s6, [#allocation8], %s5817_s1, %s5817_s1, %s5818_s21  }
0x11a3   :  { %5811 = dma.done.wait [#allocation8], 1024  }
0x11a4   :  { %5812 = vsyncadd [#allocation8], 4294966272 }
0x11a5   :  { %3988 = vsyncpa [#allocation7], 1 }
0x11a6   :  { %3989 = vsyncpa [#allocation10], 1 }
0x11a7   :  { %3990 = vsyncpa [#allocation13], 1 }
0x11a8   :  { %3991 = vsyncpa [#allocation8], 1 }

</bundles_post_ra>
